<compile_context>
chip_gen: v6e
topology: v6e:2x2x1
jax: 0.10.0
libtpu: 0.0.40
codegen_flags: <defaults>
</compile_context>

<pallas_src>
import functools

import jax
import jax.numpy as jnp
from jax import lax
from jax.experimental import pallas as pl
from jax.experimental.pallas import tpu as pltpu

EPS = 1e-5
LANES = 128  # lane-dense channel padding for all intermediate activations


# ----------------------------------------------------------------------------
# Fused bottleneck kernel
# ----------------------------------------------------------------------------
def _bottleneck_kernel(*refs, stride, n, hh, wh, halo, use_downsample):
    if use_downsample:
        (x_ref, xs_ref, w1_ref, w2_ref, w3_ref, wd_ref, gb_ref,
         o_ref, h1s_ref) = refs
    else:
        x_ref, w1_ref, w2_ref, w3_ref, gb_ref, o_ref, h1s_ref = refs
        xs_ref = wd_ref = None

    cp = o_ref.shape[1]                  # 128 lanes
    mo = n * hh * wh                     # rows of the block output
    m = stride * stride * mo            # rows at full (pre-stride) resolution
    gb = gb_ref[...]                     # (8, cp): g1,b1,g2,b2,g3,b3,gd,bd

    def bn(y, gi, bi):
        # training-mode batch stats, scale/bias form (2 VPU ops / element)
        mean = jnp.mean(y, axis=0, keepdims=True)
        var = jnp.mean(y * y, axis=0, keepdims=True) - mean * mean
        scale = gb[gi:gi + 1, :] * lax.rsqrt(var + EPS)
        bias = gb[bi:bi + 1, :] - mean * scale
        return y * scale + bias

    # ---- conv1 (1x1) + BN + ReLU  (rows already in quadrant-major order) ---
    h1 = jnp.maximum(
        bn(jnp.dot(x_ref[...].astype(jnp.bfloat16), w1_ref[...],
                   preferred_element_type=jnp.float32), 0, 1), 0.0)

    # ---- stage h1 into a halo-padded VMEM scratch ---------------------------
    # Halo rows of zeros above/below make every 3x3 tap a memory-safe static
    # slice; in-image correctness of boundary rows comes from the masks below.
    zhalo = jnp.zeros((halo, cp), jnp.float32)
    h1s_ref[0:halo, :] = zhalo
    h1s_ref[halo + m:halo + m + halo, :] = zhalo
    h1s_ref[halo:halo + m, :] = h1

    # ---- conv2 (3x3, stride, pad=1) -----------------------------------------
    # boundary masks generated in-kernel from iota (no HBM traffic).
    rowf = lax.broadcasted_iota(jnp.int32, (mo, 1), 0).astype(jnp.float32)
    jmod = rowf - jnp.floor((rowf + 0.5) * (1.0 / wh)) * wh              # = j
    imod = rowf - jnp.floor((rowf + 0.5) * (1.0 / (hh * wh))) * (hh * wh)  # = i*wh+j
    m_i = {-1: (imod >= wh - 0.5).astype(jnp.float32),                  # i >= 1
           1: (imod <= (hh - 1) * wh - 0.5).astype(jnp.float32)}        # i <= hh-2
    m_j = {-1: (jmod >= 0.5).astype(jnp.float32),                       # j >= 1
           1: (jmod <= wh - 1.5).astype(jnp.float32)}                   # j <= wh-2

    taps = []
    for ky in (-1, 0, 1):
        a = ky % stride
        dy = (ky - a) // stride
        for kx in (-1, 0, 1):
            b = kx % stride
            dx = (kx - b) // stride
            # static row offset into the halo-padded quadrant-major scratch
            start = halo + (a * stride + b) * mo + dy * wh + dx
            q = h1s_ref[start:start + mo, :]                 # (mo, cp) f32
            mk = None
            if dy != 0:
                mk = m_i[dy]
            if dx != 0:
                mk = m_j[dx] if mk is None else mk * m_j[dx]
            if mk is not None:                               # per-row mask
                q = q * mk
            taps.append(q.astype(jnp.bfloat16))
    # one long-K matmul: (mo, 9*128) x (9*128, 128)
    h1cat = jnp.concatenate(taps, axis=1)
    acc = jnp.dot(h1cat, w2_ref[...], preferred_element_type=jnp.float32)
    h2 = jnp.maximum(bn(acc, 2, 3), 0.0)

    # ---- conv3 (1x1 expand) + BN -------------------------------------------
    y3 = bn(jnp.dot(h2.astype(jnp.bfloat16), w3_ref[...],
                    preferred_element_type=jnp.float32), 4, 5)

    # ---- residual branch + add + ReLU (residual loaded late) ----------------
    if use_downsample:
        res = bn(jnp.dot(xs_ref[...].astype(jnp.bfloat16), wd_ref[...],
                         preferred_element_type=jnp.float32), 6, 7)
    else:
        x_res = x_ref[...]                                   # (mo, cin_p) f32
        cin_p = x_res.shape[1]
        # lane-pad the identity shortcut to 128 via a tiny 0/1 matmul
        eye = (lax.broadcasted_iota(jnp.int32, (cin_p, cp), 0)
               == lax.broadcasted_iota(jnp.int32, (cin_p, cp), 1)
               ).astype(jnp.float32)
        res = jnp.dot(x_res, eye, preferred_element_type=jnp.float32)

    o_ref[...] = jnp.maximum(y3 + res, 0.0)


def _full(shape):
    # whole-array block (legal: block_shape == full array dims)
    return pl.BlockSpec(shape, lambda i: (0,) * len(shape))


# ----------------------------------------------------------------------------
# Wrapper: layout plumbing only (tiny one-time relayouts of inputs/weights)
# ----------------------------------------------------------------------------
def res_bottleneck_forward(x_nchw, params, stride, use_downsample):
    """Pallas implementation of ResBottleneck.forward (NCHW in / NCHW out)."""
    x = jnp.transpose(x_nchw, (0, 2, 3, 1)).astype(jnp.float32)     # NHWC
    n, h, w, cin = x.shape
    c = params["w1"].shape[0]
    cexp = params["w3"].shape[0]
    assert h % stride == 0 and w % stride == 0
    hh, wh = h // stride, w // stride
    m = n * h * w
    mo = n * hh * wh
    cp = LANES
    assert max(cin, c, cexp) <= cp
    cin_p = ((max(cin, 8) + 7) // 8) * 8       # sublane-rounded, NOT 128
    halo = ((wh + 1 + 7) // 8) * 8             # >= wh+1, 8-aligned
    bf = jnp.bfloat16

    # conv1 input: rows permuted to parity-quadrant-major (a, b, n, i, j);
    # channels kept narrow (cin_p lanes) -- no 128-lane padding in HBM.
    if stride == 1:
        xq = x.reshape(m, cin)
    else:
        xq = x.reshape(n, hh, stride, wh, stride, cin)
        xq = xq.transpose(2, 4, 0, 1, 3, 5).reshape(m, cin)
    xq = jnp.pad(xq, ((0, 0), (0, cin_p - cin)))

    # weights: lane-dense 128, bf16; conv2 in long-K (9*128, 128) layout.
    w1p = jnp.zeros((cin_p, cp), jnp.float32).at[:cin, :c].set(
        params["w1"][:, :, 0, 0].T).astype(bf)
    w2t = params["w2"].transpose(2, 3, 1, 0).reshape(9, c, c)   # (tap, ci, co)
    w2p = jnp.zeros((9, cp, cp), jnp.float32).at[:, :c, :c].set(w2t)
    w2p = w2p.reshape(9 * cp, cp).astype(bf)
    w3p = jnp.zeros((cp, cp), jnp.float32).at[:c, :cexp].set(
        params["w3"][:, :, 0, 0].T).astype(bf)

    def pad_vec(v):
        return jnp.pad(v, (0, cp - v.shape[0]))

    gb_rows = [pad_vec(params["g1"]), pad_vec(params["b1"]),
               pad_vec(params["g2"]), pad_vec(params["b2"]),
               pad_vec(params["g3"]), pad_vec(params["b3"])]

    if use_downsample:
        xs = x[:, ::stride, ::stride, :].reshape(mo, cin)
        xs = jnp.pad(xs, ((0, 0), (0, cin_p - cin)))
        wdp = jnp.zeros((cin_p, cp), jnp.float32).at[:cin, :cexp].set(
            params["wd"][:, :, 0, 0].T).astype(bf)
        gb_rows += [pad_vec(params["gd"]), pad_vec(params["bd"])]
        gb = jnp.stack(gb_rows)                                    # (8, cp)
        inputs = [xq, xs, w1p, w2p, w3p, wdp, gb]
        in_specs = [_full((m, cin_p)), _full((mo, cin_p)), _full((cin_p, cp)),
                    _full((9 * cp, cp)), _full((cp, cp)), _full((cin_p, cp)),
                    _full((8, cp))]
    else:
        assert stride == 1 and cin == cexp, \
            "identity shortcut requires stride == 1 and cin == cexp"
        gb_rows += [jnp.zeros((cp,), jnp.float32),
                    jnp.zeros((cp,), jnp.float32)]
        gb = jnp.stack(gb_rows)                                    # (8, cp)
        inputs = [xq, w1p, w2p, w3p, gb]
        in_specs = [_full((m, cin_p)), _full((cin_p, cp)), _full((9 * cp, cp)),
                    _full((cp, cp)), _full((8, cp))]

    kernel = functools.partial(
        _bottleneck_kernel, stride=stride, n=n, hh=hh, wh=wh, halo=halo,
        use_downsample=use_downsample)

    out_flat = pl.pallas_call(
        kernel,
        out_shape=jax.ShapeDtypeStruct((mo, cp), jnp.float32),
        grid=(1,),
        in_specs=in_specs,
        out_specs=_full((mo, cp)),
        scratch_shapes=[pltpu.VMEM((m + 2 * halo, cp), jnp.float32)],
        compiler_params=pltpu.CompilerParams(
            dimension_semantics=("arbitrary",)),
    )(*inputs)

    out = out_flat.reshape(n, hh, wh, cp)[..., :cexp]
    return jnp.transpose(out, (0, 3, 1, 2))                        # -> NCHW


# ----------------------------------------------------------------------------
# Pure-JAX reference (same semantics, via lax.conv) for verification
# ----------------------------------------------------------------------------
def _ref_forward(x, params, stride, use_downsample):
    def conv(x_, w_, s, p):
        return lax.conv_general_dilated(
            x_, w_, (s, s), [(p, p), (p, p)],
            dimension_numbers=("NCHW", "OIHW", "NCHW"))

    def bn(x_, g, b):
        mean = jnp.mean(x_, axis=(0, 2, 3), keepdims=True)
        var = jnp.mean((x_ - mean) ** 2, axis=(0, 2, 3), keepdims=True)
        return ((x_ - mean) * lax.rsqrt(var + EPS)
                * g.reshape(1, -1, 1, 1) + b.reshape(1, -1, 1, 1))

    h = jnp.maximum(bn(conv(x, params["w1"], 1, 0), params["g1"], params["b1"]), 0.0)
    h = jnp.maximum(bn(conv(h, params["w2"], stride, 1), params["g2"], params["b2"]), 0.0)
    h = bn(conv(h, params["w3"], 1, 0), params["g3"], params["b3"])
    if use_downsample:
        res = bn(conv(x, params["wd"], stride, 0), params["gd"], params["bd"])
    else:
        res = x
    return jnp.maximum(h + res, 0.0)


# ----------------------------------------------------------------------------
# Main
# ----------------------------------------------------------------------------
if __name__ == "__main__":
    fwd = jax.jit(res_bottleneck_forward, static_argnums=(2, 3))

    def check(out, ref, atol):
        err = float(jnp.max(jnp.abs(out - ref)))
        merr = float(jnp.mean(jnp.abs(out - ref)))
        # bf16 MXU operands (f32 accumulation) -> relaxed tolerance
        assert jnp.allclose(out, ref, atol=atol, rtol=atol), (err, merr)
        assert merr < 2.5e-2, merr

    # --- config 1: stride-2 bottleneck with Conv1x1+BN downsample -----------
    insize, outsize, stride, expfact = 4, 4, 2, 2
    cexp = outsize * expfact
    key = jax.random.PRNGKey(0)
    ks = jax.random.split(key, 12)
    params = {
        "w1": 0.1 * jax.random.normal(ks[0], (outsize, insize, 1, 1), jnp.float32),
        "w2": 0.1 * jax.random.normal(ks[1], (outsize, outsize, 3, 3), jnp.float32),
        "w3": 0.1 * jax.random.normal(ks[2], (cexp, outsize, 1, 1), jnp.float32),
        "wd": 0.1 * jax.random.normal(ks[3], (cexp, insize, 1, 1), jnp.float32),
        "g1": 1.0 + 0.1 * jax.random.normal(ks[4], (outsize,), jnp.float32),
        "b1": 0.1 * jax.random.normal(ks[5], (outsize,), jnp.float32),
        "g2": 1.0 + 0.1 * jax.random.normal(ks[6], (outsize,), jnp.float32),
        "b2": 0.1 * jax.random.normal(ks[7], (outsize,), jnp.float32),
        "g3": 1.0 + 0.1 * jax.random.normal(ks[8], (cexp,), jnp.float32),
        "b3": 0.1 * jax.random.normal(ks[9], (cexp,), jnp.float32),
        "gd": 1.0 + 0.1 * jax.random.normal(ks[10], (cexp,), jnp.float32),
        "bd": 0.1 * jax.random.normal(ks[11], (cexp,), jnp.float32),
    }
    x = jax.random.normal(jax.random.PRNGKey(1), (2, insize, 16, 16), jnp.float32)

    out = jax.block_until_ready(fwd(x, params, stride, True))
    ref = jax.block_until_ready(_ref_forward(x, params, stride, True))
    assert out.shape == (2, cexp, 8, 8), out.shape
    check(out, ref, 1e-1)

    # --- config 2: stride-1 bottleneck with identity shortcut ---------------
    insize2, outsize2, stride2, expfact2 = 8, 4, 1, 2
    cexp2 = outsize2 * expfact2                       # == insize2
    ks2 = jax.random.split(jax.random.PRNGKey(2), 9)
    params2 = {
        "w1": 0.1 * jax.random.normal(ks2[0], (outsize2, insize2, 1, 1), jnp.float32),
        "w2": 0.1 * jax.random.normal(ks2[1], (outsize2, outsize2, 3, 3), jnp.float32),
        "w3": 0.1 * jax.random.normal(ks2[2], (cexp2, outsize2, 1, 1), jnp.float32),
        "g1": 1.0 + 0.1 * jax.random.normal(ks2[3], (outsize2,), jnp.float32),
        "b1": 0.1 * jax.random.normal(ks2[4], (outsize2,), jnp.float32),
        "g2": 1.0 + 0.1 * jax.random.normal(ks2[5], (outsize2,), jnp.float32),
        "b2": 0.1 * jax.random.normal(ks2[6], (outsize2,), jnp.float32),
        "g3": 1.0 + 0.1 * jax.random.normal(ks2[7], (cexp2,), jnp.float32),
        "b3": 0.1 * jax.random.normal(ks2[8], (cexp2,), jnp.float32),
    }
    x2 = jax.random.normal(jax.random.PRNGKey(3), (2, insize2, 16, 16), jnp.float32)

    out2 = jax.block_until_ready(fwd(x2, params2, stride2, False))
    ref2 = jax.block_until_ready(_ref_forward(x2, params2, stride2, False))
    assert out2.shape == (2, cexp2, 16, 16), out2.shape
    check(out2, ref2, 1e-1)

    print("KERNEL_OK")
</pallas_src>

<mosaic_0001>
module attributes {stable_mosaic.version = 11 : i64} {
  func.func @_bottleneck_kernel(%arg0: i32, %arg1: memref<512x8xf32, #tpu.memory_space<vmem>>, %arg2: memref<128x8xf32, #tpu.memory_space<vmem>>, %arg3: memref<8x128xbf16, #tpu.memory_space<vmem>>, %arg4: memref<1152x128xbf16, #tpu.memory_space<vmem>>, %arg5: memref<128x128xbf16, #tpu.memory_space<vmem>>, %arg6: memref<8x128xbf16, #tpu.memory_space<vmem>>, %arg7: memref<8x128xf32, #tpu.memory_space<vmem>>, %arg8: memref<128x128xf32, #tpu.memory_space<vmem>>, %arg9: memref<544x128xf32, #tpu.memory_space<vmem>>) attributes {dimension_semantics = [#tpu.dimension_semantics<arbitrary>], iteration_bounds = array<i64: 1>, scalar_prefetch = 0 : i64, scratch_operands = 1 : i64, tpu.core_type = #tpu.core_type<tc>, window_params = [{pipeline_mode = #tpu.pipeline_mode<synchronous>, transform_indices = @transform_0, window_bounds = array<i64: 512, 8>}, {pipeline_mode = #tpu.pipeline_mode<synchronous>, transform_indices = @transform_1, window_bounds = array<i64: 128, 8>}, {pipeline_mode = #tpu.pipeline_mode<synchronous>, transform_indices = @transform_2, window_bounds = array<i64: 8, 128>}, {pipeline_mode = #tpu.pipeline_mode<synchronous>, transform_indices = @transform_3, window_bounds = array<i64: 1152, 128>}, {pipeline_mode = #tpu.pipeline_mode<synchronous>, transform_indices = @transform_4, window_bounds = array<i64: 128, 128>}, {pipeline_mode = #tpu.pipeline_mode<synchronous>, transform_indices = @transform_5, window_bounds = array<i64: 8, 128>}, {pipeline_mode = #tpu.pipeline_mode<synchronous>, transform_indices = @transform_6, window_bounds = array<i64: 8, 128>}, {pipeline_mode = #tpu.pipeline_mode<synchronous>, transform_indices = @transform_7, window_bounds = array<i64: 128, 128>}]} {
    %c0 = arith.constant 0 : index
    %c0_0 = arith.constant 0 : index
    %0 = vector.load %arg7[%c0, %c0_0] : memref<8x128xf32, #tpu.memory_space<vmem>>, vector<8x128xf32>
    %c0_1 = arith.constant 0 : index
    %c0_2 = arith.constant 0 : index
    %1 = vector.load %arg1[%c0_1, %c0_2] : memref<512x8xf32, #tpu.memory_space<vmem>>, vector<512x8xf32>
    %2 = arith.truncf %1 : vector<512x8xf32> to vector<512x8xbf16>
    %c0_3 = arith.constant 0 : index
    %c0_4 = arith.constant 0 : index
    %3 = vector.load %arg3[%c0_3, %c0_4] : memref<8x128xbf16, #tpu.memory_space<vmem>>, vector<8x128xbf16>
    %cst = arith.constant dense<0.000000e+00> : vector<512x128xf32>
    %4 = tpu.matmul %2, %3, %cst {dimension_numbers = #tpu.dot_dimension_numbers<[1], [0], [0], [1], [0, 0, 1, 1], [], []>} : vector<512x8xbf16>, vector<8x128xbf16>, vector<512x128xf32> -> vector<512x128xf32>
    %cst_5 = arith.constant dense<0.000000e+00> : vector<128xf32>
    %5 = vector.multi_reduction <add>, %4, %cst_5 [0] : vector<512x128xf32> to vector<128xf32>
    %6 = vector.shape_cast %5 : vector<128xf32> to vector<1x128xf32>
    %cst_6 = arith.constant 5.120000e+02 : f32
    %7 = vector.broadcast %cst_6 : f32 to vector<1x128xf32>
    %8 = arith.divf %6, %7 : vector<1x128xf32>
    %9 = arith.mulf %4, %4 : vector<512x128xf32>
    %cst_7 = arith.constant dense<0.000000e+00> : vector<128xf32>
    %10 = vector.multi_reduction <add>, %9, %cst_7 [0] : vector<512x128xf32> to vector<128xf32>
    %11 = vector.shape_cast %10 : vector<128xf32> to vector<1x128xf32>
    %cst_8 = arith.constant 5.120000e+02 : f32
    %12 = vector.broadcast %cst_8 : f32 to vector<1x128xf32>
    %13 = arith.divf %11, %12 : vector<1x128xf32>
    %14 = arith.mulf %8, %8 : vector<1x128xf32>
    %15 = arith.subf %13, %14 : vector<1x128xf32>
    %16 = vector.extract_strided_slice %0 {offsets = [0, 0], sizes = [1, 128], strides = [1, 1]} : vector<8x128xf32> to vector<1x128xf32>
    %cst_9 = arith.constant 9.99999974E-6 : f32
    %17 = vector.broadcast %cst_9 : f32 to vector<1x128xf32>
    %18 = arith.addf %15, %17 : vector<1x128xf32>
    %19 = math.rsqrt %18 : vector<1x128xf32>
    %20 = arith.mulf %16, %19 : vector<1x128xf32>
    %21 = vector.extract_strided_slice %0 {offsets = [1, 0], sizes = [1, 128], strides = [1, 1]} : vector<8x128xf32> to vector<1x128xf32>
    %22 = arith.mulf %8, %20 : vector<1x128xf32>
    %23 = arith.subf %21, %22 : vector<1x128xf32>
    %24 = vector.broadcast %20 : vector<1x128xf32> to vector<512x128xf32>
    %25 = arith.mulf %4, %24 : vector<512x128xf32>
    %26 = vector.broadcast %23 : vector<1x128xf32> to vector<512x128xf32>
    %27 = arith.addf %25, %26 : vector<512x128xf32>
    %cst_10 = arith.constant 0.000000e+00 : f32
    %28 = vector.broadcast %cst_10 : f32 to vector<512x128xf32>
    %29 = arith.maximumf %27, %28 : vector<512x128xf32>
    %cst_11 = arith.constant 0.000000e+00 : f32
    %30 = vector.broadcast %cst_11 : f32 to vector<16x128xf32>
    %c0_12 = arith.constant 0 : index
    %c0_13 = arith.constant 0 : index
    %31 = vector.load %arg9[%c0_12, %c0_13] : memref<544x128xf32, #tpu.memory_space<vmem>>, vector<16x128xf32>
    tpu.vector_store %arg9[%c0_12, %c0_13], %30 {strides = array<i32>} : memref<544x128xf32, #tpu.memory_space<vmem>>, vector<16x128xf32>,
    %c528 = arith.constant 528 : index
    %c0_14 = arith.constant 0 : index
    %32 = vector.load %arg9[%c528, %c0_14] : memref<544x128xf32, #tpu.memory_space<vmem>>, vector<16x128xf32>
    tpu.vector_store %arg9[%c528, %c0_14], %30 {strides = array<i32>} : memref<544x128xf32, #tpu.memory_space<vmem>>, vector<16x128xf32>,
    %c16 = arith.constant 16 : index
    %c0_15 = arith.constant 0 : index
    %33 = vector.load %arg9[%c16, %c0_15] : memref<544x128xf32, #tpu.memory_space<vmem>>, vector<512x128xf32>
    tpu.vector_store %arg9[%c16, %c0_15], %29 {strides = array<i32>} : memref<544x128xf32, #tpu.memory_space<vmem>>, vector<512x128xf32>,
    %34 = tpu.iota {dimensions = array<i32: 0>} : vector<128x1xi32>
    %35 = arith.sitofp %34 : vector<128x1xi32> to vector<128x1xf32>
    %cst_16 = arith.constant 5.000000e-01 : f32
    %36 = vector.broadcast %cst_16 : f32 to vector<128x1xf32>
    %37 = arith.addf %35, %36 : vector<128x1xf32>
    %cst_17 = arith.constant 1.250000e-01 : f32
    %38 = vector.broadcast %cst_17 : f32 to vector<128x1xf32>
    %39 = arith.mulf %37, %38 : vector<128x1xf32>
    %40 = math.floor %39 : vector<128x1xf32>
    %cst_18 = arith.constant 8.000000e+00 : f32
    %41 = vector.broadcast %cst_18 : f32 to vector<128x1xf32>
    %42 = arith.mulf %40, %41 : vector<128x1xf32>
    %43 = arith.subf %35, %42 : vector<128x1xf32>
    %cst_19 = arith.constant 5.000000e-01 : f32
    %44 = vector.broadcast %cst_19 : f32 to vector<128x1xf32>
    %45 = arith.addf %35, %44 : vector<128x1xf32>
    %cst_20 = arith.constant 1.562500e-02 : f32
    %46 = vector.broadcast %cst_20 : f32 to vector<128x1xf32>
    %47 = arith.mulf %45, %46 : vector<128x1xf32>
    %48 = math.floor %47 : vector<128x1xf32>
    %cst_21 = arith.constant 6.400000e+01 : f32
    %49 = vector.broadcast %cst_21 : f32 to vector<128x1xf32>
    %50 = arith.mulf %48, %49 : vector<128x1xf32>
    %51 = arith.subf %35, %50 : vector<128x1xf32>
    %cst_22 = arith.constant 7.500000e+00 : f32
    %52 = vector.broadcast %cst_22 : f32 to vector<128x1xf32>
    %53 = arith.cmpf oge, %51, %52 : vector<128x1xf32>
    %54 = arith.extui %53 : vector<128x1xi1> to vector<128x1xi32>
    %55 = arith.sitofp %54 : vector<128x1xi32> to vector<128x1xf32>
    %cst_23 = arith.constant 5.000000e-01 : f32
    %56 = vector.broadcast %cst_23 : f32 to vector<128x1xf32>
    %57 = arith.cmpf oge, %43, %56 : vector<128x1xf32>
    %58 = arith.extui %57 : vector<128x1xi1> to vector<128x1xi32>
    %59 = arith.sitofp %58 : vector<128x1xi32> to vector<128x1xf32>
    %c391 = arith.constant 391 : index
    %c0_24 = arith.constant 0 : index
    %60 = vector.load %arg9[%c391, %c0_24] : memref<544x128xf32, #tpu.memory_space<vmem>>, vector<128x128xf32>
    %61 = arith.mulf %55, %59 : vector<128x1xf32>
    %62 = vector.broadcast %61 : vector<128x1xf32> to vector<128x128xf32>
    %63 = arith.mulf %60, %62 : vector<128x128xf32>
    %64 = arith.truncf %63 : vector<128x128xf32> to vector<128x128xbf16>
    %c264 = arith.constant 264 : index
    %c0_25 = arith.constant 0 : index
    %65 = vector.load %arg9[%c264, %c0_25] : memref<544x128xf32, #tpu.memory_space<vmem>>, vector<128x128xf32>
    %66 = vector.broadcast %55 : vector<128x1xf32> to vector<128x128xf32>
    %67 = arith.mulf %65, %66 : vector<128x128xf32>
    %68 = arith.truncf %67 : vector<128x128xf32> to vector<128x128xbf16>
    %c392 = arith.constant 392 : index
    %c0_26 = arith.constant 0 : index
    %69 = vector.load %arg9[%c392, %c0_26] : memref<544x128xf32, #tpu.memory_space<vmem>>, vector<128x128xf32>
    %70 = vector.broadcast %55 : vector<128x1xf32> to vector<128x128xf32>
    %71 = arith.mulf %69, %70 : vector<128x128xf32>
    %72 = arith.truncf %71 : vector<128x128xf32> to vector<128x128xbf16>
    %c143 = arith.constant 143 : index
    %c0_27 = arith.constant 0 : index
    %73 = vector.load %arg9[%c143, %c0_27] : memref<544x128xf32, #tpu.memory_space<vmem>>, vector<128x128xf32>
    %74 = vector.broadcast %59 : vector<128x1xf32> to vector<128x128xf32>
    %75 = arith.mulf %73, %74 : vector<128x128xf32>
    %76 = arith.truncf %75 : vector<128x128xf32> to vector<128x128xbf16>
    %c16_28 = arith.constant 16 : index
    %c0_29 = arith.constant 0 : index
    %77 = vector.load %arg9[%c16_28, %c0_29] : memref<544x128xf32, #tpu.memory_space<vmem>>, vector<128x128xf32>
    %78 = arith.truncf %77 : vector<128x128xf32> to vector<128x128xbf16>
    %c144 = arith.constant 144 : index
    %c0_30 = arith.constant 0 : index
    %79 = vector.load %arg9[%c144, %c0_30] : memref<544x128xf32, #tpu.memory_space<vmem>>, vector<128x128xf32>
    %80 = arith.truncf %79 : vector<128x128xf32> to vector<128x128xbf16>
    %c399 = arith.constant 399 : index
    %c0_31 = arith.constant 0 : index
    %81 = vector.load %arg9[%c399, %c0_31] : memref<544x128xf32, #tpu.memory_space<vmem>>, vector<128x128xf32>
    %82 = vector.broadcast %59 : vector<128x1xf32> to vector<128x128xf32>
    %83 = arith.mulf %81, %82 : vector<128x128xf32>
    %84 = arith.truncf %83 : vector<128x128xf32> to vector<128x128xbf16>
    %c272 = arith.constant 272 : index
    %c0_32 = arith.constant 0 : index
    %85 = vector.load %arg9[%c272, %c0_32] : memref<544x128xf32, #tpu.memory_space<vmem>>, vector<128x128xf32>
    %86 = arith.truncf %85 : vector<128x128xf32> to vector<128x128xbf16>
    %c400 = arith.constant 400 : index
    %c0_33 = arith.constant 0 : index
    %87 = vector.load %arg9[%c400, %c0_33] : memref<544x128xf32, #tpu.memory_space<vmem>>, vector<128x128xf32>
    %88 = arith.truncf %87 : vector<128x128xf32> to vector<128x128xbf16>
    %89 = tpu.concatenate %64, %68, %72, %76, %78, %80, %84, %86, %88 in 1 : vector<128x128xbf16>, vector<128x128xbf16>, vector<128x128xbf16>, vector<128x128xbf16>, vector<128x128xbf16>, vector<128x128xbf16>, vector<128x128xbf16>, vector<128x128xbf16>, vector<128x128xbf16> -> vector<128x1152xbf16>
    %c0_34 = arith.constant 0 : index
    %c0_35 = arith.constant 0 : index
    %90 = vector.load %arg4[%c0_34, %c0_35] : memref<1152x128xbf16, #tpu.memory_space<vmem>>, vector<1152x128xbf16>
    %cst_36 = arith.constant dense<0.000000e+00> : vector<128x128xf32>
    %91 = tpu.matmul %89, %90, %cst_36 {dimension_numbers = #tpu.dot_dimension_numbers<[1], [0], [0], [1], [0, 0, 1, 1], [], []>} : vector<128x1152xbf16>, vector<1152x128xbf16>, vector<128x128xf32> -> vector<128x128xf32>
    %cst_37 = arith.constant dense<0.000000e+00> : vector<128xf32>
    %92 = vector.multi_reduction <add>, %91, %cst_37 [0] : vector<128x128xf32> to vector<128xf32>
    %93 = vector.shape_cast %92 : vector<128xf32> to vector<1x128xf32>
    %cst_38 = arith.constant 1.280000e+02 : f32
    %94 = vector.broadcast %cst_38 : f32 to vector<1x128xf32>
    %95 = arith.divf %93, %94 : vector<1x128xf32>
    %96 = arith.mulf %91, %91 : vector<128x128xf32>
    %cst_39 = arith.constant dense<0.000000e+00> : vector<128xf32>
    %97 = vector.multi_reduction <add>, %96, %cst_39 [0] : vector<128x128xf32> to vector<128xf32>
    %98 = vector.shape_cast %97 : vector<128xf32> to vector<1x128xf32>
    %cst_40 = arith.constant 1.280000e+02 : f32
    %99 = vector.broadcast %cst_40 : f32 to vector<1x128xf32>
    %100 = arith.divf %98, %99 : vector<1x128xf32>
    %101 = arith.mulf %95, %95 : vector<1x128xf32>
    %102 = arith.subf %100, %101 : vector<1x128xf32>
    %103 = vector.extract_strided_slice %0 {offsets = [2, 0], sizes = [1, 128], strides = [1, 1]} : vector<8x128xf32> to vector<1x128xf32>
    %cst_41 = arith.constant 9.99999974E-6 : f32
    %104 = vector.broadcast %cst_41 : f32 to vector<1x128xf32>
    %105 = arith.addf %102, %104 : vector<1x128xf32>
    %106 = math.rsqrt %105 : vector<1x128xf32>
    %107 = arith.mulf %103, %106 : vector<1x128xf32>
    %108 = vector.extract_strided_slice %0 {offsets = [3, 0], sizes = [1, 128], strides = [1, 1]} : vector<8x128xf32> to vector<1x128xf32>
    %109 = arith.mulf %95, %107 : vector<1x128xf32>
    %110 = arith.subf %108, %109 : vector<1x128xf32>
    %111 = vector.broadcast %107 : vector<1x128xf32> to vector<128x128xf32>
    %112 = arith.mulf %91, %111 : vector<128x128xf32>
    %113 = vector.broadcast %110 : vector<1x128xf32> to vector<128x128xf32>
    %114 = arith.addf %112, %113 : vector<128x128xf32>
    %cst_42 = arith.constant 0.000000e+00 : f32
    %115 = vector.broadcast %cst_42 : f32 to vector<128x128xf32>
    %116 = arith.maximumf %114, %115 : vector<128x128xf32>
    %117 = arith.truncf %116 : vector<128x128xf32> to vector<128x128xbf16>
    %c0_43 = arith.constant 0 : index
    %c0_44 = arith.constant 0 : index
    %118 = vector.load %arg5[%c0_43, %c0_44] : memref<128x128xbf16, #tpu.memory_space<vmem>>, vector<128x128xbf16>
    %cst_45 = arith.constant dense<0.000000e+00> : vector<128x128xf32>
    %119 = tpu.matmul %117, %118, %cst_45 {dimension_numbers = #tpu.dot_dimension_numbers<[1], [0], [0], [1], [0, 0, 1, 1], [], []>} : vector<128x128xbf16>, vector<128x128xbf16>, vector<128x128xf32> -> vector<128x128xf32>
    %cst_46 = arith.constant dense<0.000000e+00> : vector<128xf32>
    %120 = vector.multi_reduction <add>, %119, %cst_46 [0] : vector<128x128xf32> to vector<128xf32>
    %121 = vector.shape_cast %120 : vector<128xf32> to vector<1x128xf32>
    %cst_47 = arith.constant 1.280000e+02 : f32
    %122 = vector.broadcast %cst_47 : f32 to vector<1x128xf32>
    %123 = arith.divf %121, %122 : vector<1x128xf32>
    %124 = arith.mulf %119, %119 : vector<128x128xf32>
    %cst_48 = arith.constant dense<0.000000e+00> : vector<128xf32>
    %125 = vector.multi_reduction <add>, %124, %cst_48 [0] : vector<128x128xf32> to vector<128xf32>
    %126 = vector.shape_cast %125 : vector<128xf32> to vector<1x128xf32>
    %cst_49 = arith.constant 1.280000e+02 : f32
    %127 = vector.broadcast %cst_49 : f32 to vector<1x128xf32>
    %128 = arith.divf %126, %127 : vector<1x128xf32>
    %129 = arith.mulf %123, %123 : vector<1x128xf32>
    %130 = arith.subf %128, %129 : vector<1x128xf32>
    %131 = vector.extract_strided_slice %0 {offsets = [4, 0], sizes = [1, 128], strides = [1, 1]} : vector<8x128xf32> to vector<1x128xf32>
    %cst_50 = arith.constant 9.99999974E-6 : f32
    %132 = vector.broadcast %cst_50 : f32 to vector<1x128xf32>
    %133 = arith.addf %130, %132 : vector<1x128xf32>
    %134 = math.rsqrt %133 : vector<1x128xf32>
    %135 = arith.mulf %131, %134 : vector<1x128xf32>
    %136 = vector.extract_strided_slice %0 {offsets = [5, 0], sizes = [1, 128], strides = [1, 1]} : vector<8x128xf32> to vector<1x128xf32>
    %137 = arith.mulf %123, %135 : vector<1x128xf32>
    %138 = arith.subf %136, %137 : vector<1x128xf32>
    %139 = vector.broadcast %135 : vector<1x128xf32> to vector<128x128xf32>
    %140 = arith.mulf %119, %139 : vector<128x128xf32>
    %141 = vector.broadcast %138 : vector<1x128xf32> to vector<128x128xf32>
    %142 = arith.addf %140, %141 : vector<128x128xf32>
    %c0_51 = arith.constant 0 : index
    %c0_52 = arith.constant 0 : index
    %143 = vector.load %arg2[%c0_51, %c0_52] : memref<128x8xf32, #tpu.memory_space<vmem>>, vector<128x8xf32>
    %144 = arith.truncf %143 : vector<128x8xf32> to vector<128x8xbf16>
    %c0_53 = arith.constant 0 : index
    %c0_54 = arith.constant 0 : index
    %145 = vector.load %arg6[%c0_53, %c0_54] : memref<8x128xbf16, #tpu.memory_space<vmem>>, vector<8x128xbf16>
    %cst_55 = arith.constant dense<0.000000e+00> : vector<128x128xf32>
    %146 = tpu.matmul %144, %145, %cst_55 {dimension_numbers = #tpu.dot_dimension_numbers<[1], [0], [0], [1], [0, 0, 1, 1], [], []>} : vector<128x8xbf16>, vector<8x128xbf16>, vector<128x128xf32> -> vector<128x128xf32>
    %cst_56 = arith.constant dense<0.000000e+00> : vector<128xf32>
    %147 = vector.multi_reduction <add>, %146, %cst_56 [0] : vector<128x128xf32> to vector<128xf32>
    %148 = vector.shape_cast %147 : vector<128xf32> to vector<1x128xf32>
    %cst_57 = arith.constant 1.280000e+02 : f32
    %149 = vector.broadcast %cst_57 : f32 to vector<1x128xf32>
    %150 = arith.divf %148, %149 : vector<1x128xf32>
    %151 = arith.mulf %146, %146 : vector<128x128xf32>
    %cst_58 = arith.constant dense<0.000000e+00> : vector<128xf32>
    %152 = vector.multi_reduction <add>, %151, %cst_58 [0] : vector<128x128xf32> to vector<128xf32>
    %153 = vector.shape_cast %152 : vector<128xf32> to vector<1x128xf32>
    %cst_59 = arith.constant 1.280000e+02 : f32
    %154 = vector.broadcast %cst_59 : f32 to vector<1x128xf32>
    %155 = arith.divf %153, %154 : vector<1x128xf32>
    %156 = arith.mulf %150, %150 : vector<1x128xf32>
    %157 = arith.subf %155, %156 : vector<1x128xf32>
    %158 = vector.extract_strided_slice %0 {offsets = [6, 0], sizes = [1, 128], strides = [1, 1]} : vector<8x128xf32> to vector<1x128xf32>
    %cst_60 = arith.constant 9.99999974E-6 : f32
    %159 = vector.broadcast %cst_60 : f32 to vector<1x128xf32>
    %160 = arith.addf %157, %159 : vector<1x128xf32>
    %161 = math.rsqrt %160 : vector<1x128xf32>
    %162 = arith.mulf %158, %161 : vector<1x128xf32>
    %163 = vector.extract_strided_slice %0 {offsets = [7, 0], sizes = [1, 128], strides = [1, 1]} : vector<8x128xf32> to vector<1x128xf32>
    %164 = arith.mulf %150, %162 : vector<1x128xf32>
    %165 = arith.subf %163, %164 : vector<1x128xf32>
    %166 = vector.broadcast %162 : vector<1x128xf32> to vector<128x128xf32>
    %167 = arith.mulf %146, %166 : vector<128x128xf32>
    %168 = vector.broadcast %165 : vector<1x128xf32> to vector<128x128xf32>
    %169 = arith.addf %167, %168 : vector<128x128xf32>
    %170 = arith.addf %142, %169 : vector<128x128xf32>
    %cst_61 = arith.constant 0.000000e+00 : f32
    %171 = vector.broadcast %cst_61 : f32 to vector<128x128xf32>
    %172 = arith.maximumf %170, %171 : vector<128x128xf32>
    %c0_62 = arith.constant 0 : index
    %c0_63 = arith.constant 0 : index
    %173 = vector.load %arg8[%c0_62, %c0_63] : memref<128x128xf32, #tpu.memory_space<vmem>>, vector<128x128xf32>
    tpu.vector_store %arg8[%c0_62, %c0_63], %172 {strides = array<i32>} : memref<128x128xf32, #tpu.memory_space<vmem>>, vector<128x128xf32>,
    return
  }
  func.func @transform_0(%arg0: i32) -> (i32, i32) {
    %c0_i32 = arith.constant 0 : i32
    %c0_i32_0 = arith.constant 0 : i32
    %c0_i32_1 = arith.constant 0 : i32
    return %c0_i32, %c0_i32_0 : i32, i32
  }
  func.func @transform_1(%arg0: i32) -> (i32, i32) {
    %c0_i32 = arith.constant 0 : i32
    %c0_i32_0 = arith.constant 0 : i32
    %c0_i32_1 = arith.constant 0 : i32
    return %c0_i32, %c0_i32_0 : i32, i32
  }
  func.func @transform_2(%arg0: i32) -> (i32, i32) {
    %c0_i32 = arith.constant 0 : i32
    %c0_i32_0 = arith.constant 0 : i32
    %c0_i32_1 = arith.constant 0 : i32
    return %c0_i32, %c0_i32_0 : i32, i32
  }
  func.func @transform_3(%arg0: i32) -> (i32, i32) {
    %c0_i32 = arith.constant 0 : i32
    %c0_i32_0 = arith.constant 0 : i32
    %c0_i32_1 = arith.constant 0 : i32
    return %c0_i32, %c0_i32_0 : i32, i32
  }
  func.func @transform_4(%arg0: i32) -> (i32, i32) {
    %c0_i32 = arith.constant 0 : i32
    %c0_i32_0 = arith.constant 0 : i32
    %c0_i32_1 = arith.constant 0 : i32
    return %c0_i32, %c0_i32_0 : i32, i32
  }
  func.func @transform_5(%arg0: i32) -> (i32, i32) {
    %c0_i32 = arith.constant 0 : i32
    %c0_i32_0 = arith.constant 0 : i32
    %c0_i32_1 = arith.constant 0 : i32
    return %c0_i32, %c0_i32_0 : i32, i32
  }
  func.func @transform_6(%arg0: i32) -> (i32, i32) {
    %c0_i32 = arith.constant 0 : i32
    %c0_i32_0 = arith.constant 0 : i32
    %c0_i32_1 = arith.constant 0 : i32
    return %c0_i32, %c0_i32_0 : i32, i32
  }
  func.func @transform_7(%arg0: i32) -> (i32, i32) {
    %c0_i32 = arith.constant 0 : i32
    %c0_i32_0 = arith.constant 0 : i32
    %c0_i32_1 = arith.constant 0 : i32
    return %c0_i32, %c0_i32_0 : i32, i32
  }
}

</mosaic_0001>

<bundles_post_ra>
// kernel: res_bottleneck_forward.1
= control target key start
LH: loop header
LB: loop body
LE: loop exit
PB: predicated region body
PF: predicated region fallthrough
CT: control target
= control target key end

     0   :  { %vm222_vm0 = vcmask 1043456   ;;  %vm125_vm1 = vcmask 64512   ;;  %s6918_s2 = inlined_call_operand.vmem [shape: bf16[8,128], index: 2, kind: input, shape index: {}]   ;;  %s6919_s0 = inlined_call_operand.vmem [shape: f32[512,8], index: 0, kind: input, shape index: {}]   ;;  %s6920_s3 = inlined_call_operand.vmem [shape: bf16[1152,128], index: 3, kind: input, shape index: {}]   ;;  %s6921_s6 = inlined_call_operand.vmem [shape: f32[8,128], index: 6, kind: input, shape index: {}]   ;;  %s6922_s5 = inlined_call_operand.vmem [shape: bf16[8,128], index: 5, kind: input, shape index: {}]   ;;  %s6923_s1 = inlined_call_operand.vmem [shape: f32[128,8], index: 1, kind: input, shape index: {}]   ;;  %s6924_s4 = inlined_call_operand.vmem [shape: bf16[128,128], index: 4, kind: input, shape index: {}]   ;;  %s6925_s7 = inlined_call_operand.vmem [shape: f32[128,128], index: 7, kind: output, shape index: {}]  }
   0x1   :  { %v124_v0 = vld [vmem:[%s6918_s2] sm:$0xf]  ;;  %v29_v2 = vld [vmem:[%s6919_s0 + $0x8] sm:$0xff]  ;;  %v30_v5 = vld [vmem:[%s6919_s0 + $0x10] sm:$0xff] }
   0x2   :  { %v28_v1 = vld [vmem:[%s6919_s0] sm:$0xff]  ;;  %3944 = vmatprep.subr.msk.bf16.mxu0 %vm222_vm0, %v124_v0  ;;  %v224_v3 = vsel %vm222_vm0, %v124_v0, 0  ;;  %v31_v6 = vld [vmem:[%s6919_s0 + $0x18] sm:$0xff]  ;;  %v33_v9 = vld [vmem:[%s6919_s0 + $0x28] sm:$0xff] }
   0x3   :  { %v92_v4 = vpack.c.bf16 %v29_v2, %v28_v1  ;;  %v32_v7 = vld [vmem:[%s6919_s0 + $0x20] sm:$0xff]  ;;  %3797 = vmatpush3.bf16.msra.mxu0 %v224_v3  ;;  %v93_v8 = vpack.c.bf16 %v31_v6, %v30_v5  ;;  %v34_v11 = vld [vmem:[%s6919_s0 + $0x30] sm:$0xff]  ;;  %v35_v12 = vld [vmem:[%s6919_s0 + $0x38] sm:$0xff] }
   0x4   :  { %v94_v10 = vpack.c.bf16 %v33_v9, %v32_v7  ;;  %v36_v13 = vld [vmem:[%s6919_s0 + $0x40] sm:$0xff]  ;;  %v37_v14 = vld [vmem:[%s6919_s0 + $0x48] sm:$0xff]  ;;  %v95_v15 = vpack.c.bf16 %v35_v12, %v34_v11  ;;  %v38_v17 = vld [vmem:[%s6919_s0 + $0x50] sm:$0xff] }
   0x5   :  { %3798 = vmatprep.mubr.msk.bf16.mxu0 %vm125_vm1, %v92_v4  ;;  %v96_v16 = vpack.c.bf16 %v37_v14, %v36_v13  ;;  %v39_v18 = vld [vmem:[%s6919_s0 + $0x58] sm:$0xff]  ;;  %v40_v19 = vld [vmem:[%s6919_s0 + $0x60] sm:$0xff]  ;;  %v41_v20 = vld [vmem:[%s6919_s0 + $0x68] sm:$0xff] }
   0x6   :  { %3799 = vmatmul.mubr.msk.bf16.vlgmr.msra.gmra.mxu0 %vm125_vm1, %v93_v8  ;;  %v97_v21 = vpack.c.bf16 %v39_v18, %v38_v17  ;;  %v98_v22 = vpack.c.bf16 %v41_v20, %v40_v19  ;;  %v42_v23 = vld [vmem:[%s6919_s0 + $0x70] sm:$0xff]  ;;  %v43_v24 = vld [vmem:[%s6919_s0 + $0x78] sm:$0xff]  ;;  %v44_v25 = vld [vmem:[%s6919_s0 + $0x80] sm:$0xff] }
   0x7   :  { %3802 = vmatprep.mubr.msk.bf16.mxu0 %vm125_vm1, %v94_v10  ;;  %v45_v26 = vld [vmem:[%s6919_s0 + $0x88] sm:$0xff]  ;;  %v99_v27 = vpack.c.bf16 %v43_v24, %v42_v23  ;;  %v46_v29 = vld [vmem:[%s6919_s0 + $0x90] sm:$0xff]  ;;  %v47_v30 = vld [vmem:[%s6919_s0 + $0x98] sm:$0xff] }
   0x8   :  { %v100_v28 = vpack.c.bf16 %v45_v26, %v44_v25  ;;  %v48_v31 = vld [vmem:[%s6919_s0 + $0xa0] sm:$0xff]  ;;  %v49_v32 = vld [vmem:[%s6919_s0 + $0xa8] sm:$0xff]  ;;  %v101_v33 = vpack.c.bf16 %v47_v30, %v46_v29  ;;  %v50_v35 = vld [vmem:[%s6919_s0 + $0xb0] sm:$0xff] }
   0x9   :  { %v102_v34 = vpack.c.bf16 %v49_v32, %v48_v31  ;;  %v51_v36 = vld [vmem:[%s6919_s0 + $0xb8] sm:$0xff]  ;;  %v52_v37 = vld [vmem:[%s6919_s0 + $0xc0] sm:$0xff]  ;;  %v53_v38 = vld [vmem:[%s6919_s0 + $0xc8] sm:$0xff] }
   0xa   :  { %v103_v39 = vpack.c.bf16 %v51_v36, %v50_v35  ;;  %v104_v40 = vpack.c.bf16 %v53_v38, %v52_v37  ;;  %v54_v41 = vld [vmem:[%s6919_s0 + $0xd0] sm:$0xff]  ;;  %v55_v42 = vld [vmem:[%s6919_s0 + $0xd8] sm:$0xff]  ;;  %v56_v43 = vld [vmem:[%s6919_s0 + $0xe0] sm:$0xff] }
   0xb   :  { %v57_v44 = vld [vmem:[%s6919_s0 + $0xe8] sm:$0xff]  ;;  %v105_v45 = vpack.c.bf16 %v55_v42, %v54_v41  ;;  %v58_v47 = vld [vmem:[%s6919_s0 + $0xf0] sm:$0xff]  ;;  %v59_v48 = vld [vmem:[%s6919_s0 + $0xf8] sm:$0xff] }
   0xc   :  { %v106_v46 = vpack.c.bf16 %v57_v44, %v56_v43  ;;  %v60_v49 = vld [vmem:[%s6919_s0 + $0x100] sm:$0xff]  ;;  %v61_v50 = vld [vmem:[%s6919_s0 + $0x108] sm:$0xff]  ;;  %v107_v51 = vpack.c.bf16 %v59_v48, %v58_v47  ;;  %v62_v53 = vld [vmem:[%s6919_s0 + $0x110] sm:$0xff] }
   0xd   :  { %v108_v52 = vpack.c.bf16 %v61_v50, %v60_v49  ;;  %v63_v54 = vld [vmem:[%s6919_s0 + $0x118] sm:$0xff]  ;;  %v64_v55 = vld [vmem:[%s6919_s0 + $0x120] sm:$0xff]  ;;  %v65_v56 = vld [vmem:[%s6919_s0 + $0x128] sm:$0xff] }
   0xe   :  { %3803 = vmatmul.mubr.msk.bf16.gmra.mxu0 %vm125_vm1, %v95_v15  ;;  %v109_v57 = vpack.c.bf16 %v63_v54, %v62_v53  ;;  %v110_v58 = vpack.c.bf16 %v65_v56, %v64_v55  ;;  %v66_v59 = vld [vmem:[%s6919_s0 + $0x130] sm:$0xff]  ;;  %v67_v60 = vld [vmem:[%s6919_s0 + $0x138] sm:$0xff]  ;;  %v68_v61 = vld [vmem:[%s6919_s0 + $0x140] sm:$0xff] }
   0xf   :  { %3806 = vmatprep.mubr.msk.bf16.mxu0 %vm125_vm1, %v96_v16  ;;  %v69_v62 = vld [vmem:[%s6919_s0 + $0x148] sm:$0xff]  ;;  %v111_v63 = vpack.c.bf16 %v67_v60, %v66_v59  ;;  %v70_v1 = vld [vmem:[%s6919_s0 + $0x150] sm:$0xff]  ;;  %v71_v2 = vld [vmem:[%s6919_s0 + $0x158] sm:$0xff] }
  0x10   :  { %v112_v0 = vpack.c.bf16 %v69_v62, %v68_v61  ;;  %v72_v3 = vld [vmem:[%s6919_s0 + $0x160] sm:$0xff]  ;;  %v73_v4 = vld [vmem:[%s6919_s0 + $0x168] sm:$0xff]  ;;  %v113_v5 = vpack.c.bf16 %v71_v2, %v70_v1  ;;  %v74_v7 = vld [vmem:[%s6919_s0 + $0x170] sm:$0xff] }
  0x11   :  { %v114_v6 = vpack.c.bf16 %v73_v4, %v72_v3  ;;  %v75_v8 = vld [vmem:[%s6919_s0 + $0x178] sm:$0xff]  ;;  %v76_v9 = vld [vmem:[%s6919_s0 + $0x180] sm:$0xff]  ;;  %v77_v10 = vld [vmem:[%s6919_s0 + $0x188] sm:$0xff] }
  0x12   :  { %v115_v11 = vpack.c.bf16 %v75_v8, %v74_v7  ;;  %v116_v12 = vpack.c.bf16 %v77_v10, %v76_v9  ;;  %v78_v13 = vld [vmem:[%s6919_s0 + $0x190] sm:$0xff]  ;;  %v79_v14 = vld [vmem:[%s6919_s0 + $0x198] sm:$0xff]  ;;  %v80_v15 = vld [vmem:[%s6919_s0 + $0x1a0] sm:$0xff] }
  0x13   :  { %v81_v16 = vld [vmem:[%s6919_s0 + $0x1a8] sm:$0xff]  ;;  %v117_v17 = vpack.c.bf16 %v79_v14, %v78_v13  ;;  %v82_v19 = vld [vmem:[%s6919_s0 + $0x1b0] sm:$0xff]  ;;  %v83_v20 = vld [vmem:[%s6919_s0 + $0x1b8] sm:$0xff] }
  0x14   :  { %v118_v18 = vpack.c.bf16 %v81_v16, %v80_v15  ;;  %v119_v23 = vpack.c.bf16 %v83_v20, %v82_v19  ;;  %v86_v25 = vld [vmem:[%s6919_s0 + $0x1d0] sm:$0xff]  ;;  %v87_v26 = vld [vmem:[%s6919_s0 + $0x1d8] sm:$0xff] }
  0x15   :  { %v121_v29 = vpack.c.bf16 %v87_v26, %v86_v25  ;;  %v90_v31 = vld [vmem:[%s6919_s0 + $0x1f0] sm:$0xff]  ;;  %v91_v32 = vld [vmem:[%s6919_s0 + $0x1f8] sm:$0xff] }
  0x16   :  { %3807 = vmatmul.mubr.msk.bf16.gmra.mxu0 %vm125_vm1, %v97_v21  ;;  %v84_v21 = vld [vmem:[%s6919_s0 + $0x1c0] sm:$0xff] }
  0x17   :  { %3810 = vmatprep.mubr.msk.bf16.mxu0 %vm125_vm1, %v98_v22  ;;  %v85_v22 = vld [vmem:[%s6919_s0 + $0x1c8] sm:$0xff] }
  0x18   :  { %v120_v24 = vpack.c.bf16 %v85_v22, %v84_v21 }
  0x1e   :  { %3811 = vmatmul.mubr.msk.bf16.gmra.mxu0 %vm125_vm1, %v99_v27  ;;  %v88_v27 = vld [vmem:[%s6919_s0 + $0x1e0] sm:$0xff] }
  0x1f   :  { %3814 = vmatprep.mubr.msk.bf16.mxu0 %vm125_vm1, %v100_v28  ;;  %v89_v28 = vld [vmem:[%s6919_s0 + $0x1e8] sm:$0xff] }
  0x20   :  { %v122_v30 = vpack.c.bf16 %v89_v28, %v88_v27 }
  0x26   :  { %3815 = vmatmul.mubr.msk.bf16.gmra.mxu0 %vm125_vm1, %v101_v33  ;;  %v123_v33 = vpack.c.bf16 %v91_v32, %v90_v31 }
  0x27   :  { %3818 = vmatprep.mubr.msk.bf16.mxu0 %vm125_vm1, %v102_v34 }
  0x2e   :  { %3819 = vmatmul.mubr.msk.bf16.gmra.mxu0 %vm125_vm1, %v103_v39 }
  0x2f   :  { %3822 = vmatprep.mubr.msk.bf16.mxu0 %vm125_vm1, %v104_v40 }
  0x36   :  { %3823 = vmatmul.mubr.msk.bf16.gmra.mxu0 %vm125_vm1, %v105_v45 }
  0x37   :  { %3826 = vmatprep.mubr.msk.bf16.mxu0 %vm125_vm1, %v106_v46 }
  0x3e   :  { %3827 = vmatmul.mubr.msk.bf16.gmra.mxu0 %vm125_vm1, %v107_v51 }
  0x3f   :  { %3830 = vmatprep.mubr.msk.bf16.mxu0 %vm125_vm1, %v108_v52 }
  0x46   :  { %3831 = vmatmul.mubr.msk.bf16.gmra.mxu0 %vm125_vm1, %v109_v57 }
  0x47   :  { %3834 = vmatprep.mubr.msk.bf16.mxu0 %vm125_vm1, %v110_v58 }
  0x4e   :  { %3835 = vmatmul.mubr.msk.bf16.gmra.mxu0 %vm125_vm1, %v111_v63 }
  0x4f   :  { %3838 = vmatprep.mubr.msk.bf16.mxu0 %vm125_vm1, %v112_v0 }
  0x56   :  { %3839 = vmatmul.mubr.msk.bf16.gmra.mxu0 %vm125_vm1, %v113_v5 }
  0x57   :  { %3842 = vmatprep.mubr.msk.bf16.mxu0 %vm125_vm1, %v114_v6 }
  0x5e   :  { %3843 = vmatmul.mubr.msk.bf16.gmra.mxu0 %vm125_vm1, %v115_v11 }
  0x5f   :  { %3846 = vmatprep.mubr.msk.bf16.mxu0 %vm125_vm1, %v116_v12 }
  0x66   :  { %3847 = vmatmul.mubr.msk.bf16.gmra.mxu0 %vm125_vm1, %v117_v17 }
  0x67   :  { %3850 = vmatprep.mubr.msk.bf16.mxu0 %vm125_vm1, %v118_v18 }
  0x6e   :  { %3851 = vmatmul.mubr.msk.bf16.gmra.mxu0 %vm125_vm1, %v119_v23 }
  0x6f   :  { %3854 = vmatprep.mubr.msk.bf16.mxu0 %vm125_vm1, %v120_v24 }
  0x76   :  { %3855 = vmatmul.mubr.msk.bf16.gmra.mxu0 %vm125_vm1, %v121_v29 }
  0x77   :  { %3858 = vmatprep.mubr.msk.bf16.mxu0 %vm125_vm1, %v122_v30 }
  0x7e   :  { %3859 = vmatmul.mubr.msk.bf16.gmra.mxu0 %vm125_vm1, %v123_v33 }
  0xc6   :  { %v4307_v34 = vpop.f32.mrf.mxu0 }
  0xc7   :  { %v588_v42 = vmul.f32 %v4307_v34, %v4307_v34 }
  0xc8   :  { %v4309_v35 = vpop.f32.mrf.mxu0 }
  0xc9   :  { %v586_v38 = vmul.f32 %v4309_v35, %v4309_v35 }
  0xca   :  { %v4311_v36 = vpop.f32.mrf.mxu0 }
  0xcb   :  { %v589_v46 = vmul.f32 %v4311_v36, %v4311_v36 }
  0xcc   :  { %v4313_v37 = vpop.f32.mrf.mxu0 }
  0xcd   :  { %v515_v39 = vadd.f32 %v4313_v37, %v4309_v35  ;;  %v587_v40 = vmul.f32 %v4313_v37, %v4313_v37 }
  0xce   :  { %v4321_v41 = vpop.f32.mrf.mxu0 }
  0xcf   :  { %v650_v43 = vadd.f32 %v587_v40, %v586_v38  ;;  %v516_v44 = vadd.f32 %v4307_v34, %v515_v39  ;;  %v592_v58 = vmul.f32 %v4321_v41, %v4321_v41 }
  0xd0   :  { %v4326_v45 = vpop.f32.mrf.mxu0 }
  0xd1   :  { %v517_v47 = vadd.f32 %v4311_v36, %v516_v44  ;;  %v651_v48 = vadd.f32 %v650_v43, %v588_v42  ;;  %v590_v51 = vmul.f32 %v4326_v45, %v4326_v45 }
  0xd2   :  { %v4331_v49 = vpop.f32.mrf.mxu0 }
  0xd3   :  { %v518_v50 = vadd.f32 %v517_v47, %v4326_v45  ;;  %v652_v52 = vadd.f32 %v651_v48, %v589_v46  ;;  %v593_v62 = vmul.f32 %v4331_v49, %v4331_v49  ;;  %v3947_v47 = vld [vmem:[%s6920_s3 + $0x178] sm:$0xff]  }
  0xd4   :  { %v4336_v53 = vpop.f32.mrf.mxu0  ;;  %3627 = vmatprep.subr.bf16.mxu0 %v3947_v47 }
  0xd5   :  { %v653_v54 = vadd.f32 %v652_v52, %v590_v51  ;;  %v519_v55 = vadd.f32 %v518_v50, %v4336_v53  ;;  %v591_v56 = vmul.f32 %v4336_v53, %v4336_v53 }
  0xd6   :  { %v4341_v57 = vpop.f32.mrf.mxu0 }
  0xd7   :  { %v654_v59 = vadd.f32 %v653_v54, %v591_v56  ;;  %v520_v60 = vadd.f32 %v4321_v41, %v519_v55  ;;  %v596_v10 = vmul.f32 %v4341_v57, %v4341_v57 }
  0xd8   :  { %v4346_v61 = vpop.f32.mrf.mxu0 }
  0xd9   :  { %v521_v63 = vadd.f32 %v4331_v49, %v520_v60  ;;  %v655_v0 = vadd.f32 %v654_v59, %v592_v58  ;;  %v594_v3 = vmul.f32 %v4346_v61, %v4346_v61 }
  0xda   :  { %v4351_v1 = vpop.f32.mrf.mxu0 }
  0xdb   :  { %v522_v2 = vadd.f32 %v521_v63, %v4346_v61  ;;  %v656_v4 = vadd.f32 %v655_v0, %v593_v62  ;;  %v597_v14 = vmul.f32 %v4351_v1, %v4351_v1 }
  0xdc   :  { %v4356_v5 = vpop.f32.mrf.mxu0 }
  0xdd   :  { %v657_v6 = vadd.f32 %v656_v4, %v594_v3  ;;  %v523_v7 = vadd.f32 %v522_v2, %v4356_v5  ;;  %v595_v8 = vmul.f32 %v4356_v5, %v4356_v5 }
  0xde   :  { %v4361_v9 = vpop.f32.mrf.mxu0 }
  0xdf   :  { %v658_v11 = vadd.f32 %v657_v6, %v595_v8  ;;  %v524_v12 = vadd.f32 %v4341_v57, %v523_v7  ;;  %v600_v26 = vmul.f32 %v4361_v9, %v4361_v9 }
  0xe0   :  { %v4366_v13 = vpop.f32.mrf.mxu0 }
  0xe1   :  { %v525_v15 = vadd.f32 %v4351_v1, %v524_v12  ;;  %v659_v16 = vadd.f32 %v658_v11, %v596_v10  ;;  %v598_v19 = vmul.f32 %v4366_v13, %v4366_v13 }
  0xe2   :  { %v4371_v17 = vpop.f32.mrf.mxu0 }
  0xe3   :  { %v526_v18 = vadd.f32 %v525_v15, %v4366_v13  ;;  %v660_v20 = vadd.f32 %v659_v16, %v597_v14  ;;  %v601_v30 = vmul.f32 %v4371_v17, %v4371_v17 }
  0xe4   :  { %v4376_v21 = vpop.f32.mrf.mxu0 }
  0xe5   :  { %v661_v22 = vadd.f32 %v660_v20, %v598_v19  ;;  %v527_v23 = vadd.f32 %v526_v18, %v4376_v21  ;;  %v599_v24 = vmul.f32 %v4376_v21, %v4376_v21 }
  0xe6   :  { %v4381_v25 = vpop.f32.mrf.mxu0 }
  0xe7   :  { %v662_v27 = vadd.f32 %v661_v22, %v599_v24  ;;  %v528_v28 = vadd.f32 %v4361_v9, %v527_v23  ;;  %v604_v50 = vmul.f32 %v4381_v25, %v4381_v25 }
  0xe8   :  { %v4386_v29 = vpop.f32.mrf.mxu0 }
  0xe9   :  { %v529_v31 = vadd.f32 %v4371_v17, %v528_v28  ;;  %v663_v32 = vadd.f32 %v662_v27, %v600_v26  ;;  %v602_v39 = vmul.f32 %v4386_v29, %v4386_v29 }
  0xea   :  { %v4391_v33 = vpop.f32.mrf.mxu0 }
  0xeb   :  { %v530_v38 = vadd.f32 %v529_v31, %v4386_v29  ;;  %v664_v40 = vadd.f32 %v663_v32, %v601_v30  ;;  %v605_v55 = vmul.f32 %v4391_v33, %v4391_v33 }
  0xec   :  { %v4396_v42 = vpop.f32.mrf.mxu0 }
  0xed   :  { %v665_v43 = vadd.f32 %v664_v40, %v602_v39  ;;  %v531_v44 = vadd.f32 %v530_v38, %v4396_v42  ;;  %v603_v46 = vmul.f32 %v4396_v42, %v4396_v42 }
  0xee   :  { %v4404_v48 = vpop.f32.mrf.mxu0 }
  0xef   :  { %v532_v51 = vadd.f32 %v4381_v25, %v531_v44  ;;  %v666_v52 = vadd.f32 %v665_v43, %v603_v46  ;;  %v608_v7 = vmul.f32 %v4404_v48, %v4404_v48 }
  0xf0   :  { %v4409_v54 = vpop.f32.mrf.mxu0 }
  0xf1   :  { %v667_v56 = vadd.f32 %v666_v52, %v604_v50  ;;  %v533_v58 = vadd.f32 %v4391_v33, %v532_v51  ;;  %v606_v62 = vmul.f32 %v4409_v54, %v4409_v54 }
  0xf2   :  { %v4414_v59 = vpop.f32.mrf.mxu0 }
  0xf3   :  { %v534_v60 = vadd.f32 %v533_v58, %v4409_v54  ;;  %v668_v63 = vadd.f32 %v667_v56, %v605_v55  ;;  %v609_v12 = vmul.f32 %v4414_v59, %v4414_v59  ;;  %v3949_v56 = vld [vmem:[%s6920_s3 + $0x138] sm:$0xff]  }
  0xf4   :  { %v4419_v0 = vpop.f32.mrf.mxu0  ;;  %3628 = vmatpush3.bf16.msra.mxu0 %v3949_v56  ;;  %v3952_v56 = vld [vmem:[%s6920_s3 + $0x70] sm:$0xff]  }
  0xf5   :  { %v669_v2 = vadd.f32 %v668_v63, %v606_v62  ;;  %v535_v3 = vadd.f32 %v534_v60, %v4419_v0  ;;  %v607_v4 = vmul.f32 %v4419_v0, %v4419_v0 }
  0xf6   :  { %v4424_v6 = vpop.f32.mrf.mxu0 }
  0xf7   :  { %7038 = vst [vmem:[#allocation3_spill] sm:$0xff] %v4424_v6  ;;  %v536_v8 = vadd.f32 %v4404_v48, %v535_v3  ;;  %v670_v10 = vadd.f32 %v669_v2, %v607_v4  ;;  %v612_v28 = vmul.f32 %v4424_v6, %v4424_v6  ;;  %v3951_v3 = vld [vmem:[%s6920_s3 + $0x170] sm:$0xff]  }
  0xf8   :  { %v4429_v11 = vpop.f32.mrf.mxu0  ;;  %3629 = vmatprep.subr.bf16.mxu0 %v3951_v3 }
  0xf9   :  { %v671_v14 = vadd.f32 %v670_v10, %v608_v7  ;;  %v537_v15 = vadd.f32 %v4414_v59, %v536_v8  ;;  %v610_v19 = vmul.f32 %v4429_v11, %v4429_v11  ;;  %v3953_v10 = vld [vmem:[%s6920_s3 + $0x130] sm:$0xff]  }
  0xfa   :  { %v4434_v16 = vpop.f32.mrf.mxu0  ;;  %3630 = vmatpush3.bf16.msra.mxu0 %v3953_v10  ;;  %v3963_v10 = vld [vmem:[%s6920_s3 + $0x158] sm:$0xff]  }
  0xfb   :  { %7039 = vst [vmem:[#allocation4_spill] sm:$0xff] %v4434_v16  ;;  %v538_v18 = vadd.f32 %v537_v15, %v4429_v11  ;;  %v672_v20 = vadd.f32 %v671_v14, %v609_v12  ;;  %v613_v38 = vmul.f32 %v4434_v16, %v4434_v16 }
  0xfc   :  { %v4439_v22 = vpop.f32.mrf.mxu0 }
  0xfd   :  { %7040 = vst [vmem:[#allocation5_spill] sm:$0xff] %v4439_v22  ;;  %v673_v23 = vadd.f32 %v672_v20, %v610_v19  ;;  %v539_v24 = vadd.f32 %v538_v18, %v4439_v22  ;;  %v611_v26 = vmul.f32 %v4439_v22, %v4439_v22  ;;  %v3955_v20 = vld [vmem:[%s6920_s3 + $0x168] sm:$0xff]   ;;  %v7082_v22 = vmov 0.0  }
  0xfe   :  { %v4444_v27 = vpop.f32.mrf.mxu0  ;;  %3631 = vmatprep.subr.bf16.mxu0 %v3955_v20  ;;  %v3956_v20 = vld [vmem:[%s6920_s3 + $0x68] sm:$0xff]  }
  0xff   :  { %7041 = vst [vmem:[#allocation6_spill] sm:$0xff] %v4444_v27  ;;  %v540_v30 = vadd.f32 %v4424_v6, %v539_v24  ;;  %v674_v31 = vadd.f32 %v673_v23, %v611_v26  ;;  %v616_v60 = vmul.f32 %v4444_v27, %v4444_v27 }
 0x100   :  { %v4449_v32 = vpop.f32.mrf.mxu0 }
 0x101   :  { %7042 = vst [vmem:[#allocation7_spill] sm:$0xff] %v4449_v32  ;;  %v675_v39 = vadd.f32 %v674_v31, %v612_v28  ;;  %v541_v40 = vadd.f32 %v4434_v16, %v540_v30  ;;  %v614_v46 = vmul.f32 %v4449_v32, %v4449_v32  ;;  %v3948_v28 = vld [vmem:[%s6920_s3 + $0x78] sm:$0xff]   ;;  %v3957_v30 = vld [vmem:[%s6920_s3 + $0x128] sm:$0xff]  }
 0x102   :  { %v4454_v43 = vpop.f32.mrf.mxu0  ;;  %3499 = vmatprep.subr.bf16.mxu1 %v3948_v28  ;;  %3632 = vmatpush3.bf16.msra.mxu0 %v3957_v30 }
 0x103   :  { %7043 = vst [vmem:[#allocation8_spill] sm:$0xff] %v4454_v43  ;;  %v542_v44 = vadd.f32 %v541_v40, %v4449_v32  ;;  %v676_v47 = vadd.f32 %v675_v39, %v613_v38  ;;  %v617_v4 = vmul.f32 %v4454_v43, %v4454_v43  ;;  %v3950_v38 = vld [vmem:[%s6920_s3 + $0x38] sm:$0xff]  }
 0x104   :  { %v4459_v50 = vpop.f32.mrf.mxu0  ;;  %3500 = vmatpush3.bf16.msra.mxu1 %v3950_v38 }
 0x105   :  { %7044 = vst [vmem:[#allocation9_spill] sm:$0xff] %v4459_v50  ;;  %v677_v51 = vadd.f32 %v676_v47, %v614_v46  ;;  %v543_v52 = vadd.f32 %v542_v44, %v4459_v50  ;;  %v615_v55 = vmul.f32 %v4459_v50, %v4459_v50  ;;  %v3959_v47 = vld [vmem:[%s6920_s3 + $0x160] sm:$0xff]   ;;  %3501 = vmatprep.subr.bf16.mxu1 %v3952_v56 }
 0x106   :  { %v4467_v58 = vpop.f32.mrf.mxu0  ;;  %3633 = vmatprep.subr.bf16.mxu0 %v3959_v47 }
 0x107   :  { %7045 = vst [vmem:[#allocation10_spill] sm:$0xff] %v4467_v58  ;;  %v544_v62 = vadd.f32 %v4444_v27, %v543_v52  ;;  %v678_v63 = vadd.f32 %v677_v51, %v615_v55  ;;  %v620_v39 = vmul.f32 %v4467_v58, %v4467_v58 }
 0x108   :  { %v4472_v2 = vpop.f32.mrf.mxu0 }
 0x109   :  { %7046 = vst [vmem:[#allocation11_spill] sm:$0xff] %v4472_v2  ;;  %v679_v7 = vadd.f32 %v678_v63, %v616_v60  ;;  %v545_v8 = vadd.f32 %v4454_v43, %v544_v62  ;;  %v618_v15 = vmul.f32 %v4472_v2, %v4472_v2  ;;  %v3961_v60 = vld [vmem:[%s6920_s3 + $0x120] sm:$0xff]   ;;  %v3954_v63 = vld [vmem:[%s6920_s3 + $0x30] sm:$0xff]  }
 0x10a   :  { %v4483_v12 = vpop.f32.mrf.mxu0  ;;  %3634 = vmatpush3.bf16.msra.mxu0 %v3961_v60  ;;  %3502 = vmatpush3.bf16.msra.mxu1 %v3954_v63  ;;  %v3962_v60 = vld [vmem:[%s6920_s3 + $0x20] sm:$0xff]  }
 0x10b   :  { %7047 = vst [vmem:[#allocation12_spill] sm:$0xff] %v4483_v12  ;;  %v546_v14 = vadd.f32 %v545_v8, %v4472_v2  ;;  %v680_v18 = vadd.f32 %v679_v7, %v617_v4  ;;  %v621_v51 = vmul.f32 %v4483_v12, %v4483_v12  ;;  %3635 = vmatprep.subr.bf16.mxu0 %v3963_v10  ;;  %v3971_v10 = vld [vmem:[%s6920_s3 + $0x148] sm:$0xff]  }
 0x10c   :  { %v4488_v19 = vpop.f32.mrf.mxu0  ;;  %3503 = vmatprep.subr.bf16.mxu1 %v3956_v20  ;;  %v3964_v20 = vld [vmem:[%s6920_s3 + $0x58] sm:$0xff]  }
 0x10d   :  { %7048 = vst [vmem:[#allocation13_spill] sm:$0xff] %v4488_v19  ;;  %v681_v23 = vadd.f32 %v680_v18, %v618_v15  ;;  %v547_v24 = vadd.f32 %v546_v14, %v4488_v19  ;;  %v619_v26 = vmul.f32 %v4488_v19, %v4488_v19 }
 0x10e   :  { %v4502_v31 = vpop.f32.mrf.mxu0 }
 0x10f   :  { %7049 = vst [vmem:[#allocation14_spill] sm:$0xff] %v4502_v31  ;;  %v548_v40 = vadd.f32 %v4467_v58, %v547_v24  ;;  %v682_v44 = vadd.f32 %v681_v23, %v619_v26  ;;  %v3965_v23 = vld [vmem:[%s6920_s3 + $0x118] sm:$0xff]   ;;  %v3958_v26 = vld [vmem:[%s6920_s3 + $0x28] sm:$0xff]   ;;  %v624_v28 = vmul.f32 %v4502_v31, %v4502_v31 }
 0x110   :  { %v4510_v46 = vpop.f32.mrf.mxu0  ;;  %3636 = vmatpush3.bf16.msra.mxu0 %v3965_v23  ;;  %3504 = vmatpush3.bf16.msra.mxu1 %v3958_v26  ;;  %v3973_v23 = vld [vmem:[%s6920_s3 + $0x108] sm:$0xff]  }
 0x111   :  { %7050 = vst [vmem:[#allocation15_spill] sm:$0xff] %v4510_v46  ;;  %v683_v52 = vadd.f32 %v682_v44, %v620_v39  ;;  %v549_v55 = vadd.f32 %v4483_v12, %v548_v40  ;;  %v622_v4 = vmul.f32 %v4510_v46, %v4510_v46  ;;  %v3967_v40 = vld [vmem:[%s6920_s3 + $0x150] sm:$0xff]  }
 0x112   :  { %v4524_v62 = vpop.f32.mrf.mxu0  ;;  %3637 = vmatprep.subr.bf16.mxu0 %v3967_v40 }
 0x113   :  { %7051 = vst [vmem:[#allocation16_spill] sm:$0xff] %v4524_v62  ;;  %v550_v3 = vadd.f32 %v549_v55, %v4510_v46  ;;  %v684_v7 = vadd.f32 %v683_v52, %v621_v51  ;;  %v625_v44 = vmul.f32 %v4524_v62, %v4524_v62  ;;  %v3960_v52 = vld [vmem:[%s6920_s3 + $0x60] sm:$0xff]   ;;  %v3969_v55 = vld [vmem:[%s6920_s3 + $0x110] sm:$0xff]  }
 0x114   :  { %v4532_v8 = vpop.f32.mrf.mxu0  ;;  %3505 = vmatprep.subr.bf16.mxu1 %v3960_v52  ;;  %3638 = vmatpush3.bf16.msra.mxu0 %v3969_v55 }
 0x115   :  { %7052 = vst [vmem:[#allocation17_spill] sm:$0xff] %v4532_v8  ;;  %v685_v14 = vadd.f32 %v684_v7, %v622_v4  ;;  %v551_v15 = vadd.f32 %v550_v3, %v4532_v8  ;;  %v623_v18 = vmul.f32 %v4532_v8, %v4532_v8  ;;  %3506 = vmatpush3.bf16.msra.mxu1 %v3962_v60  ;;  %v3968_v60 = vld [vmem:[%s6920_s3 + $0x50] sm:$0xff]  }
 0x116   :  { %v4546_v24 = vpop.f32.mrf.mxu0  ;;  %3639 = vmatprep.subr.bf16.mxu0 %v3971_v10  ;;  %3507 = vmatprep.subr.bf16.mxu1 %v3964_v20  ;;  %v6926_v10 = vmov 0.0   ;;  %v3972_v20 = vld [vmem:[%s6920_s3 + $0x48] sm:$0xff]  }
 0x117   :  { %7053 = vst [vmem:[#allocation18_spill] sm:$0xff] %v4546_v24  ;;  %v552_v30 = vadd.f32 %v4502_v31, %v551_v15  ;;  %v686_v38 = vadd.f32 %v685_v14, %v623_v18  ;;  %930 = vst [vmem:[#allocation2] sm:$0xff] %v6926_v10 }
 0x118   :  { %v4554_v39 = vpop.f32.mrf.mxu0  ;;  %3640 = vmatpush3.bf16.msra.mxu0 %v3973_v23 }
 0x119   :  { %7054 = vst [vmem:[#allocation19_spill] sm:$0xff] %v4554_v39  ;;  %v687_v47 = vadd.f32 %v686_v38, %v624_v28  ;;  %v553_v51 = vadd.f32 %v4524_v62, %v552_v30  ;;  %v626_v3 = vmul.f32 %v4554_v39, %v4554_v39  ;;  %v3966_v28 = vld [vmem:[%s6920_s3 + $0x18] sm:$0xff]   ;;  %v628_v30 = vmul.f32 %v4546_v24, %v4546_v24 }
 0x11a   :  { %v4568_v56 = vpop.f32.mrf.mxu0  ;;  %3508 = vmatpush3.bf16.msra.mxu1 %v3966_v28  ;;  %v3974_v28 = vld [vmem:[%s6920_s3 + $0x8] sm:$0xff]  }
 0x11b   :  { %7055 = vst [vmem:[#allocation20_spill] sm:$0xff] %v4568_v56  ;;  %v554_v63 = vadd.f32 %v553_v51, %v4554_v39  ;;  %v688_v4 = vadd.f32 %v687_v47, %v625_v44  ;;  %v3975_v47 = vld [vmem:[%s6920_s3 + $0x140] sm:$0xff]   ;;  %v629_v51 = vmul.f32 %v4568_v56, %v4568_v56  ;;  %3509 = vmatprep.subr.bf16.mxu1 %v3968_v60 }
 0x11c   :  { %v4576_v7 = vpop.f32.mrf.mxu0  ;;  %3641 = vmatprep.subr.bf16.mxu0 %v3975_v47  ;;  %v3976_v47 = vld [vmem:[%s6920_s3 + $0x40] sm:$0xff]  }
 0x11d   :  { %7056 = vst [vmem:[#allocation21_spill] sm:$0xff] %v4576_v7  ;;  %v689_v14 = vadd.f32 %v688_v4, %v626_v3  ;;  %v555_v15 = vadd.f32 %v554_v63, %v4576_v7  ;;  %v627_v18 = vmul.f32 %v4576_v7, %v4576_v7  ;;  %v3977_v63 = vld [vmem:[%s6920_s3 + $0x100] sm:$0xff]   ;;  %v3970_v4 = vld [vmem:[%s6920_s3 + $0x10] sm:$0xff]  }
 0x11e   :  { %v4590_v26 = vpop.f32.mrf.mxu0  ;;  %3642 = vmatpush3.bf16.msra.mxu0 %v3977_v63  ;;  %3510 = vmatpush3.bf16.msra.mxu1 %v3970_v4  ;;  %v3978_v4 = vld [vmem:[%s6920_s3] sm:$0xff]  }
 0x11f   :  { %7057 = vst [vmem:[#allocation22_spill] sm:$0xff] %v4590_v26  ;;  %v556_v38 = vadd.f32 %v4546_v24, %v555_v15  ;;  %v690_v40 = vadd.f32 %v689_v14, %v627_v18  ;;  %3511 = vmatprep.subr.bf16.mxu1 %v3972_v20  ;;  %v3979_v20 = vld [vmem:[%s6920_s3 + $0xf8] sm:$0xff]  }
 0x120   :  { %v4598_v44 = vpop.f32.mrf.mxu0 }
 0x121   :  { %7058 = vst [vmem:[#allocation23_spill] sm:$0xff] %v4598_v44  ;;  %v691_v52 = vadd.f32 %v690_v40, %v628_v30  ;;  %v557_v55 = vadd.f32 %v4568_v56, %v556_v38  ;;  %v630_v15 = vmul.f32 %v4598_v44, %v4598_v44 }
 0x122   :  { %v4612_v3 = vpop.f32.mrf.mxu0  ;;  %3512 = vmatpush3.bf16.msra.mxu1 %v3974_v28 }
 0x123   :  { %7059 = vst [vmem:[#allocation24_spill] sm:$0xff] %v4612_v3  ;;  %v558_v14 = vadd.f32 %v557_v55, %v4598_v44  ;;  %v692_v18 = vadd.f32 %v691_v52, %v629_v51  ;;  %v632_v52 = vmul.f32 %v4590_v26, %v4590_v26  ;;  %3513 = vmatprep.subr.bf16.mxu1 %v3976_v47 }
 0x124   :  { %v4624_v23 = vpop.f32.mrf.mxu0 }
 0x125   :  { %7060 = vst [vmem:[#allocation25_spill] sm:$0xff] %v4624_v23  ;;  %v693_v30 = vadd.f32 %v692_v18, %v630_v15  ;;  %v559_v38 = vadd.f32 %v558_v14, %v4624_v23  ;;  %v631_v40 = vmul.f32 %v4624_v23, %v4624_v23  ;;  %v633_v14 = vmul.f32 %v4612_v3, %v4612_v3 }
 0x126   :  { %v4635_v51 = vpop.f32.mrf.mxu0  ;;  %3514 = vmatpush3.bf16.msra.mxu1 %v3978_v4 }
 0x127   :  { %7061 = vst [vmem:[#allocation26_spill] sm:$0xff] %v4635_v51  ;;  %v560_v55 = vadd.f32 %v4590_v26, %v559_v38  ;;  %v694_v60 = vadd.f32 %v693_v30, %v631_v40  ;;  %3563 = vmatprep.subr.bf16.mxu1 %v3979_v20 }
 0x128   :  { %v4640_v63 = vpop.f32.mrf.mxu0 }
 0x129   :  { %7062 = vst [vmem:[#allocation27_spill] sm:$0xff] %v4640_v63  ;;  %v695_v15 = vadd.f32 %v694_v60, %v632_v52  ;;  %v561_v18 = vadd.f32 %v4612_v3, %v560_v55  ;;  %v634_v28 = vmul.f32 %v4640_v63, %v4640_v63  ;;  %v636_v60 = vmul.f32 %v4635_v51, %v4635_v51 }
 0x12a   :  { %v4651_v38 = vpop.f32.mrf.mxu0 }
 0x12b   :  { %7063 = vst [vmem:[#allocation28_spill] sm:$0xff] %v4651_v38  ;;  %v562_v30 = vadd.f32 %v561_v18, %v4640_v63  ;;  %v696_v40 = vadd.f32 %v695_v15, %v633_v14  ;;  %v637_v4 = vmul.f32 %v4651_v38, %v4651_v38 }
 0x12c   :  { %v4656_v10 = vpop.f32.mrf.mxu0 }
 0x12d   :  { %7064 = vst [vmem:[#allocation29_spill] sm:$0xff] %v4656_v10  ;;  %v697_v26 = vadd.f32 %v696_v40, %v634_v28  ;;  %v563_v52 = vadd.f32 %v562_v30, %v4656_v10  ;;  %v635_v47 = vmul.f32 %v4656_v10, %v4656_v10 }
 0x12e   :  { %v4661_v55 = vpop.f32.mrf.mxu0 }
 0x12f   :  { %7065 = vst [vmem:[#allocation30_spill] sm:$0xff] %v4661_v55  ;;  %v564_v18 = vadd.f32 %v4635_v51, %v563_v52  ;;  %v698_v3 = vadd.f32 %v697_v26, %v635_v47 }
 0x130   :  { %v4666_v63 = vpop.f32.mrf.mxu0 }
 0x131   :  { %7066 = vst [vmem:[#allocation31_spill] sm:$0xff] %v4666_v63  ;;  %v699_v14 = vadd.f32 %v698_v3, %v636_v60  ;;  %v565_v15 = vadd.f32 %v4651_v38, %v564_v18  ;;  %v638_v28 = vmul.f32 %v4666_v63, %v4666_v63  ;;  %v730_v3 = vlaneseq }
 0x132   :  { %v4671_v30 = vpop.f32.mrf.mxu0  ;;  %v640_v60 = vmul.f32 %v4661_v55, %v4661_v55 }
 0x133   :  { %7067 = vst [vmem:[#allocation32_spill] sm:$0xff] %v4671_v30  ;;  %v566_v20 = vadd.f32 %v565_v15, %v4666_v63  ;;  %v700_v40 = vadd.f32 %v699_v14, %v637_v4  ;;  %v641_v4 = vmul.f32 %v4671_v30, %v4671_v30 }
 0x134   :  { %v4676_v10 = vpop.f32.mrf.mxu0 }
 0x135   :  { %7068 = vst [vmem:[#allocation33_spill] sm:$0xff] %v4676_v10  ;;  %v701_v52 = vadd.f32 %v700_v40, %v638_v28  ;;  %v567_v26 = vadd.f32 %v566_v20, %v4676_v10  ;;  %v639_v47 = vmul.f32 %v4676_v10, %v4676_v10  ;;  %v4693_v40 = vshrl.u32 %v730_v3, 7 }
 0x136   :  { %v4681_v51 = vpop.f32.mrf.mxu0 }
 0x137   :  { %7069 = vst [vmem:[#allocation34_spill] sm:$0xff] %v4681_v51  ;;  %v568_v18 = vadd.f32 %v4661_v55, %v567_v26  ;;  %v702_v15 = vadd.f32 %v701_v52, %v639_v47  ;;  %7072 = vst [vmem:[#allocation37_spill] sm:$0xff] %v4693_v40  ;;  %v644_v3 = vmul.f32 %v4681_v51, %v4681_v51  ;;  %v1003_v62 = vadd.s32 32, %v4693_v40 }
 0x138   :  { %v4686_v38 = vpop.f32.mrf.mxu0 }
 0x139   :  { %7070 = vst [vmem:[#allocation35_spill] sm:$0xff] %v4686_v38  ;;  %v703_v14 = vadd.f32 %v702_v15, %v640_v60  ;;  %v569_v20 = vadd.f32 %v4671_v30, %v568_v18  ;;  %v642_v63 = vmul.f32 %v4686_v38, %v4686_v38  ;;  %v1000_v18 = vadd.s32 8, %v4693_v40 }
 0x13a   :  { %v4691_v28 = vpop.f32.mrf.mxu0  ;;  %v4753_v58 = vcvt.s32.f32 %v1003_v62 }
 0x13b   :  { %7071 = vst [vmem:[#allocation36_spill] sm:$0xff] %v4691_v28  ;;  %v570_v10 = vadd.f32 %v569_v20, %v4686_v38  ;;  %v704_v23 = vadd.f32 %v703_v14, %v641_v4  ;;  %v1001_v4 = vadd.s32 16, %v4693_v40  ;;  %v4720_v55 = vcvt.s32.f32 %v1000_v18  ;;  %v4736_v18 = vld [vmem:[%s6920_s3 + $0x238] sm:$0xff]  }
 0x13c   :  { %v4698_v26 = vpop.f32.mrf.mxu0  ;;  %7077 = vst [vmem:[#allocation42_spill] sm:$0xff] %v4736_v18  ;;  %3862 = vmatprep.subr.bf16.mxu0 %v4736_v18  ;;  %v1035_v62 = vadd.f32 0.5, %v4753_v58 }
 0x13d   :  { %7073 = vst [vmem:[#allocation38_spill] sm:$0xff] %v4698_v26  ;;  %v705_v52 = vadd.f32 %v704_v23, %v642_v63  ;;  %v571_v47 = vadd.f32 %v570_v10, %v4698_v26  ;;  %v643_v60 = vmul.f32 %v4698_v26, %v4698_v26  ;;  %v645_v10 = vmul.f32 %v4691_v28, %v4691_v28 }
 0x13e   :  { %v4703_v15 = vpop.f32.mrf.mxu0  ;;  %v4718_v26 = vcvt.s32.f32 %v4693_v40 }
 0x13f   :  { %7074 = vst [vmem:[#allocation39_spill] sm:$0xff] %v4703_v15  ;;  %v572_v20 = vadd.f32 %v4681_v51, %v571_v47  ;;  %v706_v30 = vadd.f32 %v705_v52, %v643_v60  ;;  %v1002_v47 = vadd.s32 24, %v4693_v40 }
 0x140   :  { %v4709_v38 = vpop.f32.mrf.mxu0 }
 0x141   :  { %7075 = vst [vmem:[#allocation40_spill] sm:$0xff] %v4709_v38  ;;  %v707_v23 = vadd.f32 %v706_v30, %v644_v3  ;;  %v573_v63 = vadd.f32 %v4691_v28, %v572_v20  ;;  %v646_v60 = vmul.f32 %v4709_v38, %v4709_v38  ;;  %v4728_v30 = vcvt.s32.f32 %v1001_v4 }
 0x142   :  { %v4715_v14 = vpop.f32.mrf.mxu0  ;;  %v648_v4 = vmul.f32 %v4703_v15, %v4703_v15 }
 0x143   :  { %7076 = vst [vmem:[#allocation41_spill] sm:$0xff] %v4715_v14  ;;  %v574_v52 = vadd.f32 %v573_v63, %v4709_v38  ;;  %v708_v51 = vadd.f32 %v707_v23, %v645_v10  ;;  %v1031_v63 = vadd.f32 0.5, %v4718_v26  ;;  %v1032_v38 = vadd.f32 0.5, %v4720_v55 }
 0x144   :  { %v4726_v44 = vpop.f32.mrf.mxu0  ;;  %v4740_v10 = vcvt.s32.f32 %v1002_v47 }
 0x145   :  { %v709_v3 = vadd.f32 %v708_v51, %v646_v60  ;;  %v575_v20 = vadd.f32 %v574_v52, %v4726_v44  ;;  %v647_v28 = vmul.f32 %v4726_v44, %v4726_v44  ;;  %v1033_v52 = vadd.f32 0.5, %v4728_v30 }
 0x146   :  { %v649_v60 = vmul.f32 %v4715_v14, %v4715_v14  ;;  %v1111_v7 = vmul.f32 0.015625, %v1031_v63  ;;  %v1112_v39 = vmul.f32 0.015625, %v1032_v38  ;;  %v1034_v47 = vadd.f32 0.5, %v4740_v10 }
 0x147   :  { %v576_v51 = vadd.f32 %v4703_v15, %v575_v20  ;;  %v710_v23 = vadd.f32 %v709_v3, %v647_v28  ;;  %v1113_v20 = vmul.f32 0.015625, %v1033_v52  ;;  %v1004_v28 = vadd.s32 40, %v4693_v40 }
 0x148   :  { %v1127_v15 = vfloor.f32 %v1111_v7  ;;  %v1128_v46 = vfloor.f32 %v1112_v39  ;;  %v1114_v12 = vmul.f32 0.015625, %v1034_v47  ;;  %v1049_v2 = vmul.f32 0.125, %v1033_v52 }
 0x149   :  { %v577_v56 = vadd.f32 %v4715_v14, %v576_v51  ;;  %v711_v24 = vadd.f32 %v710_v23, %v648_v4  ;;  %v1047_v23 = vmul.f32 0.125, %v1031_v63  ;;  %v1048_v14 = vmul.f32 0.125, %v1032_v38 }
 0x14a   :  { %v1129_v19 = vfloor.f32 %v1113_v20  ;;  %v4755_v43 = vcvt.s32.f32 %v1004_v28  ;;  %v1144_v7 = vmul.f32 64.0, %v1128_v46  ;;  %v1130_v39 = vfloor.f32 %v1114_v12 }
 0x14b   :  { %v578_v31 = vrot.slane %v577_v56, 4  ;;  %v712_v8 = vadd.f32 %v711_v24, %v649_v60  ;;  %v1050_v63 = vmul.f32 0.125, %v1034_v47  ;;  %v1065_v52 = vfloor.f32 %v1049_v2 }
 0x14c   :  { %v1145_v38 = vmul.f32 64.0, %v1129_v19  ;;  %v1036_v20 = vadd.f32 0.5, %v4755_v43  ;;  %v1005_v60 = vadd.s32 48, %v4693_v40  ;;  %v1160_v12 = vsub.f32 %v4720_v55, %v1144_v7 }
 0x14d   :  { %v579_v3 = vadd.f32 %v578_v31, %v577_v56  ;;  %v713_v18 = vrot.slane %v712_v8, 4  ;;  %v1143_v56 = vmul.f32 64.0, %v1127_v15  ;;  %v1115_v46 = vmul.f32 0.015625, %v1035_v62 }
 0x14e   :  { %v1006_v31 = vadd.s32 56, %v4693_v40  ;;  %v1066_v2 = vfloor.f32 %v1050_v63  ;;  %vm1176_vm3 = vcmp.ge.f32.partialorder %v1160_v12, 7.5 }
 0x14f   :  { %v580_v51 = vrot.slane %v579_v3, 2  ;;  %v714_v4 = vadd.f32 %v713_v18, %v712_v8  ;;  %v1063_v8 = vfloor.f32 %v1047_v23  ;;  %v1064_v18 = vfloor.f32 %v1048_v14 }
 0x150   :  { %v1159_v15 = vsub.f32 %v4718_v26, %v1143_v56  ;;  %v1081_v23 = vmul.f32 8.0, %v1065_v52  ;;  %v4769_v56 = vcvt.s32.f32 %v1005_v60  ;;  %v1131_v60 = vfloor.f32 %v1115_v46 }
 0x151   :  { %v581_v27 = vadd.f32 %v580_v51, %v579_v3  ;;  %v715_v24 = vrot.slane %v714_v4, 2  ;;  %v1051_v51 = vmul.f32 0.125, %v1035_v62  ;;  %v1079_v19 = vmul.f32 8.0, %v1063_v8 }
 0x152   :  { %v1080_v47 = vmul.f32 8.0, %v1064_v18  ;;  %7078 = vst [vmem:[#allocation43_spill] sm:$0xff] %v4769_v56  ;;  %vm4771_vm2 = vcmp.ge.f32.partialorder %v1159_v15, 7.5  ;;  %v1146_v62 = vmul.f32 64.0, %v1130_v39  ;;  %v4776_v8 = vcvt.s32.f32 %v1006_v31 }
 0x153   :  { %v582_v50 = vrot.slane %v581_v27, 1  ;;  %v716_v32 = vadd.f32 %v715_v24, %v714_v4  ;;  %v1116_v24 = vmul.f32 0.015625, %v1036_v20  ;;  %v1067_v6 = vfloor.f32 %v1051_v51 }
 0x154   :  { %7081 = vst [vmem:[#allocation44_spill] sm:$0xff] %v4776_v8  ;;  %v1095_v63 = vsub.f32 %v4718_v26, %v1079_v19  ;;  %v1096_v52 = vsub.f32 %v4720_v55, %v1080_v47  ;;  %v1037_v39 = vadd.f32 0.5, %v4769_v56  ;;  %v4785_v31 = vsel %vm4771_vm2, 1.0, %v7082_v22  ;;  %v7165_v56 = vld [vmem:[#allocation35_spill] sm:$0xff] }
 0x155   :  { %v583_v28 = vadd.f32 %v582_v50, %v581_v27  ;;  %v717_v3 = vrot.slane %v716_v32, 1  ;;  %v1052_v27 = vmul.f32 0.125, %v1036_v20  ;;  %v1082_v20 = vmul.f32 8.0, %v1066_v2  ;;  %7083 = vst [vmem:[#allocation45_spill] sm:$0xff] %v4785_v31 }
 0x156   :  { %v1038_v55 = vadd.f32 0.5, %v4776_v8  ;;  %v1007_v26 = vadd.s32 64, %v4693_v40  ;;  %vm1223_vm4 = vcmp.ge.f32.partialorder %v1095_v63, 0.5  ;;  %vm4794_vm5 = vcmp.ge.f32.partialorder %v1096_v52, 0.5  ;;  %v7161_v8 = vld [vmem:[#allocation30_spill] sm:$0xff] }
 0x157   :  { %v4765_v4 = vmul.f32 0.001953125, %v583_v28  ;;  %v718_v14 = vadd.f32 %v717_v3, %v716_v32  ;;  %v1161_v32 = vsub.f32 %v4728_v30, %v1145_v38  ;;  %v1097_v28 = vsub.f32 %v4728_v30, %v1081_v23 }
 0x158   :  { %v1132_v3 = vfloor.f32 %v1116_v24  ;;  %v1068_v15 = vfloor.f32 %v1052_v27  ;;  %v1162_v30 = vsub.f32 %v4740_v10, %v1146_v62  ;;  %v1098_v12 = vsub.f32 %v4740_v10, %v1082_v20 }
 0x159   :  { %v719_v50 = vmul.f32 0.001953125, %v718_v14  ;;  %v720_v16 = vmul.f32 %v4765_v4, %v4765_v4  ;;  %v1083_v14 = vmul.f32 8.0, %v1067_v6  ;;  %v1008_v6 = vadd.s32 72, %v4693_v40 }
 0x15a   :  { %vm4799_vm6 = vcmp.ge.f32.partialorder %v1097_v28, 0.5  ;;  %v1147_v19 = vmul.f32 64.0, %v1131_v60  ;;  %v1148_v47 = vmul.f32 64.0, %v1132_v3  ;;  %v1084_v2 = vmul.f32 8.0, %v1068_v15 }
 0x15b   :  { %v721_v18 = vsub.f32 %v719_v50, %v720_v16  ;;  %v4788_v16 = vsel %vm1176_vm3, 1.0, %v7082_v22  ;;  %v1099_v23 = vsub.f32 %v4753_v58, %v1083_v14  ;;  %v1117_v24 = vmul.f32 0.015625, %v1037_v39 }
 0x15c   :  { %7084 = vst [vmem:[#allocation46_spill] sm:$0xff] %v4788_v16  ;;  %v1118_v27 = vmul.f32 0.015625, %v1038_v55  ;;  %v1053_v50 = vmul.f32 0.125, %v1037_v39  ;;  %v1054_v7 = vmul.f32 0.125, %v1038_v55  ;;  %v4804_v62 = vcvt.s32.f32 %v1007_v26 }
 0x15d   :  { %v722_v51 = vadd.f32 1e-05, %v721_v18  ;;  %v4807_v18 = vsel %vm1223_vm4, 1.0, %v7082_v22  ;;  %vm4809_vm7 = vcmp.ge.f32.partialorder %v1161_v32, 7.5  ;;  %vm4813_vm8 = vcmp.ge.f32.partialorder %v1162_v30, 7.5 }
 0x15e   :  { %7089 = vst [vmem:[#allocation47_spill] sm:$0xff] %v4804_v62  ;;  %7090 = vst [vmem:[#allocation48_spill] sm:$0xff] %v4807_v18  ;;  %v4817_v52 = vcvt.s32.f32 %v1008_v6  ;;  %v4822_v20 = vsel %vm4794_vm5, 1.0, %v7082_v22  ;;  %vm4824_vm9 = vcmp.ge.f32.partialorder %v1098_v12, 0.5  ;;  %v4831_v32 = vsel %vm4799_vm6, 1.0, %v7082_v22 }
 0x15f   :  { %4027 = vrsqrt.f32 %v722_v51  ;;  %7096 = vst [vmem:[#allocation50_spill] sm:$0xff] %v4822_v20  ;;  %7099 = vst [vmem:[#allocation51_spill] sm:$0xff] %v4831_v32  ;;  %v1163_v60 = vsub.f32 %v4753_v58, %v1147_v19  ;;  %v1164_v3 = vsub.f32 %v4755_v43, %v1148_v47  ;;  %v1100_v51 = vsub.f32 %v4755_v43, %v1084_v2 }
 0x160   :  { %7095 = vst [vmem:[#allocation49_spill] sm:$0xff] %v4817_v52  ;;  %vm4836_vm10 = vcmp.ge.f32.partialorder %v1099_v23, 0.5  ;;  %v1133_v14 = vfloor.f32 %v1117_v24  ;;  %v1134_v39 = vfloor.f32 %v1118_v27  ;;  %v1069_v55 = vfloor.f32 %v1053_v50  ;;  %v27_v24 = vld [vmem:[%s6921_s6] sm:$0xff] }
 0x161   :  { %v1070_v26 = vfloor.f32 %v1054_v7  ;;  %v1039_v30 = vadd.f32 0.5, %v4804_v62  ;;  %v4843_v6 = vmul.f32 %v4807_v18, %v4785_v31  ;;  %v4848_v58 = vsel %vm4809_vm7, 1.0, %v7082_v22  ;;  %v7144_v62 = vld [vmem:[#allocation19_spill] sm:$0xff]  ;;  %v7155_v31 = vld [vmem:[#allocation28_spill] sm:$0xff] }
 0x162   :  { %7103 = vst [vmem:[#allocation53_spill] sm:$0xff] %v4848_v58  ;;  %v4853_v43 = vsel %vm4813_vm8, 1.0, %v7082_v22  ;;  %v1040_v38 = vadd.f32 0.5, %v4817_v52  ;;  %v4858_v12 = vmul.f32 %v4822_v20, %v4788_v16  ;;  %v4863_v46 = vsel %vm4824_vm9, 1.0, %v7082_v22  ;;  %v7133_v20 = vld [vmem:[#allocation9_spill] sm:$0xff]  ;;  %v7154_v16 = vld [vmem:[#allocation26_spill] sm:$0xff] }
 0x163   :  { %7102 = vst [vmem:[#allocation52_spill] sm:$0xff] %v4843_v6  ;;  %7104 = vst [vmem:[#allocation54_spill] sm:$0xff] %v4853_v43  ;;  %v4867_v19 = vmul.f32 %v4831_v32, %v4848_v58  ;;  %vm1179_vm11 = vcmp.ge.f32.partialorder %v1163_v60, 7.5  ;;  %vm1180_vm12 = vcmp.ge.f32.partialorder %v1164_v3, 7.5  ;;  %vm4869_vm13 = vcmp.ge.f32.partialorder %v1100_v51, 0.5  ;;  %v7137_v52 = vld [vmem:[#allocation13_spill] sm:$0xff] }
 0x164   :  { %7105 = vst [vmem:[#allocation55_spill] sm:$0xff] %v4858_v12  ;;  %7106 = vst [vmem:[#allocation56_spill] sm:$0xff] %v4863_v46  ;;  %v4876_v2 = vsel %vm4836_vm10, 1.0, %v7082_v22  ;;  %v4878_v23 = vmul.f32 64.0, %v1133_v14  ;;  %v4883_v27 = vmul.f32 64.0, %v1134_v39  ;;  %v4885_v50 = vmul.f32 8.0, %v1069_v55 }
 0x165   :  { %7107 = vst [vmem:[#allocation57_spill] sm:$0xff] %v4867_v19  ;;  %7110 = vst [vmem:[#allocation58_spill] sm:$0xff] %v4876_v2  ;;  %v4887_v7 = vmul.f32 8.0, %v1070_v26  ;;  %v4889_v10 = vmul.f32 0.015625, %v1039_v30  ;;  %v4893_v63 = vmul.f32 %v4863_v46, %v4853_v43  ;;  %v4896_v28 = vsel %vm1179_vm11, 1.0, %v7082_v22  ;;  %v7140_v6 = vld [vmem:[#allocation15_spill] sm:$0xff] }
 0x166   :  { %7111 = vst [vmem:[#allocation59_spill] sm:$0xff] %v4878_v23  ;;  %7112 = vst [vmem:[#allocation60_spill] sm:$0xff] %v4883_v27  ;;  %v4898_v60 = vmul.f32 0.015625, %v1040_v38  ;;  %v4900_v3 = vmul.f32 0.125, %v1039_v30  ;;  %v4903_v15 = vsel %vm1180_vm12, 1.0, %v7082_v22  ;;  %v4905_v14 = vmul.f32 0.125, %v1040_v38 }
 0x167   :  { %7113 = vst [vmem:[#allocation61_spill] sm:$0xff] %v4885_v50  ;;  %7114 = vst [vmem:[#allocation62_spill] sm:$0xff] %v4887_v7  ;;  %v1009_v39 = vadd.s32 80, %v4693_v40  ;;  %v1010_v55 = vadd.s32 88, %v4693_v40  ;;  %v4912_v46 = vsel %vm4869_vm13, 1.0, %v7082_v22  ;;  %v4916_v30 = vmul.f32 %v4876_v2, %v4896_v28  ;;  %v7150_v7 = vld [vmem:[#allocation22_spill] sm:$0xff] }
 0x168   :  { %7115 = vst [vmem:[#allocation63_spill] sm:$0xff] %v4889_v10  ;;  %7116 = vst [vmem:[#allocation64_spill] sm:$0xff] %v4893_v63  ;;  %v7124_v19 = vsub.s32 0, %v4693_v40  ;;  %v7153_v10 = vld [vmem:[#allocation29_spill] sm:$0xff]  ;;  %v7157_v50 = vld [vmem:[#allocation31_spill] sm:$0xff] }
 0x169   :  { %7117 = vst [vmem:[#allocation65_spill] sm:$0xff] %v4896_v28  ;;  %7118 = vst [vmem:[#allocation66_spill] sm:$0xff] %v4898_v60  ;;  %v4935_v28 = vcvt.s32.f32 %v1009_v39  ;;  %v4937_v63 = vcvt.s32.f32 %v1010_v55  ;;  %v7149_v60 = vld [vmem:[#allocation25_spill] sm:$0xff]  ;;  %v7163_v23 = vld [vmem:[#allocation32_spill] sm:$0xff] }
 0x16a   :  { %7119 = vst [vmem:[#allocation67_spill] sm:$0xff] %v4900_v3  ;;  %7120 = vst [vmem:[#allocation68_spill] sm:$0xff] %v4903_v15  ;;  %v7152_v15 = vld [vmem:[#allocation27_spill] sm:$0xff]  ;;  %v7159_v27 = vld [vmem:[#allocation33_spill] sm:$0xff] }
 0x16b   :  { %7121 = vst [vmem:[#allocation69_spill] sm:$0xff] %v4905_v14  ;;  %7122 = vst [vmem:[#allocation70_spill] sm:$0xff] %v4912_v46  ;;  %v7141_v14 = vld [vmem:[#allocation17_spill] sm:$0xff]  ;;  %v7151_v46 = vld [vmem:[#allocation24_spill] sm:$0xff] }
 0x16c   :  { %v4028_v51 = vpop.eup %4027  ;;  %7123 = vst [vmem:[#allocation71_spill] sm:$0xff] %v4916_v30  ;;  %7125 = vst [vmem:[#allocation72_spill] sm:$0xff] %v4935_v28  ;;  %v7132_v30 = vld [vmem:[#allocation7_spill] sm:$0xff] }
 0x16d   :  { %v724_v26 = vmul.f32 %v4028_v51, %v27_v24  ;;  %7126 = vst [vmem:[#allocation73_spill] sm:$0xff] %v4937_v63  ;;  %v4940_v51 = vadd.s32 96, %v4693_v40  ;;  %v7146_v63 = vld [vmem:[#allocation18_spill] sm:$0xff]  ;;  %v7148_v28 = vld [vmem:[#allocation23_spill] sm:$0xff] }
 0x16f   :  { %v725_v22 = vmul.f32 %v724_v26, %v4765_v4  ;;  %v4930_v2 = vrot.slane %v724_v26, %v7124_v19  ;;  %7127 = vst [vmem:[#allocation74_spill] sm:$0xff] %v4940_v51  ;;  %v7145_v51 = vld [vmem:[#allocation21_spill] sm:$0xff] }
 0x171   :  { %v727_v47 = vrot.slane %v725_v22, 7  ;;  %v795_v4 = vmul.f32 %v4930_v2, %v4726_v44  ;;  %v4946_v19 = vmul.f32 %v4930_v2, %v4309_v35  ;;  %v4950_v26 = vmul.f32 %v4930_v2, %v4313_v37 }
 0x172   :  { %v4954_v39 = vmul.f32 %v4307_v34, %v4930_v2  ;;  %v4958_v55 = vmul.f32 %v4311_v36, %v4930_v2  ;;  %v4962_v22 = vmul.f32 %v4930_v2, %v4326_v45  ;;  %v4966_v35 = vmul.f32 %v4930_v2, %v4336_v53 }
 0x173   :  { %v729_v44 = vsub.f32 %v27_v24, %v727_v47  ;;  %v4970_v37 = vmul.f32 %v4321_v41, %v4930_v2  ;;  %v4974_v34 = vmul.f32 %v4331_v49, %v4930_v2  ;;  %v4978_v36 = vmul.f32 %v4930_v2, %v4346_v61 }
 0x174   :  { %v4982_v45 = vmul.f32 %v4930_v2, %v4356_v5  ;;  %v4986_v53 = vmul.f32 %v4341_v57, %v4930_v2  ;;  %v4990_v41 = vmul.f32 %v4351_v1, %v4930_v2  ;;  %v4994_v49 = vmul.f32 %v4930_v2, %v4366_v13 }
 0x175   :  { %v7128_v24 = vsub.s32 1, %v4693_v40  ;;  %v5002_v5 = vmul.f32 %v4930_v2, %v4376_v21  ;;  %v5006_v57 = vmul.f32 %v4361_v9, %v4930_v2  ;;  %v5010_v1 = vmul.f32 %v4371_v17, %v4930_v2  ;;  %v7147_v40 = vld [vmem:[#allocation20_spill] sm:$0xff] }
 0x176   :  { %v5014_v13 = vmul.f32 %v4930_v2, %v4386_v29  ;;  %v5018_v47 = vmul.f32 %v4930_v2, %v4396_v42  ;;  %v5022_v21 = vmul.f32 %v4381_v25, %v4930_v2  ;;  %v5026_v9 = vmul.f32 %v4391_v33, %v4930_v2 }
 0x177   :  { %v4998_v61 = vrot.slane %v729_v44, %v7128_v24  ;;  %v5031_v17 = vmul.f32 %v4930_v2, %v4409_v54  ;;  %v5035_v29 = vmul.f32 %v4930_v2, %v4419_v0  ;;  %v5039_v42 = vmul.f32 %v4404_v48, %v4930_v2  ;;  %v7130_v24 = vld [vmem:[#allocation3_spill] sm:$0xff]  ;;  %v7131_v48 = vld [vmem:[#allocation4_spill] sm:$0xff] }
 0x178   :  { %v5043_v25 = vmul.f32 %v4414_v59, %v4930_v2  ;;  %v5047_v33 = vmul.f32 %v4930_v2, %v4429_v11  ;;  %v5055_v0 = vmul.f32 %v7130_v24, %v4930_v2  ;;  %v5059_v32 = vmul.f32 %v7131_v48, %v4930_v2  ;;  %v7135_v24 = vld [vmem:[#allocation8_spill] sm:$0xff] }
 0x179   :  { %v863_v44 = vadd.f32 %v4998_v61, %v795_v4  ;;  %v7129_v4 = vld [vmem:[#allocation5_spill] sm:$0xff]  ;;  %v5063_v59 = vmul.f32 %v4930_v2, %v7132_v30  ;;  %v5067_v11 = vmul.f32 %v4930_v2, %v7133_v20  ;;  %v5075_v12 = vmul.f32 %v7135_v24, %v4930_v2  ;;  %v7138_v20 = vld [vmem:[#allocation10_spill] sm:$0xff] }
 0x17a   :  { %v5051_v54 = vmul.f32 %v4930_v2, %v7129_v4  ;;  %v7134_v4 = vld [vmem:[#allocation6_spill] sm:$0xff]  ;;  %v5083_v30 = vmul.f32 %v4930_v2, %v7137_v52  ;;  %v5087_v43 = vmul.f32 %v7138_v20, %v4930_v2  ;;  %v5095_v24 = vmul.f32 %v4930_v2, %v7140_v6 }
 0x17b   :  { %v927_v38 = vmax.f32 %v863_v44, 0.0  ;;  %v5071_v18 = vmul.f32 %v7134_v4, %v4930_v2  ;;  %v7136_v44 = vld [vmem:[#allocation11_spill] sm:$0xff]  ;;  %v7139_v4 = vld [vmem:[#allocation12_spill] sm:$0xff]  ;;  %v7142_v52 = vld [vmem:[#allocation14_spill] sm:$0xff]  ;;  %v5115_v6 = vmul.f32 %v4930_v2, %v7145_v51  ;;  %v5135_v51 = vmul.f32 %v7150_v7, %v4930_v2 }
 0x17c   :  { %v5079_v48 = vmul.f32 %v4930_v2, %v7136_v44  ;;  %v5091_v58 = vmul.f32 %v7139_v4, %v4930_v2  ;;  %v5099_v44 = vmul.f32 %v4930_v2, %v7141_v14  ;;  %v5103_v3 = vmul.f32 %v7142_v52, %v4930_v2 }
 0x17d   :  { %995 = vst [vmem:[#allocation2 + $0x1f8] sm:$0xff] %v927_v38  ;;  %v7143_v38 = vld [vmem:[#allocation16_spill] sm:$0xff]  ;;  %v5111_v4 = vmul.f32 %v4930_v2, %v7144_v62  ;;  %v5119_v14 = vmul.f32 %v7146_v63, %v4930_v2  ;;  %v5123_v52 = vmul.f32 %v7147_v40, %v4930_v2  ;;  %v5131_v62 = vmul.f32 %v4930_v2, %v7149_v60 }
 0x17e   :  { %v5107_v20 = vmul.f32 %v7143_v38, %v4930_v2  ;;  %v5127_v38 = vmul.f32 %v4930_v2, %v7148_v28  ;;  %v5139_v63 = vmul.f32 %v7151_v46, %v4930_v2  ;;  %v5143_v40 = vmul.f32 %v4930_v2, %v7152_v15 }
 0x17f   :  { %v5147_v28 = vmul.f32 %v4930_v2, %v7153_v10  ;;  %v5151_v60 = vmul.f32 %v7154_v16, %v4930_v2  ;;  %v5155_v7 = vmul.f32 %v7155_v31, %v4930_v2  ;;  %v5159_v46 = vmul.f32 %v4930_v2, %v7157_v50 }
 0x180   :  { %v5163_v15 = vmul.f32 %v4930_v2, %v7159_v27  ;;  %v5167_v10 = vmul.f32 %v7161_v8, %v4930_v2  ;;  %v5171_v16 = vmul.f32 %v7163_v23, %v4930_v2  ;;  %v5175_v31 = vmul.f32 %v4930_v2, %v7165_v56 }
 0x181   :  { %7156 = vst [vmem:[#allocation5_spill] sm:$0xff] %v5155_v7  ;;  %7158 = vst [vmem:[#allocation3_spill] sm:$0xff] %v5159_v46  ;;  %v7167_v7 = vld [vmem:[#allocation38_spill] sm:$0xff] }
 0x182   :  { %7160 = vst [vmem:[#allocation4_spill] sm:$0xff] %v5163_v15  ;;  %7162 = vst [vmem:[#allocation7_spill] sm:$0xff] %v5167_v10  ;;  %v5179_v50 = vmul.f32 %v4930_v2, %v7167_v7  ;;  %v7168_v46 = vld [vmem:[#allocation34_spill] sm:$0xff]  ;;  %v7169_v15 = vld [vmem:[#allocation36_spill] sm:$0xff] }
 0x183   :  { %7164 = vst [vmem:[#allocation9_spill] sm:$0xff] %v5171_v16  ;;  %7166 = vst [vmem:[#allocation6_spill] sm:$0xff] %v5175_v31  ;;  %v5183_v27 = vmul.f32 %v7168_v46, %v4930_v2  ;;  %v5187_v8 = vmul.f32 %v7169_v15, %v4930_v2  ;;  %v7170_v10 = vld [vmem:[#allocation40_spill] sm:$0xff]  ;;  %v7171_v16 = vld [vmem:[#allocation39_spill] sm:$0xff]  ;;  %v5203_v46 = vadd.f32 %v4998_v61, %v4946_v19 }
 0x184   :  { %v5191_v23 = vmul.f32 %v4930_v2, %v7170_v10  ;;  %v5195_v56 = vmul.f32 %v7171_v16, %v4930_v2  ;;  %v7172_v31 = vld [vmem:[#allocation41_spill] sm:$0xff]  ;;  %v5207_v15 = vadd.f32 %v4998_v61, %v4950_v26  ;;  %v5211_v10 = vadd.f32 %v4998_v61, %v4954_v39 }
 0x185   :  { %v5199_v7 = vmul.f32 %v7172_v31, %v4930_v2  ;;  %v5215_v16 = vadd.f32 %v4998_v61, %v4958_v55  ;;  %v5219_v2 = vadd.f32 %v4998_v61, %v4962_v22  ;;  %v5223_v19 = vadd.f32 %v4998_v61, %v4966_v35 }
 0x186   :  { %v5227_v26 = vadd.f32 %v4998_v61, %v4970_v37  ;;  %v5231_v39 = vadd.f32 %v4998_v61, %v4974_v34  ;;  %v5235_v55 = vadd.f32 %v4998_v61, %v4978_v36  ;;  %v5239_v22 = vadd.f32 %v4998_v61, %v4982_v45 }
 0x187   :  { %v5243_v35 = vadd.f32 %v4998_v61, %v4986_v53  ;;  %v5247_v37 = vadd.f32 %v4998_v61, %v4990_v41  ;;  %v5251_v34 = vadd.f32 %v4998_v61, %v4994_v49  ;;  %v5255_v36 = vadd.f32 %v4998_v61, %v5002_v5 }
 0x188   :  { %v5259_v45 = vadd.f32 %v4998_v61, %v5006_v57  ;;  %v5263_v53 = vadd.f32 %v4998_v61, %v5010_v1  ;;  %v5267_v41 = vadd.f32 %v4998_v61, %v5014_v13  ;;  %v5271_v49 = vadd.f32 %v4998_v61, %v5018_v47  ;;  %v7183_v31 = vld [vmem:[#allocation5_spill] sm:$0xff] }
 0x189   :  { %v5275_v5 = vadd.f32 %v4998_v61, %v5022_v21  ;;  %v5279_v57 = vadd.f32 %v4998_v61, %v5026_v9  ;;  %v5283_v1 = vadd.f32 %v4998_v61, %v5031_v17  ;;  %v5287_v13 = vadd.f32 %v4998_v61, %v5035_v29 }
 0x18a   :  { %v5291_v47 = vadd.f32 %v4998_v61, %v5039_v42  ;;  %v5295_v21 = vadd.f32 %v4998_v61, %v5043_v25  ;;  %v5299_v9 = vadd.f32 %v4998_v61, %v5047_v33  ;;  %v5303_v17 = vadd.f32 %v4998_v61, %v5051_v54 }
 0x18b   :  { %v5307_v29 = vadd.f32 %v4998_v61, %v5055_v0  ;;  %v5311_v42 = vadd.f32 %v4998_v61, %v5059_v32  ;;  %v5315_v25 = vadd.f32 %v4998_v61, %v5063_v59  ;;  %v5319_v33 = vadd.f32 %v4998_v61, %v5067_v11 }
 0x18c   :  { %v5323_v54 = vadd.f32 %v4998_v61, %v5071_v18  ;;  %v5327_v0 = vadd.f32 %v4998_v61, %v5075_v12  ;;  %v5331_v32 = vadd.f32 %v4998_v61, %v5079_v48  ;;  %v5335_v59 = vadd.f32 %v4998_v61, %v5083_v30 }
 0x18d   :  { %v5339_v11 = vadd.f32 %v4998_v61, %v5087_v43  ;;  %v5343_v18 = vadd.f32 %v4998_v61, %v5091_v58  ;;  %v5347_v12 = vadd.f32 %v4998_v61, %v5095_v24  ;;  %v5351_v48 = vadd.f32 %v4998_v61, %v5099_v44 }
 0x18e   :  { %7173 = vst [vmem:[#allocation8_spill] sm:$0xff] %v5331_v32  ;;  %7174 = vst [vmem:[#allocation11_spill] sm:$0xff] %v5335_v59  ;;  %v5355_v30 = vadd.f32 %v4998_v61, %v5103_v3  ;;  %v5359_v43 = vadd.f32 %v4998_v61, %v5107_v20  ;;  %v5363_v58 = vadd.f32 %v4998_v61, %v5111_v4 }
 0x18f   :  { %7175 = vst [vmem:[#allocation13_spill] sm:$0xff] %v5339_v11  ;;  %v5367_v24 = vadd.f32 %v4998_v61, %v5115_v6  ;;  %v5371_v44 = vadd.f32 %v4998_v61, %v5119_v14  ;;  %v5375_v3 = vadd.f32 %v4998_v61, %v5123_v52  ;;  %v5379_v20 = vadd.f32 %v4998_v61, %v5127_v38 }
 0x190   :  { %v5383_v4 = vadd.f32 %v4998_v61, %v5131_v62  ;;  %v5387_v6 = vadd.f32 %v4998_v61, %v5135_v51  ;;  %v5391_v14 = vadd.f32 %v4998_v61, %v5139_v63  ;;  %v5395_v52 = vadd.f32 %v4998_v61, %v5143_v40 }
 0x191   :  { %7176 = vst [vmem:[#allocation10_spill] sm:$0xff] %v5367_v24  ;;  %7177 = vst [vmem:[#allocation12_spill] sm:$0xff] %v5371_v44  ;;  %v5399_v38 = vadd.f32 %v4998_v61, %v5147_v28  ;;  %v5403_v62 = vadd.f32 %v4998_v61, %v5151_v60  ;;  %v5407_v51 = vadd.f32 %v4998_v61, %v7183_v31 }
 0x192   :  { %7178 = vst [vmem:[#allocation15_spill] sm:$0xff] %v5387_v6  ;;  %7179 = vst [vmem:[#allocation17_spill] sm:$0xff] %v5391_v14  ;;  %v7184_v6 = vld [vmem:[#allocation3_spill] sm:$0xff]  ;;  %v7185_v14 = vld [vmem:[#allocation4_spill] sm:$0xff] }
 0x193   :  { %7180 = vst [vmem:[#allocation14_spill] sm:$0xff] %v5395_v52  ;;  %7181 = vst [vmem:[#allocation16_spill] sm:$0xff] %v5399_v38  ;;  %v5411_v63 = vadd.f32 %v4998_v61, %v7184_v6  ;;  %v5415_v40 = vadd.f32 %v4998_v61, %v7185_v14  ;;  %v7186_v52 = vld [vmem:[#allocation7_spill] sm:$0xff]  ;;  %v7187_v38 = vld [vmem:[#allocation9_spill] sm:$0xff]  ;;  %v5431_v6 = vadd.f32 %v4998_v61, %v5179_v50 }
 0x194   :  { %7182 = vst [vmem:[#allocation19_spill] sm:$0xff] %v5403_v62  ;;  %v5419_v28 = vadd.f32 %v4998_v61, %v7186_v52  ;;  %v5423_v60 = vadd.f32 %v4998_v61, %v7187_v38  ;;  %v7188_v62 = vld [vmem:[#allocation6_spill] sm:$0xff]  ;;  %v5435_v14 = vadd.f32 %v4998_v61, %v5183_v27  ;;  %v5439_v52 = vadd.f32 %v4998_v61, %v5187_v8 }
 0x195   :  { %v5427_v31 = vadd.f32 %v4998_v61, %v7188_v62  ;;  %7189 = vst [vmem:[#allocation21_spill] sm:$0xff] %v5431_v6  ;;  %v5443_v38 = vadd.f32 %v4998_v61, %v5191_v23  ;;  %v5447_v62 = vadd.f32 %v4998_v61, %v5195_v56  ;;  %v5451_v50 = vadd.f32 %v4998_v61, %v5199_v7 }
 0x196   :  { %7190 = vst [vmem:[#allocation18_spill] sm:$0xff] %v5435_v14  ;;  %7191 = vst [vmem:[#allocation20_spill] sm:$0xff] %v5439_v52  ;;  %v876_v7 = vmax.f32 %v5243_v35, 0.0  ;;  %v877_v27 = vmax.f32 %v5247_v37, 0.0  ;;  %v878_v14 = vmax.f32 %v5251_v34, 0.0  ;;  %v879_v8 = vmax.f32 %v5255_v36, 0.0 }
 0x197   :  { %7192 = vst [vmem:[#allocation23_spill] sm:$0xff] %v5443_v38  ;;  %7193 = vst [vmem:[#allocation25_spill] sm:$0xff] %v5447_v62  ;;  %v880_v52 = vmax.f32 %v5259_v45, 0.0  ;;  %v881_v23 = vmax.f32 %v5263_v53, 0.0  ;;  %v882_v38 = vmax.f32 %v5267_v41, 0.0  ;;  %v7019_v56 = vmax.f32 %v5271_v49, 0.0 }
 0x198   :  { %v7018_v62 = vmax.f32 %v5275_v5, 0.0  ;;  %v7010_v61 = vmax.f32 %v5279_v57, 0.0  ;;  %944 = vst [vmem:[#allocation2 + $0x60] sm:$0xff] %v876_v7  ;;  %945 = vst [vmem:[#allocation2 + $0x68] sm:$0xff] %v877_v27  ;;  %v7009_v35 = vmax.f32 %v5283_v1, 0.0  ;;  %v7011_v37 = vmax.f32 %v5287_v13, 0.0 }
 0x199   :  { %v7013_v34 = vmax.f32 %v5291_v47, 0.0  ;;  %v7012_v36 = vmax.f32 %v5295_v21, 0.0  ;;  %946 = vst [vmem:[#allocation2 + $0x70] sm:$0xff] %v878_v14  ;;  %947 = vst [vmem:[#allocation2 + $0x78] sm:$0xff] %v879_v8  ;;  %v7014_v45 = vmax.f32 %v5299_v9, 0.0  ;;  %v7015_v53 = vmax.f32 %v5303_v17, 0.0 }
 0x19a   :  { %948 = vst [vmem:[#allocation2 + $0x80] sm:$0xff] %v880_v52  ;;  %949 = vst [vmem:[#allocation2 + $0x88] sm:$0xff] %v881_v23  ;;  %v7016_v6 = vmax.f32 %v5307_v29, 0.0  ;;  %v7017_v27 = vmax.f32 %v5311_v42, 0.0  ;;  %v894_v14 = vmax.f32 %v5315_v25, 0.0  ;;  %v895_v52 = vmax.f32 %v5319_v33, 0.0 }
 0x19b   :  { %950 = vst [vmem:[#allocation2 + $0x90] sm:$0xff] %v882_v38  ;;  %951 = vst [vmem:[#allocation2 + $0x98] sm:$0xff] %v7019_v56  ;;  %v896_v8 = vmax.f32 %v5323_v54, 0.0  ;;  %v5493_v23 = vmax.f32 %v5327_v0, 0.0  ;;  %v7195_v25 = vld [vmem:[#allocation43_spill] sm:$0xff] }
 0x19c   :  { %952 = vst [vmem:[#allocation2 + $0xa0] sm:$0xff] %v7018_v62  ;;  %953 = vst [vmem:[#allocation2 + $0xa8] sm:$0xff] %v7010_v61  ;;  %v7196_v7 = vld [vmem:[#allocation59_spill] sm:$0xff]  ;;  %v7213_v62 = vld [vmem:[#allocation16_spill] sm:$0xff] }
 0x19d   :  { %7194 = vst [vmem:[#allocation22_spill] sm:$0xff] %v5493_v23  ;;  %954 = vst [vmem:[#allocation2 + $0xb0] sm:$0xff] %v7009_v35  ;;  %v7197_v33 = vsub.f32 %v7195_v25, %v7196_v7  ;;  %v7200_v7 = vld [vmem:[#allocation44_spill] sm:$0xff]  ;;  %v7210_v35 = vld [vmem:[#allocation17_spill] sm:$0xff]  ;;  %v915_v0 = vmax.f32 %v7213_v62, 0.0  ;;  %v922_v62 = vmax.f32 %v5427_v31, 0.0 }
 0x19e   :  { %955 = vst [vmem:[#allocation2 + $0xb8] sm:$0xff] %v7011_v37  ;;  %956 = vst [vmem:[#allocation2 + $0xc0] sm:$0xff] %v7013_v34  ;;  %v7205_v37 = vld [vmem:[#allocation61_spill] sm:$0xff]  ;;  %v7220_v31 = vmax.f32 %v5271_v49, 0.0  ;;  %v7226_v41 = vld [vmem:[#allocation63_spill] sm:$0xff] }
 0x19f   :  { %957 = vst [vmem:[#allocation2 + $0xc8] sm:$0xff] %v7012_v36  ;;  %vm5506_vm14 = vcmp.ge.f32.partialorder %v7197_v33, 7.5  ;;  %958 = vst [vmem:[#allocation2 + $0xd0] sm:$0xff] %v7014_v45  ;;  %v7201_v33 = vld [vmem:[#allocation60_spill] sm:$0xff]  ;;  %v7206_v61 = vsub.f32 %v7195_v25, %v7205_v37  ;;  %v909_v25 = vmax.f32 %v5375_v3, 0.0  ;;  %v918_v3 = vmax.f32 %v5411_v63, 0.0 }
 0x1a0   :  { %959 = vst [vmem:[#allocation2 + $0xd8] sm:$0xff] %v7015_v53  ;;  %960 = vst [vmem:[#allocation2 + $0xe0] sm:$0xff] %v7016_v6  ;;  %v7202_v36 = vsub.f32 %v7200_v7, %v7201_v33  ;;  %v910_v33 = vmax.f32 %v5379_v20, 0.0  ;;  %v911_v6 = vmax.f32 %v5383_v4, 0.0  ;;  %v919_v20 = vmax.f32 %v5415_v40, 0.0  ;;  %v7218_v63 = vld [vmem:[#allocation23_spill] sm:$0xff] }
 0x1a1   :  { %961 = vst [vmem:[#allocation2 + $0xe8] sm:$0xff] %v7017_v27  ;;  %vm5532_vm2 = vcmp.ge.f32.partialorder %v7206_v61, 0.5  ;;  %962 = vst [vmem:[#allocation2 + $0xf0] sm:$0xff] %v894_v14  ;;  %v7209_v27 = vld [vmem:[#allocation15_spill] sm:$0xff]  ;;  %v5549_v14 = vmax.f32 %v7210_v35, 0.0  ;;  %v917_v61 = vmax.f32 %v5407_v51, 0.0 }
 0x1a2   :  { %vm5525_vm15 = vcmp.ge.f32.partialorder %v7202_v36, 7.5  ;;  %963 = vst [vmem:[#allocation2 + $0xf8] sm:$0xff] %v895_v52  ;;  %964 = vst [vmem:[#allocation2 + $0x100] sm:$0xff] %v896_v8  ;;  %v912_v53 = vmax.f32 %v7209_v27, 0.0  ;;  %v7212_v52 = vld [vmem:[#allocation14_spill] sm:$0xff]  ;;  %v7214_v36 = vld [vmem:[#allocation19_spill] sm:$0xff] }
 0x1a3   :  { %965 = vst [vmem:[#allocation2 + $0x108] sm:$0xff] %v5493_v23  ;;  %7211 = vst [vmem:[#allocation24_spill] sm:$0xff] %v5549_v14  ;;  %v914_v8 = vmax.f32 %v7212_v52, 0.0  ;;  %v916_v56 = vmax.f32 %v7214_v36, 0.0  ;;  %v920_v4 = vmax.f32 %v5419_v28, 0.0  ;;  %v921_v27 = vmax.f32 %v5423_v60, 0.0 }
 0x1a4   :  { %977 = vst [vmem:[#allocation2 + $0x168] sm:$0xff] %v909_v25  ;;  %978 = vst [vmem:[#allocation2 + $0x170] sm:$0xff] %v910_v33  ;;  %v7215_v35 = vld [vmem:[#allocation21_spill] sm:$0xff]  ;;  %v7216_v52 = vld [vmem:[#allocation18_spill] sm:$0xff]  ;;  %v926_v40 = vmax.f32 %v7218_v63, 0.0 }
 0x1a5   :  { %979 = vst [vmem:[#allocation2 + $0x178] sm:$0xff] %v911_v6  ;;  %980 = vst [vmem:[#allocation2 + $0x180] sm:$0xff] %v912_v53  ;;  %v923_v36 = vmax.f32 %v7215_v35, 0.0  ;;  %v924_v51 = vmax.f32 %v7216_v52, 0.0  ;;  %v7217_v25 = vld [vmem:[#allocation20_spill] sm:$0xff]  ;;  %v7219_v28 = vld [vmem:[#allocation25_spill] sm:$0xff]  ;;  %v1486_v53 = vpack.c.bf16 %v7220_v31, %v882_v38 }
 0x1a6   :  { %981 = vst [vmem:[#allocation2 + $0x188] sm:$0xff] %v5549_v14  ;;  %v925_v37 = vmax.f32 %v7217_v25, 0.0  ;;  %982 = vst [vmem:[#allocation2 + $0x190] sm:$0xff] %v914_v8  ;;  %v928_v60 = vmax.f32 %v7219_v28, 0.0  ;;  %v929_v6 = vmax.f32 %v5451_v50, 0.0  ;;  %v7223_v50 = vld [vmem:[#allocation45_spill] sm:$0xff] }
 0x1a7   :  { %983 = vst [vmem:[#allocation2 + $0x198] sm:$0xff] %v915_v0  ;;  %984 = vst [vmem:[#allocation2 + $0x1a0] sm:$0xff] %v916_v56  ;;  %v7221_v56 = vmax.f32 %v5203_v46, 0.0  ;;  %v7222_v0 = vmax.f32 %v5207_v15, 0.0  ;;  %v1343_v33 = vmul.f32 %v7223_v50, %v5493_v23  ;;  %v7224_v8 = vmax.f32 %v5331_v32, 0.0  ;;  %2338 = vmatprep.mubr.bf16.mxu0 %v1486_v53  ;;  %v7232_v35 = vld [vmem:[#allocation62_spill] sm:$0xff] }
 0x1a8   :  { %985 = vst [vmem:[#allocation2 + $0x1a8] sm:$0xff] %v917_v61  ;;  %986 = vst [vmem:[#allocation2 + $0x1b0] sm:$0xff] %v918_v3  ;;  %v7225_v3 = vld [vmem:[#allocation46_spill] sm:$0xff]  ;;  %v7228_v38 = vmax.f32 %v5275_v5, 0.0  ;;  %v7229_v46 = vmax.f32 %v5279_v57, 0.0  ;;  %v5599_v5 = vld [vmem:[#allocation2] sm:$0xff] }
 0x1a9   :  { %987 = vst [vmem:[#allocation2 + $0x1b8] sm:$0xff] %v919_v20  ;;  %988 = vst [vmem:[#allocation2 + $0x1c0] sm:$0xff] %v920_v4  ;;  %v1463_v61 = vpack.c.bf16 %v7222_v0, %v7221_v56  ;;  %v1344_v20 = vmul.f32 %v7225_v3, %v7224_v8  ;;  %v7227_v4 = vfloor.f32 %v7226_v41  ;;  %v5604_v57 = vsel %vm5506_vm14, 1.0, %v5599_v5  ;;  %v7238_v28 = vld [vmem:[#allocation72_spill] sm:$0xff]  ;;  %v7241_v56 = vld [vmem:[#allocation73_spill] sm:$0xff] }
 0x1aa   :  { %989 = vst [vmem:[#allocation2 + $0x1c8] sm:$0xff] %v921_v27  ;;  %990 = vst [vmem:[#allocation2 + $0x1d0] sm:$0xff] %v922_v62  ;;  %v1487_v15 = vpack.c.bf16 %v7229_v46, %v7228_v38  ;;  %v7231_v27 = vld [vmem:[#allocation70_spill] sm:$0xff]  ;;  %v5614_v53 = vsel %vm5525_vm15, 1.0, %v5599_v5  ;;  %v5619_v54 = vsel %vm5532_vm2, 1.0, %v5599_v5  ;;  %v1042_v0 = vadd.f32 0.5, %v7241_v56 }
 0x1ab   :  { %991 = vst [vmem:[#allocation2 + $0x1d8] sm:$0xff] %v923_v36  ;;  %992 = vst [vmem:[#allocation2 + $0x1e0] sm:$0xff] %v924_v51  ;;  %v1151_v49 = vmul.f32 64.0, %v7227_v4  ;;  %v7233_v36 = vsub.f32 %v7200_v7, %v7232_v35  ;;  %v7236_v51 = vld [vmem:[#allocation66_spill] sm:$0xff]  ;;  %2339 = vmatmul.mubr.bf16.vlgmr.msra.gmra.mxu0 %v1463_v61  ;;  %v3990_v7 = vld [vmem:[%s6920_s3 + $0x230] sm:$0xff]   ;;  %v7251_v3 = vmax.f32 %v5339_v11, 0.0  ;;  %v5666_v11 = vmul.f32 %v5619_v54, %v5604_v57 }
 0x1ac   :  { %993 = vst [vmem:[#allocation2 + $0x1e8] sm:$0xff] %v925_v37  ;;  %994 = vst [vmem:[#allocation2 + $0x1f0] sm:$0xff] %v926_v40  ;;  %v7230_v37 = vld [vmem:[#allocation68_spill] sm:$0xff]  ;;  %v7237_v25 = vfloor.f32 %v7236_v51  ;;  %v1359_v40 = vpack.c.bf16 %v1344_v20, %v1343_v33  ;;  %2346 = vmatprep.mubr.bf16.mxu0 %v1487_v15  ;;  %v7242_v61 = vld [vmem:[#allocation74_spill] sm:$0xff] }
 0x1ad   :  { %996 = vst [vmem:[#allocation2 + $0x200] sm:$0xff] %v928_v60  ;;  %997 = vst [vmem:[#allocation2 + $0x208] sm:$0xff] %v929_v6  ;;  %v5588_v62 = vmul.f32 %v7231_v27, %v7230_v37  ;;  %vm5593_vm3 = vcmp.ge.f32.partialorder %v7233_v36, 0.5  ;;  %v1041_v60 = vadd.f32 0.5, %v7238_v28  ;;  %v7239_v6 = vld [vmem:[#allocation37_spill] sm:$0xff]  ;;  %v5623_v33 = vcvt.s32.f32 %v7242_v61  ;;  %v1271_v8 = vld [vmem:[#allocation2 + $0x187] sm:$0xff] }
 0x1ae   :  { %v1152_v63 = vmul.f32 64.0, %v7237_v25  ;;  %v1012_v31 = vadd.s32 104, %v7239_v6  ;;  %7240 = vst [vmem:[#allocation27_spill] sm:$0xff] %v5614_v53  ;;  %2144 = vmatprep.mubr.bf16.mxu1 %v1359_v40  ;;  %v5628_v20 = vsel %vm5593_vm3, 1.0, %v5599_v5  ;;  %v7243_v34 = vld [vmem:[#allocation47_spill] sm:$0xff]  ;;  %v7246_v45 = vld [vmem:[#allocation69_spill] sm:$0xff] }
 0x1af   :  { %v1167_v41 = vsub.f32 %v7243_v34, %v1151_v49  ;;  %v7244_v4 = vld [vmem:[#allocation67_spill] sm:$0xff]  ;;  %v7247_v15 = vfloor.f32 %v7246_v45  ;;  %v1272_v36 = vld [vmem:[#allocation2 + $0x18f] sm:$0xff]  ;;  %v7249_v61 = vmax.f32 %v5335_v59, 0.0  ;;  %v7252_v52 = vld [vmem:[#allocation54_spill] sm:$0xff]  ;;  %v1121_v44 = vmul.f32 0.015625, %v1041_v60 }
 0x1b0   :  { %v7245_v38 = vfloor.f32 %v7244_v4  ;;  %v7248_v51 = vld [vmem:[#allocation52_spill] sm:$0xff]  ;;  %v7250_v40 = vld [vmem:[#allocation53_spill] sm:$0xff]  ;;  %v1346_v23 = vmul.f32 %v7252_v52, %v7251_v3  ;;  %v7254_v32 = vld [vmem:[#allocation42_spill] sm:$0xff]  ;;  %v1122_v52 = vmul.f32 0.015625, %v1042_v0 }
 0x1b1   :  { %v1088_v35 = vmul.f32 8.0, %v7247_v15  ;;  %v1303_v25 = vmul.f32 %v7248_v51, %v1271_v8  ;;  %v1345_v50 = vmul.f32 %v7250_v40, %v7249_v61  ;;  %v1273_v14 = vld [vmem:[#allocation2 + $0x197] sm:$0xff]  ;;  %3863 = vmatpush3.bf16.msra.mxu0 %v7254_v32  ;;  %v7255_v4 = vld [vmem:[#allocation55_spill] sm:$0xff]  ;;  %v7256_v45 = vld [vmem:[#allocation48_spill] sm:$0xff]  ;;  %v5648_v8 = vcvt.s32.f32 %v1012_v31 }
 0x1b2   :  { %v1087_v46 = vmul.f32 8.0, %v7245_v38  ;;  %v7253_v27 = vld [vmem:[#allocation49_spill] sm:$0xff]  ;;  %v1304_v38 = vmul.f32 %v7255_v4, %v1272_v36  ;;  %v5646_v15 = vmul.f32 %v7256_v45, %v1272_v36  ;;  %3864 = vmatprep.subr.bf16.mxu0 %v3990_v7  ;;  %v3980_v51 = vld [vmem:[%s6920_s3 + $0xb8] sm:$0xff]   ;;  %v1043_v32 = vadd.f32 0.5, %v5623_v33 }
 0x1b3   :  { %v1168_v49 = vsub.f32 %v7253_v27, %v1152_v63  ;;  %v7258_v61 = vld [vmem:[#allocation50_spill] sm:$0xff]  ;;  %v1057_v63 = vmul.f32 0.125, %v1041_v60  ;;  %v7260_v4 = vmax.f32 %v5211_v10, 0.0  ;;  %v7261_v36 = vmax.f32 %v5215_v16, 0.0  ;;  %v3981_v31 = vld [vmem:[%s6920_s3 + $0xf0] sm:$0xff]  }
 0x1b4   :  { %7257 = vst [vmem:[#allocation29_spill] sm:$0xff] %v5646_v15  ;;  %v5654_v3 = vmul.f32 %v7258_v61, %v1273_v14  ;;  %v1319_v40 = vpack.c.bf16 %v1304_v38, %v1303_v25  ;;  %v1058_v61 = vmul.f32 0.125, %v1042_v0  ;;  %v1360_v59 = vpack.c.bf16 %v1346_v23, %v1345_v50  ;;  %v5668_v24 = vld [vmem:[#allocation2 + $0x19f] sm:$0xff]  ;;  %v3991_v25 = vld [vmem:[%s6920_s3 + $0x228] sm:$0xff]  }
 0x1b5   :  { %v1464_v45 = vpack.c.bf16 %v7261_v36, %v7260_v4  ;;  %v1103_v10 = vsub.f32 %v7243_v34, %v1087_v46  ;;  %v1104_v16 = vsub.f32 %v7253_v27, %v1088_v35  ;;  %3865 = vmatpush3.bf16.msra.mxu0 %v3990_v7  ;;  %v7262_v38 = vmax.f32 %v5283_v1, 0.0  ;;  %v3982_v7 = vld [vmem:[%s6920_s3 + $0xb0] sm:$0xff]  }
 0x1b6   :  { %7259 = vst [vmem:[#allocation26_spill] sm:$0xff] %v5654_v3  ;;  %2145 = vmatmul.mubr.bf16.vlgmr.msra.gmra.mxu1 %v1319_v40  ;;  %v7263_v23 = vmax.f32 %v5287_v13, 0.0  ;;  %vm5681_vm4 = vcmp.ge.f32.partialorder %v1167_v41, 7.5  ;;  %vm5685_vm5 = vcmp.ge.f32.partialorder %v1168_v49, 7.5  ;;  %v1044_v27 = vadd.f32 0.5, %v5648_v8  ;;  %v3994_v41 = vld [vmem:[%s6920_s3 + $0x220] sm:$0xff]   ;;  %3866 = vmatprep.subr.bf16.mxu0 %v3991_v25 }
 0x1b7   :  { %2347 = vmatmul.mubr.bf16.gmra.mxu0 %v1464_v45  ;;  %3564 = vmatpush3.bf16.msra.mxu1 %v3980_v51  ;;  %v1137_v1 = vfloor.f32 %v1121_v44  ;;  %v1138_v46 = vfloor.f32 %v1122_v52  ;;  %v1073_v13 = vfloor.f32 %v1057_v63  ;;  %v1059_v35 = vmul.f32 0.125, %v1043_v32  ;;  %v7268_v40 = vld [vmem:[#allocation57_spill] sm:$0xff]  ;;  %v7269_v45 = vld [vmem:[#allocation64_spill] sm:$0xff] }
 0x1b8   :  { %v1488_v50 = vpack.c.bf16 %v7263_v23, %v7262_v38  ;;  %2152 = vmatprep.mubr.bf16.mxu1 %v1360_v59  ;;  %3565 = vmatprep.subr.bf16.mxu1 %v3981_v31  ;;  %v1305_v49 = vmul.f32 %v7268_v40, %v1273_v14  ;;  %v1306_v51 = vmul.f32 %v7269_v45, %v5668_v24  ;;  %v3983_v59 = vld [vmem:[%s6920_s3 + $0xe8] sm:$0xff]   ;;  %v1074_v52 = vfloor.f32 %v1058_v61  ;;  %v7271_v4 = vld [vmem:[#allocation65_spill] sm:$0xff] }
 0x1b9   :  { %v5704_v44 = vmul.f32 %v5628_v20, %v5614_v53  ;;  %v7270_v63 = vmax.f32 %v5343_v18, 0.0  ;;  %v7272_v31 = vmax.f32 %v5347_v12, 0.0  ;;  %v5715_v38 = vsel %vm5681_vm4, 1.0, %v5599_v5  ;;  %3867 = vmatpush3.bf16.msra.mxu0 %v3991_v25  ;;  %v3985_v25 = vld [vmem:[%s6920_s3 + $0xe0] sm:$0xff]  }
 0x1ba   :  { %2354 = vmatprep.mubr.bf16.mxu0 %v1488_v50  ;;  %7273 = vst [vmem:[#allocation28_spill] sm:$0xff] %v5715_v38  ;;  %v5720_v23 = vsel %vm5685_vm5, 1.0, %v5599_v5  ;;  %vm5722_vm6 = vcmp.ge.f32.partialorder %v1103_v10, 0.5  ;;  %vm5726_vm7 = vcmp.ge.f32.partialorder %v1104_v16, 0.5  ;;  %v1060_v40 = vmul.f32 0.125, %v1044_v27  ;;  %3868 = vmatprep.subr.bf16.mxu0 %v3994_v41  ;;  %v3984_v16 = vld [vmem:[%s6920_s3 + $0xa8] sm:$0xff]  }
 0x1bb   :  { %v1347_v36 = vmul.f32 %v7271_v4, %v7270_v63  ;;  %v1348_v14 = vmul.f32 %v7230_v37, %v7272_v31  ;;  %7274 = vst [vmem:[#allocation31_spill] sm:$0xff] %v5720_v23  ;;  %v1013_v0 = vadd.s32 112, %v7239_v6  ;;  %3566 = vmatpush3.bf16.msra.mxu1 %v3982_v7  ;;  %v1153_v45 = vmul.f32 64.0, %v1137_v1 }
 0x1bc   :  { %v1154_v63 = vmul.f32 64.0, %v1138_v46  ;;  %v1089_v31 = vmul.f32 8.0, %v1073_v13  ;;  %v1075_v34 = vfloor.f32 %v1059_v35  ;;  %v1320_v60 = vpack.c.bf16 %v1306_v51, %v1305_v49  ;;  %3567 = vmatprep.subr.bf16.mxu1 %v3983_v59  ;;  %v3995_v59 = vld [vmem:[%s6920_s3 + $0x218] sm:$0xff]  }
 0x1bd   :  { %v7279_v10 = vmax.f32 %v5219_v2, 0.0  ;;  %v7280_v15 = vmax.f32 %v5223_v19, 0.0  ;;  %v1090_v7 = vmul.f32 8.0, %v1074_v52  ;;  %v1014_v1 = vadd.s32 120, %v7239_v6  ;;  %v5746_v19 = vld [vmem:[#allocation2 + $0x1a7] sm:$0xff]  ;;  %3869 = vmatpush3.bf16.msra.mxu0 %v3994_v41 }
 0x1be   :  { %v1361_v46 = vpack.c.bf16 %v1348_v14, %v1347_v36  ;;  %v7281_v13 = vmax.f32 %v5291_v47, 0.0  ;;  %v7282_v2 = vmax.f32 %v5295_v21, 0.0  ;;  %v1123_v49 = vmul.f32 0.015625, %v1043_v32  ;;  %2153 = vmatmul.mubr.bf16.gmra.mxu1 %v1320_v60  ;;  %v7283_v14 = vld [vmem:[#allocation71_spill] sm:$0xff]  ;;  %3870 = vmatprep.subr.bf16.mxu0 %v3995_v59 }
 0x1bf   :  { %v1465_v3 = vpack.c.bf16 %v7280_v15, %v7279_v10  ;;  %v5748_v15 = vld [vmem:[#allocation2 + $0x1af] sm:$0xff]  ;;  %v1124_v51 = vmul.f32 0.015625, %v1044_v27  ;;  %v5756_v52 = vsel %vm5722_vm6, 1.0, %v5599_v5  ;;  %v5761_v47 = vsel %vm5726_vm7, 1.0, %v5599_v5  ;;  %3568 = vmatpush3.bf16.msra.mxu1 %v3984_v16 }
 0x1c0   :  { %v1489_v35 = vpack.c.bf16 %v7282_v2, %v7281_v13  ;;  %v1076_v21 = vfloor.f32 %v1060_v40  ;;  %v5763_v36 = vcvt.s32.f32 %v1013_v0  ;;  %2160 = vmatprep.mubr.bf16.mxu1 %v1361_v46  ;;  %v1169_v32 = vsub.f32 %v7238_v28, %v1153_v45  ;;  %v3986_v40 = vld [vmem:[%s6920_s3 + $0xa0] sm:$0xff]   ;;  %3569 = vmatprep.subr.bf16.mxu1 %v3985_v25 }
 0x1c1   :  { %2355 = vmatmul.mubr.bf16.gmra.mxu0 %v1465_v3  ;;  %v1170_v60 = vsub.f32 %v7241_v56, %v1154_v63  ;;  %v1105_v3 = vsub.f32 %v7238_v28, %v1089_v31  ;;  %v1091_v27 = vmul.f32 8.0, %v1075_v34  ;;  %v1307_v61 = vmul.f32 %v7283_v14, %v5746_v19 }
 0x1c2   :  { %2362 = vmatprep.mubr.bf16.mxu0 %v1489_v35  ;;  %v1308_v50 = vmul.f32 %v5588_v62, %v5748_v15  ;;  %v1106_v0 = vsub.f32 %v7241_v56, %v1090_v7  ;;  %v5776_v45 = vcvt.s32.f32 %v1014_v1  ;;  %v7284_v63 = vmax.f32 %v5351_v48, 0.0  ;;  %v3988_v62 = vld [vmem:[%s6920_s3 + $0xd8] sm:$0xff]   ;;  %v3998_v56 = vld [vmem:[%s6920_s3 + $0x210] sm:$0xff]   ;;  %3871 = vmatpush3.bf16.msra.mxu0 %v3995_v59  ;;  %v3999_v59 = vld [vmem:[%s6920_s3 + $0x208] sm:$0xff]  }
 0x1c3   :  { %v7285_v31 = vmax.f32 %v5355_v30, 0.0  ;;  %v1139_v10 = vfloor.f32 %v1123_v49  ;;  %v1140_v16 = vfloor.f32 %v1124_v51  ;;  %v1295_v41 = vmul.f32 %v5756_v52, %v5715_v38  ;;  %3570 = vmatpush3.bf16.msra.mxu1 %v3986_v40  ;;  %v5827_v40 = vld [vmem:[#allocation2 + $0x1b7] sm:$0xff]  ;;  %3872 = vmatprep.subr.bf16.mxu0 %v3998_v56 }
 0x1c4   :  { %v1349_v28 = vmul.f32 %v5604_v57, %v7284_v63  ;;  %v1296_v7 = vmul.f32 %v5761_v47, %v5720_v23  ;;  %v1092_v1 = vmul.f32 8.0, %v1076_v21  ;;  %v1045_v25 = vadd.f32 0.5, %v5763_v36  ;;  %v5829_v63 = vld [vmem:[#allocation2 + $0x1bf] sm:$0xff]  ;;  %3571 = vmatprep.subr.bf16.mxu1 %v3988_v62 }
 0x1c5   :  { %v1350_v34 = vmul.f32 %v5614_v53, %v7285_v31  ;;  %vm5795_vm8 = vcmp.ge.f32.partialorder %v1169_v32, 7.5  ;;  %vm5799_vm9 = vcmp.ge.f32.partialorder %v1170_v60, 7.5  ;;  %vm5803_vm10 = vcmp.ge.f32.partialorder %v1105_v3, 0.5  ;;  %v3989_v32 = vld [vmem:[%s6920_s3 + $0x98] sm:$0xff]   ;;  %v3992_v60 = vld [vmem:[%s6920_s3 + $0xd0] sm:$0xff]  }
 0x1c6   :  { %v1107_v35 = vsub.f32 %v5623_v33, %v1091_v27  ;;  %v1321_v49 = vpack.c.bf16 %v1308_v50, %v1307_v61  ;;  %v7292_v51 = vmax.f32 %v5227_v26, 0.0  ;;  %v7293_v21 = vmax.f32 %v5231_v39, 0.0  ;;  %v5868_v3 = vld [vmem:[#allocation2 + $0x1cf] sm:$0xff]  ;;  %3873 = vmatpush3.bf16.msra.mxu0 %v3998_v56  ;;  %v4002_v56 = vld [vmem:[%s6920_s3 + $0x200] sm:$0xff]  }
 0x1c7   :  { %vm5818_vm11 = vcmp.ge.f32.partialorder %v1106_v0, 0.5  ;;  %v1046_v27 = vadd.f32 0.5, %v5776_v45  ;;  %v1362_v26 = vpack.c.bf16 %v1350_v34, %v1349_v28  ;;  %v7296_v39 = vmax.f32 %v5299_v9, 0.0  ;;  %3572 = vmatpush3.bf16.msra.mxu1 %v3989_v32  ;;  %3874 = vmatprep.subr.bf16.mxu0 %v3999_v59 }
 0x1c8   :  { %v1466_v14 = vpack.c.bf16 %v7293_v21, %v7292_v51  ;;  %v7297_v61 = vmax.f32 %v5303_v17, 0.0  ;;  %v1155_v31 = vmul.f32 64.0, %v1139_v10  ;;  %v1156_v51 = vmul.f32 64.0, %v1140_v16  ;;  %2161 = vmatmul.mubr.bf16.gmra.mxu1 %v1321_v49  ;;  %3573 = vmatprep.subr.bf16.mxu1 %v3992_v60 }
 0x1c9   :  { %v5837_v9 = vsel %vm5795_vm8, 1.0, %v5599_v5  ;;  %v5842_v17 = vsel %vm5803_vm10, 1.0, %v5599_v5  ;;  %v1108_v0 = vsub.f32 %v5648_v8, %v1092_v1  ;;  %v1125_v28 = vmul.f32 0.015625, %v1045_v25  ;;  %2168 = vmatprep.mubr.bf16.mxu1 %v1362_v26 }
 0x1ca   :  { %v1490_v50 = vpack.c.bf16 %v7297_v61, %v7296_v39  ;;  %2363 = vmatmul.mubr.bf16.gmra.mxu0 %v1466_v14  ;;  %v7298_v34 = vmax.f32 %v5359_v43, 0.0  ;;  %v5851_v10 = vsel %vm5818_vm11, 1.0, %v5599_v5  ;;  %vm5853_vm12 = vcmp.ge.f32.partialorder %v1107_v35, 0.5  ;;  %v5866_v14 = vld [vmem:[#allocation2 + $0x1c7] sm:$0xff] }
 0x1cb   :  { %v5857_v46 = vmul.f32 0.125, %v1045_v25  ;;  %v1309_v1 = vmul.f32 %v5666_v11, %v5827_v40  ;;  %v1310_v2 = vmul.f32 %v5704_v44, %v5829_v63  ;;  %v7301_v49 = vmax.f32 %v5363_v58, 0.0  ;;  %v3993_v25 = vld [vmem:[%s6920_s3 + $0x90] sm:$0xff]   ;;  %v3996_v39 = vld [vmem:[%s6920_s3 + $0xc8] sm:$0xff]   ;;  %3875 = vmatpush3.bf16.msra.mxu0 %v3999_v59 }
 0x1cc   :  { %2370 = vmatprep.mubr.bf16.mxu0 %v1490_v50  ;;  %v1351_v62 = vmul.f32 %v5715_v38, %v7298_v34  ;;  %v1126_v35 = vmul.f32 0.015625, %v1046_v27  ;;  %v5876_v11 = vsel %vm5799_vm9, 1.0, %v5599_v5  ;;  %v5880_v44 = vmul.f32 %v5842_v17, %v5837_v9  ;;  %3574 = vmatpush3.bf16.msra.mxu1 %v3993_v25  ;;  %v7308_v34 = vld [vmem:[#allocation10_spill] sm:$0xff] }
 0x1cd   :  { %v1352_v21 = vmul.f32 %v5720_v23, %v7301_v49  ;;  %v1171_v26 = vsub.f32 %v5623_v33, %v1155_v31  ;;  %v1172_v32 = vsub.f32 %v5648_v8, %v1156_v51  ;;  %v5892_v13 = vmul.f32 %v5851_v10, %v5876_v11  ;;  %v5909_v31 = vld [vmem:[#allocation2 + $0x60] sm:$0xff]  ;;  %v5911_v51 = vld [vmem:[#allocation2 + $0x68] sm:$0xff]  ;;  %3575 = vmatprep.subr.bf16.mxu1 %v3996_v39 }
 0x1ce   :  { %vm5894_vm13 = vcmp.ge.f32.partialorder %v1108_v0, 0.5  ;;  %v5901_v33 = vsel %vm5853_vm12, 1.0, %v5599_v5  ;;  %v1141_v8 = vfloor.f32 %v1125_v28  ;;  %v5904_v61 = vmul.f32 %v1295_v41, %v5866_v14  ;;  %v3997_v41 = vld [vmem:[%s6920_s3 + $0x88] sm:$0xff]   ;;  %3876 = vmatprep.subr.bf16.mxu0 %v4002_v56  ;;  %v7318_v39 = vld [vmem:[#allocation11_spill] sm:$0xff] }
 0x1cf   :  { %v5907_v50 = vmul.f32 %v1296_v7, %v5868_v3  ;;  %v5913_v0 = vmul.f32 0.125, %v1046_v27  ;;  %v1322_v49 = vpack.c.bf16 %v1310_v2, %v1309_v1  ;;  %v1363_v6 = vpack.c.bf16 %v1352_v21, %v1351_v62  ;;  %3877 = vmatpush3.bf16.msra.mxu0 %v4002_v56  ;;  %v6008_v56 = vld [vmem:[#allocation2 + $0x1f7] sm:$0xff]  ;;  %v1485_v21 = vld [vmem:[#allocation2 + $0x100] sm:$0xff] }
 0x1d0   :  { %v7304_v16 = vmax.f32 %v5235_v55, 0.0  ;;  %v7305_v28 = vmax.f32 %v5239_v22, 0.0  ;;  %v1142_v7 = vfloor.f32 %v1126_v35  ;;  %v7306_v38 = vmax.f32 %v5307_v29, 0.0  ;;  %v7310_v55 = vld [vmem:[#allocation12_spill] sm:$0xff]  ;;  %v4001_v35 = vld [vmem:[%s6920_s3 + $0x80] sm:$0xff]   ;;  %3576 = vmatpush3.bf16.msra.mxu1 %v3997_v41 }
 0x1d1   :  { %v7307_v27 = vmax.f32 %v5311_v42, 0.0  ;;  %v7309_v1 = vmax.f32 %v7308_v34, 0.0  ;;  %v7311_v22 = vmax.f32 %v7310_v55, 0.0  ;;  %vm5937_vm14 = vcmp.ge.f32.partialorder %v1171_v26, 7.5  ;;  %v4000_v42 = vld [vmem:[%s6920_s3 + $0xc0] sm:$0xff]   ;;  %2169 = vmatmul.mubr.bf16.gmra.mxu1 %v1322_v49  ;;  %v7316_v26 = vld [vmem:[#allocation8_spill] sm:$0xff] }
 0x1d2   :  { %v1467_v23 = vpack.c.bf16 %v7305_v28, %v7304_v16  ;;  %vm5941_vm15 = vcmp.ge.f32.partialorder %v1172_v32, 7.5  ;;  %v5948_v29 = vsel %vm5894_vm13, 1.0, %v5599_v5  ;;  %v5955_v25 = vmul.f32 64.0, %v1141_v8  ;;  %v7321_v28 = vld [vmem:[#allocation13_spill] sm:$0xff]  ;;  %2176 = vmatprep.mubr.bf16.mxu1 %v1363_v6  ;;  %v1282_v6 = vld [vmem:[#allocation2 + $0x1df] sm:$0xff]  ;;  %3577 = vmatprep.subr.bf16.mxu1 %v4000_v42 }
 0x1d3   :  { %v1491_v53 = vpack.c.bf16 %v7307_v27, %v7306_v38  ;;  %v5930_v62 = vmul.f32 %v5837_v9, %v7309_v1  ;;  %v5935_v2 = vmul.f32 %v5876_v11, %v7311_v22  ;;  %v1468_v38 = vpack.c.bf16 %v5911_v51, %v5909_v31  ;;  %v1281_v31 = vld [vmem:[#allocation2 + $0x1d7] sm:$0xff]  ;;  %v1339_v51 = vld [vmem:[#allocation2 + $0x168] sm:$0xff] }
 0x1d4   :  { %2371 = vmatmul.mubr.bf16.gmra.mxu0 %v1467_v23  ;;  %v7317_v32 = vmax.f32 %v7316_v26, 0.0  ;;  %v7319_v60 = vmax.f32 %v7318_v39, 0.0  ;;  %v7322_v27 = vmax.f32 %v7321_v28, 0.0  ;;  %v7323_v49 = vmax.f32 %v5343_v18, 0.0  ;;  %v4003_v22 = vld [vmem:[%s6920_s3 + $0x1f8] sm:$0xff]   ;;  %v7325_v26 = vld [vmem:[#allocation51_spill] sm:$0xff]  ;;  %3578 = vmatpush3.bf16.msra.mxu1 %v4001_v35 }
 0x1d5   :  { %2378 = vmatprep.mubr.bf16.mxu0 %v1491_v53  ;;  %v1323_v8 = vpack.c.bf16 %v5907_v50, %v5904_v61  ;;  %v1078_v1 = vfloor.f32 %v5913_v0  ;;  %v7326_v18 = vld [vmem:[#allocation56_spill] sm:$0xff]  ;;  %v5986_v53 = vld [vmem:[#allocation2 + $0x170] sm:$0xff]  ;;  %v1158_v50 = vmul.f32 64.0, %v1142_v7  ;;  %v7327_v0 = vmax.f32 %v5347_v12, 0.0  ;;  %3691 = vmatprep.subr.bf16.mxu1 %v4003_v22 }
 0x1d6   :  { %v5964_v16 = vpack.c.bf16 %v7319_v60, %v7317_v32  ;;  %v5970_v23 = vpack.c.bf16 %v7323_v49, %v7322_v27  ;;  %v5980_v32 = vmul.f32 %v7325_v26, %v5668_v24  ;;  %v5984_v39 = vmul.f32 %v7326_v18, %v5746_v19  ;;  %v5988_v61 = vld [vmem:[#allocation2 + $0x1e7] sm:$0xff]  ;;  %v7330_v24 = vld [vmem:[#allocation58_spill] sm:$0xff]  ;;  %v1483_v42 = vld [vmem:[#allocation2 + $0xf0] sm:$0xff] }
 0x1d7   :  { %v7328_v60 = vmax.f32 %v5351_v48, 0.0  ;;  %v5998_v27 = vmul.f32 %v7330_v24, %v5748_v15  ;;  %v7331_v19 = vld [vmem:[#allocation70_spill] sm:$0xff]  ;;  %v7332_v48 = vmax.f32 %v5355_v30, 0.0  ;;  %v7333_v41 = vmax.f32 %v5359_v43, 0.0 }
 0x1d8   :  { %7320 = vst [vmem:[#allocation33_spill] sm:$0xff] %v5964_v16  ;;  %7324 = vst [vmem:[#allocation30_spill] sm:$0xff] %v5970_v23  ;;  %v6002_v49 = vmul.f32 %v7331_v19, %v5827_v40  ;;  %v6004_v23 = vld [vmem:[#allocation2 + $0x1ef] sm:$0xff]  ;;  %v6006_v16 = vld [vmem:[#allocation2 + $0x178] sm:$0xff]  ;;  %v6020_v40 = vmul.f32 %v5619_v54, %v5829_v63  ;;  %v6024_v7 = vmul.f32 %v5628_v20, %v5866_v14  ;;  %v7335_v30 = vmax.f32 %v5363_v58, 0.0 }
 0x1d9   :  { %v5994_v28 = vpack.c.bf16 %v7328_v60, %v7327_v0  ;;  %v6016_v15 = vpack.c.bf16 %v7333_v41, %v7332_v48  ;;  %v1484_v0 = vld [vmem:[#allocation2 + $0xf8] sm:$0xff]  ;;  %v6026_v60 = vld [vmem:[#allocation2 + $0x180] sm:$0xff]  ;;  %v7336_v43 = vmax.f32 %v7308_v34, 0.0  ;;  %v6038_v63 = vmul.f32 %v5756_v52, %v5868_v3  ;;  %v7341_v3 = vld [vmem:[#allocation24_spill] sm:$0xff]  ;;  %2177 = vmatmul.mubr.bf16.gmra.mxu1 %v1323_v8 }
 0x1da   :  { %v6041_v14 = vmul.f32 %v5761_v47, %v1281_v31  ;;  %v6050_v58 = vmul.f32 %v5842_v17, %v1282_v6  ;;  %v6054_v34 = vmul.f32 %v5851_v10, %v5988_v61  ;;  %v1492_v41 = vpack.c.bf16 %v1484_v0, %v1483_v42  ;;  %v1460_v42 = vld [vmem:[#allocation2 + $0x78] sm:$0xff] }
 0x1db   :  { %7329 = vst [vmem:[#allocation32_spill] sm:$0xff] %v5994_v28  ;;  %7334 = vst [vmem:[#allocation35_spill] sm:$0xff] %v6016_v15  ;;  %v6034_v48 = vpack.c.bf16 %v7336_v43, %v7335_v30  ;;  %v7339_v15 = vmax.f32 %v7310_v55, 0.0  ;;  %v6062_v43 = vmul.f32 %v5901_v33, %v6004_v23  ;;  %v6066_v55 = vmul.f32 %v5948_v29, %v6008_v56 }
 0x1dc   :  { %7337 = vst [vmem:[#allocation38_spill] sm:$0xff] %v6038_v63  ;;  %7338 = vst [vmem:[#allocation34_spill] sm:$0xff] %v6041_v14  ;;  %v1516_v35 = vpack.c.bf16 %v6054_v34, %v6050_v58  ;;  %2379 = vmatmul.mubr.bf16.gmra.mxu0 %v1468_v38  ;;  %v7342_v30 = vfloor.f32 %v5857_v46  ;;  %v1094_v63 = vmul.f32 8.0, %v1078_v1  ;;  %v6083_v22 = vsel %vm5937_vm14, 1.0, %v5599_v5  ;;  %v1459_v1 = vld [vmem:[#allocation2 + $0x70] sm:$0xff] }
 0x1dd   :  { %v6047_v28 = vpack.c.bf16 %v1339_v51, %v7339_v15  ;;  %v1364_v15 = vpack.c.bf16 %v5935_v2, %v5930_v62  ;;  %v1517_v14 = vpack.c.bf16 %v6066_v55, %v6062_v43  ;;  %2386 = vmatprep.mubr.bf16.mxu0 %v1492_v41  ;;  %v1313_v62 = vmul.f32 %v5880_v44, %v1281_v31 }
 0x1de   :  { %v1314_v2 = vmul.f32 %v5892_v13, %v1282_v6  ;;  %v6088_v46 = vsel %vm5941_vm15, 1.0, %v5599_v5  ;;  %v1355_v38 = vmul.f32 %v6083_v22, %v1339_v51  ;;  %v1173_v44 = vsub.f32 %v5763_v36, %v5955_v25 }
 0x1df   :  { %7340 = vst [vmem:[#allocation36_spill] sm:$0xff] %v6047_v28  ;;  %v1093_v28 = vmul.f32 8.0, %v7342_v30  ;;  %2184 = vmatprep.mubr.bf16.mxu1 %v1364_v15  ;;  %v1356_v8 = vmul.f32 %v6088_v46, %v5986_v53  ;;  %v1174_v13 = vsub.f32 %v5776_v45, %v1158_v50  ;;  %v1110_v6 = vsub.f32 %v5776_v45, %v1094_v63  ;;  %v7343_v15 = vld [vmem:[#allocation22_spill] sm:$0xff] }
 0x1e0   :  { %v1324_v59 = vpack.c.bf16 %v1314_v2, %v1313_v62  ;;  %v1469_v0 = vpack.c.bf16 %v1460_v42, %v1459_v1  ;;  %v1299_v51 = vmul.f32 %v5901_v33, %v6083_v22  ;;  %v1300_v41 = vmul.f32 %v5948_v29, %v6088_v46  ;;  %v1461_v62 = vld [vmem:[#allocation2 + $0x80] sm:$0xff]  ;;  %v1462_v2 = vld [vmem:[#allocation2 + $0x88] sm:$0xff] }
 0x1e1   :  { %v1109_v31 = vsub.f32 %v5763_v36, %v1093_v28  ;;  %v1365_v30 = vpack.c.bf16 %v1356_v8, %v1355_v38  ;;  %v1493_v12 = vpack.c.bf16 %v7343_v15, %v1485_v21  ;;  %vm1189_vm2 = vcmp.ge.f32.partialorder %v1173_v44, 7.5  ;;  %v1369_v38 = vld [vmem:[#allocation2 + $0x198] sm:$0xff] }
 0x1e2   :  { %vm1190_vm3 = vcmp.ge.f32.partialorder %v1174_v13, 7.5  ;;  %2185 = vmatmul.mubr.bf16.gmra.mxu1 %v1324_v59  ;;  %vm1238_vm5 = vcmp.ge.f32.partialorder %v1110_v6, 0.5  ;;  %v1315_v36 = vmul.f32 %v1299_v51, %v5988_v61  ;;  %v1316_v45 = vmul.f32 %v1300_v41, %v6004_v23  ;;  %v1368_v23 = vld [vmem:[#allocation2 + $0x190] sm:$0xff]  ;;  %v7344_v51 = vld [vmem:[#allocation48_spill] sm:$0xff] }
 0x1e3   :  { %vm1237_vm4 = vcmp.ge.f32.partialorder %v1109_v31, 0.5  ;;  %2192 = vmatprep.mubr.bf16.mxu1 %v1365_v30  ;;  %v6106_v25 = vsel %vm1189_vm2, 1.0, %v5599_v5  ;;  %v6109_v50 = vsel %vm1190_vm3, 1.0, %v5599_v5  ;;  %v6119_v61 = vsel %vm1238_vm5, 1.0, %v5599_v5  ;;  %v6125_v31 = vld [vmem:[#allocation2 + $0x1ff] sm:$0xff]  ;;  %v1407_v6 = vld [vmem:[#allocation2 + $0x8f] sm:$0xff] }
 0x1e4   :  { %2387 = vmatmul.mubr.bf16.gmra.mxu0 %v1469_v0  ;;  %v1357_v28 = vmul.f32 %v6106_v25, %v6006_v16  ;;  %v1358_v63 = vmul.f32 %v6109_v50, %v6026_v60  ;;  %v1325_v8 = vpack.c.bf16 %v1316_v45, %v1315_v36  ;;  %v1470_v1 = vpack.c.bf16 %v1462_v2, %v1461_v62  ;;  %v1408_v59 = vld [vmem:[#allocation2 + $0x97] sm:$0xff]  ;;  %v1370_v36 = vld [vmem:[#allocation2 + $0x1a0] sm:$0xff]  ;;  %v1371_v45 = vld [vmem:[#allocation2 + $0x1a8] sm:$0xff] }
 0x1e5   :  { %2394 = vmatprep.mubr.bf16.mxu0 %v1493_v12  ;;  %v6116_v12 = vsel %vm1237_vm4, 1.0, %v5599_v5  ;;  %v1302_v44 = vmul.f32 %v6119_v61, %v6109_v50  ;;  %v1528_v21 = vpack.c.bf16 %v1369_v38, %v1368_v23  ;;  %v1423_v41 = vmul.f32 %v7344_v51, %v1407_v6  ;;  %v7345_v30 = vld [vmem:[#allocation50_spill] sm:$0xff]  ;;  %v6139_v51 = vld [vmem:[#allocation2 + $0x1c8] sm:$0xff] }
 0x1e6   :  { %v1301_v42 = vmul.f32 %v6116_v12, %v6106_v25  ;;  %v1366_v13 = vpack.c.bf16 %v1358_v63, %v1357_v28  ;;  %v1424_v15 = vmul.f32 %v7345_v30, %v1408_v59  ;;  %v1372_v28 = vld [vmem:[#allocation2 + $0x1b0] sm:$0xff]  ;;  %v6131_v63 = vld [vmem:[#allocation2 + $0x1b8] sm:$0xff]  ;;  %v1529_v2 = vpack.c.bf16 %v1371_v45, %v1370_v36  ;;  %v6137_v59 = vld [vmem:[#allocation2 + $0x1c0] sm:$0xff] }
 0x1e7   :  { %v1318_v0 = vmul.f32 %v1302_v44, %v6125_v31  ;;  %v6146_v30 = vld [vmem:[#allocation2 + $0x1d0] sm:$0xff] }
 0x1e8   :  { %v1317_v5 = vmul.f32 %v1301_v42, %v6008_v56  ;;  %v1410_v56 = vld [vmem:[#allocation2 + $0xa7] sm:$0xff]  ;;  %v7346_v42 = vld [vmem:[#allocation46_spill] sm:$0xff] }
 0x1e9   :  { %v1384_v44 = vmul.f32 %v7346_v42, %v1368_v23  ;;  %v1426_v6 = vmul.f32 %v7326_v18, %v1410_v56  ;;  %v4005_v18 = vld [vmem:[%s6920_s3 + $0x1f0] sm:$0xff]  }
 0x1ea   :  { %2193 = vmatmul.mubr.bf16.gmra.mxu1 %v1325_v8  ;;  %v1326_v62 = vpack.c.bf16 %v1318_v0, %v1317_v5  ;;  %v1439_v8 = vpack.c.bf16 %v1424_v15, %v1423_v41  ;;  %v7347_v5 = vld [vmem:[#allocation45_spill] sm:$0xff]  ;;  %v4004_v41 = vld [vmem:[%s6920_s3 + $0x1b8] sm:$0xff]  }
 0x1eb   :  { %2200 = vmatprep.mubr.bf16.mxu1 %v1366_v13  ;;  %v1409_v13 = vld [vmem:[#allocation2 + $0x9f] sm:$0xff]  ;;  %v1383_v0 = vmul.f32 %v7347_v5, %v7341_v3  ;;  %v7348_v56 = vld [vmem:[#allocation53_spill] sm:$0xff] }
 0x1ec   :  { %2395 = vmatmul.mubr.bf16.gmra.mxu0 %v1470_v1  ;;  %v1530_v1 = vpack.c.bf16 %v6131_v63, %v1372_v28  ;;  %v6148_v15 = vld [vmem:[#allocation2 + $0x1d8] sm:$0xff]  ;;  %v1385_v42 = vmul.f32 %v7348_v56, %v1369_v38  ;;  %v1388_v56 = vmul.f32 %v7230_v37, %v1372_v28 }
 0x1ed   :  { %3878 = vmatprep.mubr.bf16.mxu0 %v1528_v21  ;;  %v1425_v21 = vmul.f32 %v7325_v26, %v1409_v13  ;;  %v1399_v23 = vpack.c.bf16 %v1384_v44, %v1383_v0  ;;  %v1531_v26 = vpack.c.bf16 %v6139_v51, %v6137_v59  ;;  %v4006_v13 = vld [vmem:[%s6920_s3 + $0x1b0] sm:$0xff]   ;;  %v7349_v44 = vld [vmem:[#allocation54_spill] sm:$0xff] }
 0x1ee   :  { %v1386_v5 = vmul.f32 %v7349_v44, %v1370_v36 }
 0x1f0   :  { %v1400_v38 = vpack.c.bf16 %v1386_v5, %v1385_v42  ;;  %v4010_v42 = vld [vmem:[%s6920_s3 + $0x1a0] sm:$0xff]  }
 0x1f2   :  { %2201 = vmatmul.mubr.bf16.gmra.mxu1 %v1326_v62  ;;  %v1440_v62 = vpack.c.bf16 %v1426_v6, %v1425_v21  ;;  %v4007_v21 = vld [vmem:[%s6920_s3 + $0x1e8] sm:$0xff]  }
 0x1f3   :  { %2241 = vmatprep.mubr.bf16.mxu1 %v1439_v8  ;;  %v1411_v8 = vld [vmem:[#allocation2 + $0xaf] sm:$0xff] }
 0x1f4   :  { %3879 = vmatmul.mubr.bf16.vlgmr.msra.gmra.mxu0 %v1529_v2  ;;  %v1532_v2 = vpack.c.bf16 %v6148_v15, %v6146_v30  ;;  %v1427_v6 = vmul.f32 %v7330_v24, %v1411_v8  ;;  %v4008_v24 = vld [vmem:[%s6920_s3 + $0x1a8] sm:$0xff]   ;;  %v1413_v8 = vld [vmem:[#allocation2 + $0xbf] sm:$0xff] }
 0x1f5   :  { %3882 = vmatprep.mubr.bf16.mxu0 %v1530_v1  ;;  %v1412_v1 = vld [vmem:[#allocation2 + $0xb7] sm:$0xff]  ;;  %v1429_v44 = vmul.f32 %v5619_v54, %v1413_v8 }
 0x1f6   :  { %v1428_v0 = vmul.f32 %v7331_v19, %v1412_v1  ;;  %v1414_v1 = vld [vmem:[#allocation2 + $0xc7] sm:$0xff]  ;;  %v4013_v54 = vld [vmem:[%s6920_s3 + $0x1d0] sm:$0xff]  }
 0x1f7   :  { %v1430_v5 = vmul.f32 %v5628_v20, %v1414_v1  ;;  %v1415_v20 = vld [vmem:[#allocation2 + $0xcf] sm:$0xff] }
 0x1f8   :  { %v4015_v1 = vld [vmem:[%s6920_s3 + $0x1c8] sm:$0xff]  }
 0x1f9   :  { %v1442_v28 = vpack.c.bf16 %v1430_v5, %v1429_v44  ;;  %v7352_v44 = vld [vmem:[#allocation31_spill] sm:$0xff] }
 0x1fa   :  { %2242 = vmatmul.mubr.bf16.vlgmr.msra.gmra.mxu1 %v1399_v23  ;;  %v6169_v23 = vld [vmem:[#allocation2 + $0x1e8] sm:$0xff]  ;;  %v1392_v5 = vmul.f32 %v7352_v44, %v6146_v30 }
 0x1fb   :  { %3692 = vmatpush3.bf16.msra.mxu1 %v4004_v41  ;;  %2249 = vmatprep.mubr.bf16.mxu1 %v1440_v62  ;;  %v6167_v41 = vld [vmem:[#allocation2 + $0x1e0] sm:$0xff]  ;;  %v1441_v62 = vpack.c.bf16 %v1428_v0, %v1427_v6  ;;  %v1527_v6 = vld [vmem:[#allocation2 + $0x208] sm:$0xff]  ;;  %v4011_v0 = vld [vmem:[%s6920_s3 + $0x1d8] sm:$0xff]  }
 0x1fc   :  { %3883 = vmatmul.mubr.bf16.gmra.mxu0 %v1531_v26  ;;  %3693 = vmatprep.subr.bf16.mxu1 %v4005_v18  ;;  %v6171_v26 = vld [vmem:[#allocation2 + $0x1f0] sm:$0xff]  ;;  %v6173_v18 = vld [vmem:[#allocation2 + $0x1f8] sm:$0xff]  ;;  %v1533_v36 = vpack.c.bf16 %v6169_v23, %v6167_v41  ;;  %v1394_v30 = vmul.f32 %v5876_v11, %v6167_v41 }
 0x1fd   :  { %3886 = vmatprep.mubr.bf16.mxu0 %v1532_v2  ;;  %v1534_v19 = vpack.c.bf16 %v6173_v18, %v6171_v26  ;;  %v4009_v2 = vld [vmem:[%s6920_s3 + $0x1e0] sm:$0xff]  }
 0x1ff   :  { %3694 = vmatpush3.bf16.msra.mxu1 %v4006_v13  ;;  %v1387_v13 = vmul.f32 %v7271_v4, %v1371_v45  ;;  %v4012_v45 = vld [vmem:[%s6920_s3 + $0x198] sm:$0xff]  }
 0x200   :  { %3695 = vmatprep.subr.bf16.mxu1 %v4007_v21  ;;  %v6192_v21 = vld [vmem:[#allocation2 + $0x200] sm:$0xff] }
 0x201   :  { %v1401_v4 = vpack.c.bf16 %v1388_v56, %v1387_v13  ;;  %v1535_v37 = vpack.c.bf16 %v1527_v6, %v6192_v21  ;;  %v7351_v56 = vld [vmem:[#allocation28_spill] sm:$0xff]  ;;  %v4018_v6 = vld [vmem:[%s6920_s3 + $0x180] sm:$0xff]   ;;  %v1398_v41 = vmul.f32 %v6109_v50, %v6192_v21  ;;  %v7363_v21 = vld [vmem:[#allocation34_spill] sm:$0xff] }
 0x202   :  { %2250 = vmatmul.mubr.bf16.gmra.mxu1 %v1400_v38  ;;  %v1416_v38 = vld [vmem:[#allocation2 + $0xd7] sm:$0xff]  ;;  %v7361_v50 = vld [vmem:[#allocation35_spill] sm:$0xff] }
 0x203   :  { %2257 = vmatprep.mubr.bf16.mxu1 %v1441_v62  ;;  %3696 = vmatpush3.bf16.msra.mxu1 %v4008_v24  ;;  %v7350_v24 = vld [vmem:[#allocation27_spill] sm:$0xff]  ;;  %v1432_v8 = vmul.f32 %v5761_v47, %v1416_v38 }
 0x204   :  { %3887 = vmatmul.mubr.bf16.gmra.mxu0 %v1533_v36  ;;  %3697 = vmatprep.subr.bf16.mxu1 %v4009_v2  ;;  %v1389_v36 = vmul.f32 %v5604_v57, %v6131_v63  ;;  %v1390_v62 = vmul.f32 %v7350_v24, %v6137_v59  ;;  %v1431_v2 = vmul.f32 %v5756_v52, %v1415_v20  ;;  %v4016_v57 = vld [vmem:[%s6920_s3 + $0x188] sm:$0xff]   ;;  %v4017_v59 = vld [vmem:[%s6920_s3 + $0x1c0] sm:$0xff]  }
 0x205   :  { %3890 = vmatprep.mubr.bf16.mxu0 %v1534_v19  ;;  %v4014_v19 = vld [vmem:[%s6920_s3 + $0x190] sm:$0xff]   ;;  %v1417_v52 = vld [vmem:[#allocation2 + $0xdf] sm:$0xff]  ;;  %v1418_v47 = vld [vmem:[#allocation2 + $0xe7] sm:$0xff] }
 0x206   :  { %v1402_v13 = vpack.c.bf16 %v1390_v62, %v1389_v36  ;;  %v1443_v63 = vpack.c.bf16 %v1432_v8, %v1431_v2  ;;  %v1421_v36 = vld [vmem:[#allocation2 + $0xff] sm:$0xff]  ;;  %v1422_v24 = vld [vmem:[#allocation2 + $0x107] sm:$0xff]  ;;  %v1395_v62 = vmul.f32 %v6083_v22, %v6169_v23  ;;  %v7353_v22 = vld [vmem:[#allocation33_spill] sm:$0xff] }
 0x207   :  { %3698 = vmatpush3.bf16.msra.mxu1 %v4010_v42  ;;  %v1391_v42 = vmul.f32 %v7351_v56, %v6139_v51  ;;  %v1393_v51 = vmul.f32 %v5837_v9, %v6148_v15  ;;  %v1437_v9 = vmul.f32 %v6116_v12, %v1421_v36  ;;  %v1438_v11 = vmul.f32 %v6119_v61, %v1422_v24  ;;  %v7354_v23 = vld [vmem:[#allocation26_spill] sm:$0xff] }
 0x208   :  { %3699 = vmatprep.subr.bf16.mxu1 %v4011_v0  ;;  %v1433_v0 = vmul.f32 %v5842_v17, %v1417_v52  ;;  %v7357_v8 = vld [vmem:[#allocation30_spill] sm:$0xff] }
 0x209   :  { %v1404_v38 = vpack.c.bf16 %v1394_v30, %v1393_v51 }
 0x20a   :  { %2258 = vmatmul.mubr.bf16.gmra.mxu1 %v1401_v4  ;;  %v1434_v4 = vmul.f32 %v5851_v10, %v1418_v47 }
 0x20b   :  { %2265 = vmatprep.mubr.bf16.mxu1 %v1442_v28  ;;  %3700 = vmatpush3.bf16.msra.mxu1 %v4012_v45  ;;  %v1419_v28 = vld [vmem:[#allocation2 + $0xef] sm:$0xff] }
 0x20c   :  { %3891 = vmatmul.mubr.bf16.gmra.mxu0 %v1535_v37  ;;  %3701 = vmatprep.subr.bf16.mxu1 %v4013_v54  ;;  %v1403_v37 = vpack.c.bf16 %v1392_v5, %v1391_v42  ;;  %v1444_v45 = vpack.c.bf16 %v1434_v4, %v1433_v0  ;;  %v1420_v54 = vld [vmem:[#allocation2 + $0xf7] sm:$0xff]  ;;  %v1435_v20 = vmul.f32 %v5901_v33, %v1419_v28 }
 0x20d   :  { %v1436_v17 = vmul.f32 %v5948_v29, %v1420_v54  ;;  %v1446_v33 = vpack.c.bf16 %v1438_v11, %v1437_v9  ;;  %v1397_v29 = vmul.f32 %v6106_v25, %v6173_v18  ;;  %v7360_v25 = vpack.c.bf16 %v6002_v49, %v5998_v27  ;;  %v1494_v27 = vld [vmem:[#allocation2 + $0x207] sm:$0xff] }
 0x20e   :  { %v7362_v18 = vpack.c.bf16 %v6024_v7, %v6020_v40  ;;  %v7368_v49 = vpack.c.bf16 %v7341_v3, %v6026_v60  ;;  %v1509_v40 = vmul.f32 %v6116_v12, %v6125_v31  ;;  %v1510_v7 = vmul.f32 %v6119_v61, %v1494_v27 }
 0x20f   :  { %3702 = vmatpush3.bf16.msra.mxu1 %v4014_v19  ;;  %v1445_v10 = vpack.c.bf16 %v1436_v17, %v1435_v20  ;;  %v1396_v19 = vmul.f32 %v6088_v46, %v6171_v26  ;;  %v1406_v2 = vpack.c.bf16 %v1398_v41, %v1397_v29  ;;  %v7355_v46 = vld [vmem:[#allocation29_spill] sm:$0xff] }
 0x210   :  { %3703 = vmatprep.subr.bf16.mxu1 %v4015_v1  ;;  %v7356_v26 = vpack.c.bf16 %v7354_v23, %v7355_v46  ;;  %v7358_v1 = vpack.c.bf16 %v5984_v39, %v5980_v32  ;;  %v7366_v32 = vld [vmem:[#allocation36_spill] sm:$0xff]  ;;  %v7367_v39 = vpack.c.bf16 %v6006_v16, %v5986_v53 }
 0x211   :  { %v1405_v15 = vpack.c.bf16 %v1396_v19, %v1395_v62 }
 0x212   :  { %2266 = vmatmul.mubr.bf16.gmra.mxu1 %v1402_v13  ;;  %v7359_v13 = vld [vmem:[#allocation32_spill] sm:$0xff] }
 0x213   :  { %2273 = vmatprep.mubr.bf16.mxu1 %v1443_v63  ;;  %3704 = vmatpush3.bf16.msra.mxu1 %v4016_v57  ;;  %v7364_v57 = vld [vmem:[#allocation38_spill] sm:$0xff] }
 0x214   :  { %3705 = vmatprep.subr.bf16.mxu1 %v4017_v59  ;;  %v7365_v63 = vpack.c.bf16 %v7363_v21, %v7364_v57 }
 0x217   :  { %3706 = vmatpush3.bf16.msra.mxu1 %v4018_v6 }
 0x21a   :  { %2274 = vmatmul.mubr.bf16.gmra.mxu1 %v1403_v37 }
 0x21b   :  { %2281 = vmatprep.mubr.bf16.mxu1 %v1444_v45 }
 0x222   :  { %2282 = vmatmul.mubr.bf16.gmra.mxu1 %v1404_v38 }
 0x223   :  { %2289 = vmatprep.mubr.bf16.mxu1 %v1445_v10 }
 0x22a   :  { %2290 = vmatmul.mubr.bf16.gmra.mxu1 %v1405_v15 }
 0x22b   :  { %2297 = vmatprep.mubr.bf16.mxu1 %v1446_v33 }
 0x232   :  { %2298 = vmatmul.mubr.bf16.gmra.mxu1 %v1406_v2 }
 0x233   :  { %2435 = vmatprep.mubr.bf16.mxu1 %v7353_v22 }
 0x23a   :  { %2436 = vmatmul.mubr.bf16.vlgmr.msra.gmra.mxu1 %v7356_v26 }
 0x23b   :  { %2443 = vmatprep.mubr.bf16.mxu1 %v7357_v8 }
 0x242   :  { %2444 = vmatmul.mubr.bf16.gmra.mxu1 %v7358_v1 }
 0x243   :  { %2451 = vmatprep.mubr.bf16.mxu1 %v7359_v13  ;;  %v3027_v13 = vld [vmem:[%s6922_s5] sm:$0xf] }
 0x244   :  { %3945 = vmatprep.subr.msk.bf16.mxu0 %vm222_vm0, %v3027_v13 }
 0x24a   :  { %2452 = vmatmul.mubr.bf16.gmra.mxu1 %v7360_v25  ;;  %v3053_v25 = vsel %vm222_vm0, %v3027_v13, 0  ;;  %v3014_v13 = vld [vmem:[%s6923_s1 + $0x58] sm:$0xff] }
 0x24b   :  { %2459 = vmatprep.mubr.bf16.mxu1 %v7361_v50  ;;  %3927 = vmatpush3.bf16.msra.mxu0 %v3053_v25 }
 0x252   :  { %2460 = vmatmul.mubr.bf16.gmra.mxu1 %v7362_v18 }
 0x253   :  { %2467 = vmatprep.mubr.bf16.mxu1 %v6034_v48  ;;  %v1518_v48 = vpack.c.bf16 %v1510_v7, %v1509_v40 }
 0x25a   :  { %2468 = vmatmul.mubr.bf16.gmra.mxu1 %v7365_v63  ;;  %v3003_v63 = vld [vmem:[%s6923_s1] sm:$0xff] }
 0x25b   :  { %2475 = vmatprep.mubr.bf16.mxu1 %v7366_v32  ;;  %v3004_v32 = vld [vmem:[%s6923_s1 + $0x8] sm:$0xff] }
 0x25c   :  { %v3019_v27 = vpack.c.bf16 %v3004_v32, %v3003_v63 }
 0x25e   :  { %3928 = vmatprep.mubr.msk.bf16.mxu0 %vm125_vm1, %v3019_v27 }
 0x262   :  { %2476 = vmatmul.mubr.bf16.gmra.mxu1 %v1516_v35 }
 0x263   :  { %2483 = vmatprep.mubr.bf16.mxu1 %v7367_v39  ;;  %v3005_v39 = vld [vmem:[%s6923_s1 + $0x10] sm:$0xff] }
 0x26a   :  { %2484 = vmatmul.mubr.bf16.gmra.mxu1 %v1517_v14 }
 0x26b   :  { %2491 = vmatprep.mubr.bf16.mxu1 %v7368_v49  ;;  %v6283_v58 = vpop.f32.mrf.mxu0  ;;  %v3006_v49 = vld [vmem:[%s6923_s1 + $0x18] sm:$0xff] }
 0x26d   :  { %v6285_v53 = vpop.f32.mrf.mxu0 }
 0x26e   :  { %v3645_v25 = vadd.f32 %v6285_v53, %v6283_v58 }
 0x26f   :  { %v6289_v43 = vpop.f32.mrf.mxu0 }
 0x271   :  { %v6293_v12 = vpop.f32.mrf.mxu0 }
 0x272   :  { %2492 = vmatmul.mubr.bf16.gmra.mxu1 %v1518_v48  ;;  %v3020_v48 = vpack.c.bf16 %v3006_v49, %v3005_v39 }
 0x274   :  { %3929 = vmatmul.mubr.msk.bf16.vlgmr.msra.gmra.mxu0 %vm125_vm1, %v3020_v48 }
 0x276   :  { %v3515_v16 = vpop.f32.mrf.mxu1 }
 0x277   :  { %v6297_v52 = vpop.f32.mrf.mxu0 }
 0x278   :  { %v3516_v34 = vpop.f32.mrf.mxu1 }
 0x279   :  { %v6287_v35 = vadd.f32 %v3516_v34, %v3515_v16  ;;  %v6301_v44 = vpop.f32.mrf.mxu0 }
 0x27a   :  { %v3518_v14 = vpop.f32.mrf.mxu1 }
 0x27b   :  { %v6305_v4 = vpop.f32.mrf.mxu0 }
 0x27c   :  { %v3519_v60 = vpop.f32.mrf.mxu1 }
 0x27d   :  { %v6291_v3 = vadd.f32 %v3519_v60, %v3518_v14  ;;  %v6309_v54 = vpop.f32.mrf.mxu0 }
 0x27e   :  { %v3521_v55 = vpop.f32.mrf.mxu1 }
 0x280   :  { %v3522_v61 = vpop.f32.mrf.mxu1 }
 0x281   :  { %v6295_v31 = vadd.f32 %v3522_v61, %v3521_v55  ;;  %v6313_v17 = vpop.f32.mrf.mxu0  ;;  %v3007_v61 = vld [vmem:[%s6923_s1 + $0x20] sm:$0xff] }
 0x282   :  { %v3524_v59 = vpop.f32.mrf.mxu1 }
 0x283   :  { %v6317_v24 = vpop.f32.mrf.mxu0 }
 0x284   :  { %v3525_v47 = vpop.f32.mrf.mxu1 }
 0x285   :  { %v6299_v56 = vadd.f32 %v3525_v47, %v3524_v59  ;;  %v6321_v11 = vpop.f32.mrf.mxu0  ;;  %v3008_v59 = vld [vmem:[%s6923_s1 + $0x28] sm:$0xff]  ;;  %v3009_v47 = vld [vmem:[%s6923_s1 + $0x30] sm:$0xff] }
 0x287   :  { %v6325_v41 = vpop.f32.mrf.mxu0 }
 0x288   :  { %v3527_v42 = vpop.f32.mrf.mxu1 }
 0x28a   :  { %v3528_v5 = vpop.f32.mrf.mxu1  ;;  %v6329_v46 = vpop.f32.mrf.mxu0 }
 0x28b   :  { %v6303_v6 = vadd.f32 %v3528_v5, %v3527_v42  ;;  %v3021_v5 = vpack.c.bf16 %v3008_v59, %v3007_v61 }
 0x28c   :  { %v3530_v0 = vpop.f32.mrf.mxu1  ;;  %v6338_v50 = vpop.f32.mrf.mxu0 }
 0x28d   :  { %3932 = vmatprep.mubr.msk.bf16.mxu0 %vm125_vm1, %v3021_v5 }
 0x28e   :  { %v3531_v37 = vpop.f32.mrf.mxu1  ;;  %v6354_v40 = vpop.f32.mrf.mxu0 }
 0x28f   :  { %v6307_v45 = vadd.f32 %v3531_v37, %v3530_v0  ;;  %v3010_v0 = vld [vmem:[%s6923_s1 + $0x38] sm:$0xff] }
 0x290   :  { %v6360_v14 = vpop.f32.mrf.mxu0  ;;  %v3022_v37 = vpack.c.bf16 %v3010_v0, %v3009_v47 }
 0x291   :  { %v3533_v28 = vpop.f32.mrf.mxu1 }
 0x292   :  { %3933 = vmatmul.mubr.msk.bf16.gmra.mxu0 %vm125_vm1, %v3022_v37 }
 0x293   :  { %v3534_v51 = vpop.f32.mrf.mxu1 }
 0x294   :  { %v6311_v30 = vadd.f32 %v3534_v51, %v3533_v28  ;;  %v6376_v28 = vpop.f32.mrf.mxu0 }
 0x295   :  { %v3536_v20 = vpop.f32.mrf.mxu1 }
 0x297   :  { %v3537_v38 = vpop.f32.mrf.mxu1 }
 0x298   :  { %v6315_v10 = vadd.f32 %v3537_v38, %v3536_v20 }
 0x299   :  { %v3539_v36 = vpop.f32.mrf.mxu1 }
 0x29b   :  { %v3540_v62 = vpop.f32.mrf.mxu1 }
 0x29c   :  { %v6319_v19 = vadd.f32 %v3540_v62, %v3539_v36  ;;  %v4019_v36 = vld [vmem:[%s6924_s4 + $0x38] sm:$0xff]   ;;  %v6385_v62 = vpop.f32.mrf.mxu0 }
 0x29d   :  { %v3542_v9 = vpop.f32.mrf.mxu1  ;;  %3894 = vmatprep.subr.bf16.mxu1 %v4019_v36 }
 0x29e   :  { %3895 = vmatpush3.bf16.msra.mxu1 %v4019_v36  ;;  %v6402_v63 = vpop.f32.mrf.mxu0 }
 0x29f   :  { %v3543_v15 = vpop.f32.mrf.mxu1 }
 0x2a0   :  { %v6323_v33 = vadd.f32 %v3543_v15, %v3542_v9  ;;  %v6411_v48 = vpop.f32.mrf.mxu0 }
 0x2a2   :  { %v3545_v29 = vpop.f32.mrf.mxu1 }
 0x2a4   :  { %v3546_v2 = vpop.f32.mrf.mxu1 }
 0x2a5   :  { %v6327_v22 = vadd.f32 %v3546_v2, %v3545_v29  ;;  %v3011_v29 = vld [vmem:[%s6923_s1 + $0x40] sm:$0xff]  ;;  %v3012_v2 = vld [vmem:[%s6923_s1 + $0x48] sm:$0xff] }
 0x2a6   :  { %v3548_v23 = vpop.f32.mrf.mxu1 }
 0x2a8   :  { %v3549_v26 = vpop.f32.mrf.mxu1 }
 0x2a9   :  { %v6331_v8 = vadd.f32 %v3549_v26, %v3548_v23  ;;  %v3013_v23 = vld [vmem:[%s6923_s1 + $0x50] sm:$0xff] }
 0x2aa   :  { %v3551_v1 = vpop.f32.mrf.mxu1 }
 0x2ac   :  { %v3552_v18 = vpop.f32.mrf.mxu1 }
 0x2ad   :  { %v6340_v21 = vadd.f32 %v3552_v18, %v3551_v1  ;;  %v3023_v1 = vpack.c.bf16 %v3012_v2, %v3011_v29 }
 0x2ae   :  { %v3554_v57 = vpop.f32.mrf.mxu1 }
 0x2af   :  { %3936 = vmatprep.mubr.msk.bf16.mxu0 %vm125_vm1, %v3023_v1 }
 0x2b0   :  { %v3555_v7 = vpop.f32.mrf.mxu1 }
 0x2b1   :  { %v6356_v16 = vadd.f32 %v3555_v7, %v3554_v57  ;;  %v3024_v57 = vpack.c.bf16 %v3014_v13, %v3013_v23 }
 0x2b2   :  { %v3557_v34 = vpop.f32.mrf.mxu1 }
 0x2b3   :  { %3937 = vmatmul.mubr.msk.bf16.gmra.mxu0 %vm125_vm1, %v3024_v57 }
 0x2b4   :  { %v3558_v60 = vpop.f32.mrf.mxu1 }
 0x2b5   :  { %v6362_v55 = vadd.f32 %v3558_v60, %v3557_v34  ;;  %v6416_v60 = vpop.f32.mrf.mxu0 }
 0x2b6   :  { %v3560_v42 = vpop.f32.mrf.mxu1 }
 0x2b7   :  { %v6421_v5 = vpop.f32.mrf.mxu0 }
 0x2b8   :  { %v3561_v51 = vpop.f32.mrf.mxu1 }
 0x2b9   :  { %v6379_v20 = vadd.f32 %v3561_v51, %v3560_v42 }
 0x2ba   :  { %v3579_v38 = vpop.f32.mrf.mxu1 }
 0x2bb   :  { %7369 = vst [vmem:[#allocation40_spill] sm:$0xff] %v6379_v20 }
 0x2bc   :  { %v3580_v9 = vpop.f32.mrf.mxu1 }
 0x2bd   :  { %v3581_v15 = vadd.f32 %v3580_v9, %v3579_v38  ;;  %v6426_v38 = vpop.f32.mrf.mxu0 }
 0x2be   :  { %v3582_v26 = vpop.f32.mrf.mxu1 }
 0x2bf   :  { %v2244_v18 = vadd.f32 %v3581_v15, %v6287_v35  ;;  %v6431_v29 = vpop.f32.mrf.mxu0 }
 0x2c0   :  { %v3583_v32 = vpop.f32.mrf.mxu1 }
 0x2c1   :  { %v3584_v39 = vadd.f32 %v3583_v32, %v3582_v26  ;;  %v6405_v27 = vadd.f32 %v3645_v25, %v2244_v18  ;;  %v6436_v1 = vpop.f32.mrf.mxu0 }
 0x2c2   :  { %v3585_v49 = vpop.f32.mrf.mxu1 }
 0x2c3   :  { %v6409_v7 = vadd.f32 %v3584_v39, %v6291_v3  ;;  %v6441_v57 = vpop.f32.mrf.mxu0 }
 0x2c4   :  { %v3586_v58 = vpop.f32.mrf.mxu1 }
 0x2c5   :  { %v3587_v53 = vadd.f32 %v3586_v58, %v3585_v49  ;;  %v6446_v58 = vpop.f32.mrf.mxu0 }
 0x2c6   :  { %v3588_v35 = vpop.f32.mrf.mxu1  ;;  %7370 = vst [vmem:[#allocation39_spill] sm:$0xff] %v6446_v58 }
 0x2c7   :  { %v6414_v34 = vadd.f32 %v3587_v53, %v6295_v31 }
 0x2c8   :  { %v3589_v61 = vpop.f32.mrf.mxu1 }
 0x2c9   :  { %v3590_v59 = vadd.f32 %v3589_v61, %v3588_v35  ;;  %v3015_v61 = vld [vmem:[%s6923_s1 + $0x60] sm:$0xff] }
 0x2ca   :  { %v3591_v47 = vpop.f32.mrf.mxu1 }
 0x2cb   :  { %v6419_v42 = vadd.f32 %v3590_v59, %v6299_v56 }
 0x2cc   :  { %v3592_v3 = vpop.f32.mrf.mxu1 }
 0x2cd   :  { %v3593_v0 = vadd.f32 %v3592_v3, %v3591_v47  ;;  %v3018_v3 = vld [vmem:[%s6923_s1 + $0x78] sm:$0xff] }
 0x2ce   :  { %v3594_v37 = vpop.f32.mrf.mxu1 }
 0x2cf   :  { %v6424_v51 = vadd.f32 %v3593_v0, %v6303_v6  ;;  %v6463_v0 = vpop.f32.mrf.mxu0 }
 0x2d0   :  { %v3595_v31 = vpop.f32.mrf.mxu1  ;;  %7371 = vst [vmem:[#allocation41_spill] sm:$0xff] %v6463_v0 }
 0x2d1   :  { %v3596_v36 = vadd.f32 %v3595_v31, %v3594_v37 }
 0x2d2   :  { %v3597_v9 = vpop.f32.mrf.mxu1 }
 0x2d3   :  { %v6429_v15 = vadd.f32 %v3596_v36, %v6307_v45 }
 0x2d4   :  { %v3598_v56 = vpop.f32.mrf.mxu1 }
 0x2d5   :  { %v3599_v2 = vadd.f32 %v3598_v56, %v3597_v9  ;;  %v6470_v56 = vpop.f32.mrf.mxu0 }
 0x2d6   :  { %v3600_v23 = vpop.f32.mrf.mxu1  ;;  %7372 = vst [vmem:[#allocation5_spill] sm:$0xff] %v6470_v56 }
 0x2d7   :  { %v6434_v26 = vadd.f32 %v3599_v2, %v6311_v30 }
 0x2d8   :  { %v3601_v6 = vpop.f32.mrf.mxu1 }
 0x2d9   :  { %v3602_v13 = vadd.f32 %v3601_v6, %v3600_v23 }
 0x2da   :  { %v3603_v25 = vpop.f32.mrf.mxu1 }
 0x2db   :  { %v6439_v18 = vadd.f32 %v3602_v13, %v6315_v10  ;;  %v3016_v10 = vld [vmem:[%s6923_s1 + $0x68] sm:$0xff] }
 0x2dc   :  { %v3604_v45 = vpop.f32.mrf.mxu1  ;;  %v3025_v47 = vpack.c.bf16 %v3016_v10, %v3015_v61 }
 0x2dd   :  { %v3605_v32 = vadd.f32 %v3604_v45, %v3603_v25  ;;  %v4020_v25 = vld [vmem:[%s6924_s4 + $0x30] sm:$0xff]   ;;  %v4021_v45 = vld [vmem:[%s6924_s4 + $0x28] sm:$0xff]  }
 0x2de   :  { %v3606_v39 = vpop.f32.mrf.mxu1  ;;  %3940 = vmatprep.mubr.msk.bf16.mxu0 %vm125_vm1, %v3025_v47  ;;  %3896 = vmatprep.subr.bf16.mxu1 %v4020_v25 }
 0x2df   :  { %v6444_v49 = vadd.f32 %v3605_v32, %v6319_v19  ;;  %v3017_v19 = vld [vmem:[%s6923_s1 + $0x70] sm:$0xff]  ;;  %v6481_v32 = vpop.f32.mrf.mxu0  ;;  %3897 = vmatpush3.bf16.msra.mxu1 %v4020_v25  ;;  %v4025_v25 = vld [vmem:[%s6924_s4 + $0x8] sm:$0xff]  }
 0x2e0   :  { %v3607_v30 = vpop.f32.mrf.mxu1  ;;  %v3026_v31 = vpack.c.bf16 %v3018_v3, %v3017_v19  ;;  %7373 = vst [vmem:[#allocation3_spill] sm:$0xff] %v6481_v32  ;;  %3898 = vmatprep.subr.bf16.mxu1 %v4021_v45  ;;  %v3651_v32 = vadd.f32 %v6301_v44, %v6297_v52 }
 0x2e1   :  { %v3608_v53 = vadd.f32 %v3607_v30, %v3606_v39 }
 0x2e2   :  { %v3609_v35 = vpop.f32.mrf.mxu1  ;;  %3941 = vmatmul.mubr.msk.bf16.gmra.mxu0 %vm125_vm1, %v3026_v31  ;;  %v2349_v58 = vadd.f32 %v3651_v32, %v6414_v34 }
 0x2e3   :  { %v6455_v59 = vadd.f32 %v3608_v53, %v6323_v33  ;;  %3899 = vmatpush3.bf16.msra.mxu1 %v4021_v45 }
 0x2e4   :  { %v3610_v37 = vpop.f32.mrf.mxu1 }
 0x2e5   :  { %v3611_v36 = vadd.f32 %v3610_v37, %v3609_v35  ;;  %v6489_v35 = vpop.f32.mrf.mxu0 }
 0x2e6   :  { %v3612_v9 = vpop.f32.mrf.mxu1  ;;  %7375 = vst [vmem:[#allocation7_spill] sm:$0xff] %v6489_v35 }
 0x2e7   :  { %v6468_v33 = vadd.f32 %v3611_v36, %v6327_v22  ;;  %v6497_v3 = vpop.f32.mrf.mxu0 }
 0x2e8   :  { %v3613_v2 = vpop.f32.mrf.mxu1  ;;  %7377 = vst [vmem:[#allocation6_spill] sm:$0xff] %v6497_v3 }
 0x2e9   :  { %v3614_v23 = vadd.f32 %v3613_v2, %v3612_v9  ;;  %v3880_v2 = vpop.f32.mrf.mxu0 }
 0x2ea   :  { %v3615_v6 = vpop.f32.mrf.mxu1 }
 0x2eb   :  { %v6473_v13 = vadd.f32 %v3614_v23, %v6331_v8  ;;  %v4022_v8 = vld [vmem:[%s6924_s4 + $0x20] sm:$0xff]   ;;  %v2534_v45 = vpop.f32.mrf.mxu0 }
 0x2ec   :  { %v3616_v22 = vpop.f32.mrf.mxu1  ;;  %3900 = vmatprep.subr.bf16.mxu1 %v4022_v8 }
 0x2ed   :  { %v3617_v39 = vadd.f32 %v3616_v22, %v3615_v6  ;;  %3901 = vmatpush3.bf16.msra.mxu1 %v4022_v8 }
 0x2ee   :  { %v3618_v30 = vpop.f32.mrf.mxu1 }
 0x2ef   :  { %v6484_v53 = vadd.f32 %v3617_v39, %v6340_v21  ;;  %v4023_v21 = vld [vmem:[%s6924_s4 + $0x18] sm:$0xff]  }
 0x2f0   :  { %v3619_v61 = vpop.f32.mrf.mxu1  ;;  %3902 = vmatprep.subr.bf16.mxu1 %v4023_v21 }
 0x2f1   :  { %7374 = vst [vmem:[#allocation4_spill] sm:$0xff] %v6484_v53  ;;  %v3620_v10 = vadd.f32 %v3619_v61, %v3618_v30  ;;  %3903 = vmatpush3.bf16.msra.mxu1 %v4023_v21  ;;  %v3881_v30 = vpop.f32.mrf.mxu0 }
 0x2f2   :  { %v3621_v47 = vpop.f32.mrf.mxu1 }
 0x2f3   :  { %v6492_v19 = vadd.f32 %v3620_v10, %v6356_v16  ;;  %v4024_v16 = vld [vmem:[%s6924_s4 + $0x10] sm:$0xff]   ;;  %v2537_v10 = vpop.f32.mrf.mxu0 }
 0x2f4   :  { %v3622_v37 = vpop.f32.mrf.mxu1  ;;  %3904 = vmatprep.subr.bf16.mxu1 %v4024_v16 }
 0x2f5   :  { %7376 = vst [vmem:[#allocation9_spill] sm:$0xff] %v6492_v19  ;;  %v3623_v31 = vadd.f32 %v3622_v37, %v3621_v47  ;;  %3905 = vmatpush3.bf16.msra.mxu1 %v4024_v16  ;;  %v6515_v37 = vpop.f32.mrf.mxu0  ;;  %v3648_v16 = vadd.f32 %v6293_v12, %v6289_v43  ;;  %v3657_v12 = vadd.f32 %v6317_v24, %v6313_v17 }
 0x2f6   :  { %v6499_v36 = vpop.f32.mrf.mxu1  ;;  %3906 = vmatprep.subr.bf16.mxu1 %v4025_v25  ;;  %v3663_v17 = vadd.f32 %v6338_v50, %v6329_v46 }
 0x2f7   :  { %7378 = vst [vmem:[#allocation43_spill] sm:$0xff] %v6499_v36  ;;  %v6502_v9 = vadd.f32 %v3623_v31, %v6362_v55  ;;  %v4026_v55 = vld [vmem:[%s6924_s4] sm:$0xff]   ;;  %v2550_v35 = vpop.f32.mrf.mxu0  ;;  %v2357_v34 = vadd.f32 %v3657_v12, %v6424_v51 }
 0x2f8   :  { %v6507_v23 = vpop.f32.mrf.mxu1  ;;  %v2365_v50 = vadd.f32 %v3663_v17, %v6434_v26 }
 0x2f9   :  { %7379 = vst [vmem:[#allocation59_spill] sm:$0xff] %v6502_v9  ;;  %7380 = vst [vmem:[#allocation44_spill] sm:$0xff] %v6507_v23  ;;  %3907 = vmatpush3.bf16.msra.mxu1 %v4025_v25  ;;  %v2344_v25 = vadd.f32 %v3648_v16, %v6409_v7  ;;  %v3885_v19 = vpop.f32.mrf.mxu0 }
 0x2fa   :  { %v3707_v6 = vpop.f32.mrf.mxu1  ;;  %3908 = vmatprep.subr.bf16.mxu1 %v4026_v55 }
 0x2fc   :  { %v3708_v22 = vpop.f32.mrf.mxu1 }
 0x2fd   :  { %3909 = vmatpush3.bf16.msra.mxu1 %v4026_v55  ;;  %v3709_v56 = vadd.f32 %v3708_v22, %v3707_v6  ;;  %v3654_v55 = vadd.f32 %v6309_v54, %v6305_v4  ;;  %v3660_v22 = vadd.f32 %v6325_v41, %v6321_v11  ;;  %v2553_v4 = vpop.f32.mrf.mxu0  ;;  %v3666_v41 = vadd.f32 %v6360_v14, %v6354_v40 }
 0x2fe   :  { %v3710_v39 = vpop.f32.mrf.mxu1 }
 0x2ff   :  { %v2352_v44 = vadd.f32 %v3654_v55, %v6419_v42  ;;  %v2360_v24 = vadd.f32 %v3660_v22, %v6429_v15 }
 0x300   :  { %v3711_v8 = vpop.f32.mrf.mxu1 }
 0x301   :  { %v3712_v20 = vadd.f32 %v3711_v8, %v3710_v39  ;;  %v2438_v39 = vadd.f32 %v3709_v56, %v6405_v27 }
 0x302   :  { %v3713_v61 = vpop.f32.mrf.mxu1 }
 0x303   :  { %v2441_v0 = vadd.f32 %v3712_v20, %v2344_v25  ;;  %v6537_v27 = vadd.f32 %v2534_v45, %v2438_v39  ;;  %v3669_v45 = vadd.f32 %v6385_v62, %v6376_v28 }
 0x304   :  { %v3714_v47 = vpop.f32.mrf.mxu1 }
 0x305   :  { %v3715_v23 = vadd.f32 %v3714_v47, %v3713_v61  ;;  %v6531_v54 = vadd.f32 %v2537_v10, %v2441_v0  ;;  %v6543_v0 = vpop.f32.mrf.mxu0 }
 0x306   :  { %v3716_v21 = vpop.f32.mrf.mxu1 }
 0x307   :  { %v2446_v52 = vadd.f32 %v3715_v23, %v2349_v58  ;;  %v2621_v51 = vmul.f32 %v6531_v54, %v6531_v54  ;;  %v2597_v26 = vadd.f32 %v6531_v54, %v6537_v27 }
 0x308   :  { %v3717_v31 = vpop.f32.mrf.mxu1 }
 0x309   :  { %v3718_v53 = vadd.f32 %v3717_v31, %v3716_v21  ;;  %v6539_v42 = vadd.f32 %v3880_v2, %v2446_v52  ;;  %v2373_v31 = vadd.f32 %v3669_v45, %v6444_v49  ;;  %v3681_v45 = vadd.f32 %v6441_v57, %v6436_v1  ;;  %v7383_v1 = vld [vmem:[#allocation41_spill] sm:$0xff] }
 0x30a   :  { %v3719_v3 = vpop.f32.mrf.mxu1 }
 0x30b   :  { %v2449_v20 = vadd.f32 %v3718_v53, %v2352_v44  ;;  %v2622_v40 = vmul.f32 %v6539_v42, %v6539_v42 }
 0x30c   :  { %v3720_v9 = vpop.f32.mrf.mxu1 }
 0x30d   :  { %v3721_v7 = vadd.f32 %v3720_v9, %v3719_v3  ;;  %v6547_v53 = vadd.f32 %v3881_v30, %v2449_v20  ;;  %v2368_v3 = vadd.f32 %v3666_v41, %v6439_v18  ;;  %v2620_v9 = vmul.f32 %v6537_v27, %v6537_v27  ;;  %v2566_v30 = vpop.f32.mrf.mxu0 }
 0x30e   :  { %v3722_v36 = vpop.f32.mrf.mxu1 }
 0x30f   :  { %v2454_v58 = vadd.f32 %v3721_v7, %v2357_v34  ;;  %v2636_v61 = vadd.f32 %v2621_v51, %v2620_v9  ;;  %v2623_v18 = vmul.f32 %v6547_v53, %v6547_v53  ;;  %v3889_v52 = vpop.f32.mrf.mxu0  ;;  %v3675_v34 = vadd.f32 %v6421_v5, %v6416_v60 }
 0x310   :  { %v3723_v43 = vpop.f32.mrf.mxu1  ;;  %v3678_v60 = vadd.f32 %v6431_v29, %v6426_v38 }
 0x311   :  { %v3724_v32 = vadd.f32 %v3723_v43, %v3722_v36  ;;  %v6555_v14 = vadd.f32 %v2550_v35, %v2454_v58  ;;  %v2598_v35 = vadd.f32 %v2597_v26, %v6539_v42  ;;  %v2637_v25 = vadd.f32 %v2636_v61, %v2622_v40  ;;  %v2569_v17 = vpop.f32.mrf.mxu0 }
 0x312   :  { %v3725_v6 = vpop.f32.mrf.mxu1  ;;  %v3672_v43 = vadd.f32 %v6411_v48, %v6402_v63  ;;  %v2381_v41 = vadd.f32 %v3675_v34, %v6468_v33  ;;  %v2384_v40 = vadd.f32 %v3678_v60, %v6473_v13  ;;  %v7389_v60 = vld [vmem:[#allocation59_spill] sm:$0xff] }
 0x313   :  { %v2457_v46 = vadd.f32 %v3724_v32, %v2360_v24  ;;  %v2624_v28 = vmul.f32 %v6555_v14, %v6555_v14  ;;  %v2599_v12 = vadd.f32 %v2598_v35, %v6547_v53  ;;  %v2638_v44 = vadd.f32 %v2637_v25, %v2623_v18 }
 0x314   :  { %v3726_v8 = vpop.f32.mrf.mxu1 }
 0x315   :  { %v3727_v56 = vadd.f32 %v3726_v8, %v3725_v6  ;;  %v6563_v10 = vadd.f32 %v2553_v4, %v2457_v46  ;;  %v2600_v22 = vadd.f32 %v2599_v12, %v6555_v14  ;;  %v2639_v20 = vadd.f32 %v2638_v44, %v2624_v28 }
 0x316   :  { %v3728_v11 = vpop.f32.mrf.mxu1 }
 0x317   :  { %v2462_v2 = vadd.f32 %v3727_v56, %v2365_v50  ;;  %v2625_v49 = vmul.f32 %v6563_v10, %v6563_v10  ;;  %v2601_v32 = vadd.f32 %v2600_v22, %v6563_v10  ;;  %v7384_v22 = vld [vmem:[#allocation9_spill] sm:$0xff] }
 0x318   :  { %v3729_v15 = vpop.f32.mrf.mxu1 }
 0x319   :  { %v3730_v36 = vadd.f32 %v3729_v15, %v3728_v11  ;;  %v6570_v62 = vadd.f32 %v6515_v37, %v2462_v2  ;;  %v2376_v37 = vadd.f32 %v3672_v43, %v6455_v59  ;;  %v2640_v24 = vadd.f32 %v2639_v20, %v2625_v49  ;;  %v7385_v20 = vld [vmem:[#allocation43_spill] sm:$0xff] }
 0x31a   :  { %v3731_v23 = vpop.f32.mrf.mxu1 }
 0x31b   :  { %v2465_v47 = vadd.f32 %v3730_v36, %v2368_v3  ;;  %v2626_v63 = vmul.f32 %v6570_v62, %v6570_v62  ;;  %v2602_v56 = vadd.f32 %v2601_v32, %v6570_v62  ;;  %v3892_v36 = vpop.f32.mrf.mxu0 }
 0x31c   :  { %v3732_v21 = vpop.f32.mrf.mxu1 }
 0x31d   :  { %v3733_v16 = vadd.f32 %v3732_v21, %v3731_v23  ;;  %v6577_v7 = vadd.f32 %v3885_v19, %v2465_v47  ;;  %v2641_v5 = vadd.f32 %v2640_v24, %v2626_v63  ;;  %v2582_v47 = vpop.f32.mrf.mxu0  ;;  %v7381_v21 = vld [vmem:[#allocation4_spill] sm:$0xff] }
 0x31e   :  { %v3734_v55 = vpop.f32.mrf.mxu1  ;;  %v2389_v35 = vadd.f32 %v3681_v45, %v7381_v21  ;;  %v7386_v63 = vld [vmem:[#allocation44_spill] sm:$0xff] }
 0x31f   :  { %v2470_v39 = vadd.f32 %v3733_v16, %v2373_v31  ;;  %v2627_v58 = vmul.f32 %v6577_v7, %v6577_v7  ;;  %v2603_v50 = vadd.f32 %v2602_v56, %v6577_v7 }
 0x320   :  { %v3735_v6 = vpop.f32.mrf.mxu1 }
 0x321   :  { %v3736_v4 = vadd.f32 %v3735_v6, %v3734_v55  ;;  %v6586_v8 = vadd.f32 %v2566_v30, %v2470_v39  ;;  %v2642_v9 = vadd.f32 %v2641_v5, %v2627_v58  ;;  %v7382_v55 = vld [vmem:[#allocation39_spill] sm:$0xff]  ;;  %v3893_v6 = vpop.f32.mrf.mxu0 }
 0x322   :  { %v3737_v48 = vpop.f32.mrf.mxu1  ;;  %v3684_v57 = vadd.f32 %v7383_v1, %v7382_v55 }
 0x323   :  { %v2473_v19 = vadd.f32 %v3736_v4, %v2376_v37  ;;  %v2628_v15 = vmul.f32 %v6586_v8, %v6586_v8  ;;  %v2604_v23 = vadd.f32 %v2603_v50, %v6586_v8  ;;  %v7390_v50 = vld [vmem:[#allocation40_spill] sm:$0xff] }
 0x324   :  { %v3738_v59 = vpop.f32.mrf.mxu1  ;;  %v2392_v37 = vadd.f32 %v3684_v57, %v7384_v22 }
 0x325   :  { %v6591_v11 = vadd.f32 %v2569_v17, %v2473_v19  ;;  %v3739_v51 = vadd.f32 %v3738_v59, %v3737_v48  ;;  %v2643_v30 = vadd.f32 %v2642_v9, %v2628_v15  ;;  %v7387_v19 = vld [vmem:[#allocation5_spill] sm:$0xff]  ;;  %v7388_v17 = vld [vmem:[#allocation3_spill] sm:$0xff] }
 0x326   :  { %v3740_v46 = vpop.f32.mrf.mxu1  ;;  %v3687_v24 = vadd.f32 %v7388_v17, %v7387_v19 }
 0x327   :  { %v2478_v3 = vadd.f32 %v3739_v51, %v2381_v41  ;;  %v2629_v33 = vmul.f32 %v6591_v11, %v6591_v11  ;;  %v2605_v61 = vadd.f32 %v2604_v23, %v6591_v11  ;;  %v2585_v51 = vpop.f32.mrf.mxu0  ;;  %v7391_v23 = vld [vmem:[#allocation7_spill] sm:$0xff] }
 0x328   :  { %v3741_v2 = vpop.f32.mrf.mxu1  ;;  %v2397_v5 = vadd.f32 %v3687_v24, %v7389_v60  ;;  %v7393_v24 = vld [vmem:[#allocation37_spill] sm:$0xff] }
 0x329   :  { %v6604_v38 = vadd.f32 %v6543_v0, %v2478_v3  ;;  %v3742_v29 = vadd.f32 %v3741_v2, %v3740_v46  ;;  %v2644_v16 = vadd.f32 %v2643_v30, %v2629_v33  ;;  %v7392_v33 = vld [vmem:[#allocation6_spill] sm:$0xff] }
 0x32a   :  { %v3743_v26 = vpop.f32.mrf.mxu1 }
 0x32b   :  { %v2630_v13 = vmul.f32 %v6604_v38, %v6604_v38  ;;  %v2481_v18 = vadd.f32 %v3742_v29, %v2384_v40  ;;  %v2606_v0 = vadd.f32 %v2605_v61, %v6604_v38  ;;  %v3690_v29 = vadd.f32 %v7392_v33, %v7391_v23 }
 0x32c   :  { %v3744_v31 = vpop.f32.mrf.mxu1 }
 0x32d   :  { %v6613_v25 = vadd.f32 %v3889_v52, %v2481_v18  ;;  %v3745_v28 = vadd.f32 %v3744_v31, %v3743_v26  ;;  %v2645_v12 = vadd.f32 %v2644_v16, %v2630_v13  ;;  %v3626_v52 = vadd.f32 %v7386_v63, %v7385_v20 }
 0x32e   :  { %v3746_v43 = vpop.f32.mrf.mxu1 }
 0x32f   :  { %v2607_v39 = vadd.f32 %v2606_v0, %v6613_v25  ;;  %v2631_v44 = vmul.f32 %v6613_v25, %v6613_v25  ;;  %v2486_v49 = vadd.f32 %v3745_v28, %v2389_v35  ;;  %v2303_v15 = vadd.f32 %v3626_v52, %v7390_v50 }
 0x330   :  { %v3747_v4 = vpop.f32.mrf.mxu1 }
 0x331   :  { %v2646_v48 = vadd.f32 %v2645_v12, %v2631_v44  ;;  %v6623_v34 = vadd.f32 %v2582_v47, %v2486_v49  ;;  %v3748_v32 = vadd.f32 %v3747_v4, %v3746_v43  ;;  %v2400_v47 = vadd.f32 %v3690_v29, %v2303_v15 }
 0x332   :  { %v3749_v58 = vpop.f32.mrf.mxu1 }
 0x333   :  { %v2608_v59 = vadd.f32 %v2607_v39, %v6623_v34  ;;  %v2632_v56 = vmul.f32 %v6623_v34, %v6623_v34  ;;  %v2489_v41 = vadd.f32 %v3748_v32, %v2392_v37 }
 0x334   :  { %v3750_v46 = vpop.f32.mrf.mxu1 }
 0x335   :  { %v2647_v3 = vadd.f32 %v2646_v48, %v2632_v56  ;;  %v2586_v9 = vadd.f32 %v2585_v51, %v2489_v41  ;;  %v3751_v40 = vadd.f32 %v3750_v46, %v3749_v58  ;;  %v2670_v58 = vsub.s32 2, %v7393_v24  ;;  %v6638_v56 = vld [vmem:[%s6921_s6] sm:$0xff] }
 0x336   :  { %v3752_v2 = vpop.f32.mrf.mxu1  ;;  %v2690_v46 = vsub.s32 3, %v7393_v24 }
 0x337   :  { %v2609_v45 = vadd.f32 %v2608_v59, %v2586_v9  ;;  %v2633_v26 = vmul.f32 %v2586_v9, %v2586_v9  ;;  %v2494_v30 = vadd.f32 %v3751_v40, %v2397_v5 }
 0x338   :  { %v3753_v61 = vpop.f32.mrf.mxu1 }
 0x339   :  { %v2648_v13 = vadd.f32 %v2647_v3, %v2633_v26  ;;  %v2591_v18 = vadd.f32 %v3892_v36, %v2494_v30  ;;  %v3754_v21 = vadd.f32 %v3753_v61, %v3752_v2 }
 0x33b   :  { %v2610_v35 = vadd.f32 %v2609_v45, %v2591_v18  ;;  %v2634_v31 = vmul.f32 %v2591_v18, %v2591_v18  ;;  %v2497_v16 = vadd.f32 %v3754_v21, %v2400_v47 }
 0x33d   :  { %v2649_v0 = vadd.f32 %v2648_v13, %v2634_v31  ;;  %v2594_v28 = vadd.f32 %v3893_v6, %v2497_v16 }
 0x33f   :  { %v2611_v55 = vadd.f32 %v2610_v35, %v2594_v28  ;;  %v2635_v1 = vmul.f32 %v2594_v28, %v2594_v28 }
 0x341   :  { %v2612_v57 = vrot.slane %v2611_v55, 4  ;;  %v2650_v43 = vadd.f32 %v2649_v0, %v2635_v1 }
 0x343   :  { %v2613_v12 = vadd.f32 %v2612_v57, %v2611_v55  ;;  %v2651_v39 = vrot.slane %v2650_v43, 4 }
 0x345   :  { %v2614_v44 = vrot.slane %v2613_v12, 2  ;;  %v2652_v49 = vadd.f32 %v2651_v39, %v2650_v43 }
 0x347   :  { %v2615_v22 = vadd.f32 %v2614_v44, %v2613_v12  ;;  %v2653_v37 = vrot.slane %v2652_v49, 2 }
 0x349   :  { %v2616_v4 = vrot.slane %v2615_v22, 1  ;;  %v2654_v20 = vadd.f32 %v2653_v37, %v2652_v49 }
 0x34b   :  { %v2617_v36 = vadd.f32 %v2616_v4, %v2615_v22  ;;  %v2655_v63 = vrot.slane %v2654_v20, 1 }
 0x34d   :  { %v2619_v52 = vmul.f32 0.0078125, %v2617_v36  ;;  %v2656_v48 = vadd.f32 %v2655_v63, %v2654_v20 }
 0x34f   :  { %v2657_v32 = vmul.f32 0.0078125, %v2656_v48  ;;  %v2658_v19 = vmul.f32 %v2619_v52, %v2619_v52 }
 0x351   :  { %v2659_v17 = vsub.f32 %v2657_v32, %v2658_v19 }
 0x353   :  { %v2660_v6 = vadd.f32 1e-05, %v2659_v17 }
 0x355   :  { %4029 = vrsqrt.f32 %v2660_v6 }
 0x362   :  { %v4030_v59 = vpop.eup %4029 }
 0x363   :  { %v2662_v41 = vmul.f32 %v6638_v56, %v4030_v59 }
 0x365   :  { %v2663_v51 = vmul.f32 %v2662_v41, %v2619_v52  ;;  %v2671_v60 = vrot.slane %v2662_v41, %v2670_v58 }
 0x367   :  { %v2665_v5 = vrot.slane %v2663_v51, 7  ;;  %v2672_v50 = vmul.f32 %v2671_v60, %v6537_v27  ;;  %v2673_v15 = vmul.f32 %v2671_v60, %v6531_v54  ;;  %v2674_v40 = vmul.f32 %v2671_v60, %v6539_v42  ;;  %v6656_v51 = vpop.f32.mrf.mxu0 }
 0x368   :  { %v2675_v2 = vmul.f32 %v2671_v60, %v6547_v53  ;;  %v2676_v23 = vmul.f32 %v2671_v60, %v6555_v14  ;;  %v2682_v33 = vmul.f32 %v2671_v60, %v6604_v38  ;;  %v2683_v29 = vmul.f32 %v2671_v60, %v6613_v25 }
 0x369   :  { %v2667_v3 = vsub.f32 %v6638_v56, %v2665_v5  ;;  %v2684_v45 = vmul.f32 %v2671_v60, %v6623_v34  ;;  %v2685_v26 = vmul.f32 %v2671_v60, %v2586_v9  ;;  %v2677_v27 = vmul.f32 %v2671_v60, %v6563_v10 }
 0x36a   :  { %v2686_v61 = vmul.f32 %v2671_v60, %v2591_v18  ;;  %v2687_v54 = vmul.f32 %v2671_v60, %v2594_v28  ;;  %v2678_v13 = vmul.f32 %v2671_v60, %v6570_v62  ;;  %v2679_v42 = vmul.f32 %v2671_v60, %v6577_v7 }
 0x36b   :  { %v2691_v30 = vrot.slane %v2667_v3, %v2690_v46  ;;  %v2680_v53 = vmul.f32 %v2671_v60, %v6586_v8  ;;  %v2681_v14 = vmul.f32 %v2671_v60, %v6591_v11  ;;  %v6658_v60 = vpop.f32.mrf.mxu0 }
 0x36d   :  { %v2692_v47 = vadd.f32 %v2691_v30, %v2672_v50  ;;  %v2693_v38 = vadd.f32 %v2691_v30, %v2673_v15  ;;  %v2694_v21 = vadd.f32 %v2691_v30, %v2674_v40  ;;  %v2695_v25 = vadd.f32 %v2691_v30, %v2675_v2  ;;  %v6660_v5 = vpop.f32.mrf.mxu0 }
 0x36e   :  { %v2696_v35 = vadd.f32 %v2691_v30, %v2676_v23  ;;  %v2697_v34 = vadd.f32 %v2691_v30, %v2677_v27  ;;  %v2698_v9 = vadd.f32 %v2691_v30, %v2678_v13  ;;  %v2699_v31 = vadd.f32 %v2691_v30, %v2679_v42 }
 0x36f   :  { %v2708_v16 = vmax.f32 %v2692_v47, 0.0  ;;  %v2709_v10 = vmax.f32 %v2693_v38, 0.0  ;;  %v2710_v18 = vmax.f32 %v2694_v21, 0.0  ;;  %v2711_v0 = vmax.f32 %v2695_v25, 0.0  ;;  %v6662_v46 = vpop.f32.mrf.mxu0 }
 0x370   :  { %v2712_v28 = vmax.f32 %v2696_v35, 0.0  ;;  %v2713_v62 = vmax.f32 %v2697_v34, 0.0  ;;  %v2714_v55 = vmax.f32 %v2698_v9, 0.0  ;;  %v2715_v7 = vmax.f32 %v2699_v31, 0.0 }
 0x371   :  { %v2724_v1 = vpack.c.bf16 %v2709_v10, %v2708_v16  ;;  %v2725_v8 = vpack.c.bf16 %v2711_v0, %v2710_v18  ;;  %v2700_v57 = vadd.f32 %v2691_v30, %v2680_v53  ;;  %v2701_v11 = vadd.f32 %v2691_v30, %v2681_v14  ;;  %v6670_v40 = vpop.f32.mrf.mxu0 }
 0x372   :  { %v2726_v43 = vpack.c.bf16 %v2713_v62, %v2712_v28  ;;  %v2727_v12 = vpack.c.bf16 %v2715_v7, %v2714_v55  ;;  %v2702_v39 = vadd.f32 %v2691_v30, %v2682_v33  ;;  %v2703_v44 = vadd.f32 %v2691_v30, %v2683_v29 }
 0x373   :  { %3910 = vmatprep.mubr.bf16.mxu1 %v2724_v1  ;;  %v2716_v49 = vmax.f32 %v2700_v57, 0.0  ;;  %v2717_v22 = vmax.f32 %v2701_v11, 0.0  ;;  %v2704_v37 = vadd.f32 %v2691_v30, %v2684_v45  ;;  %v2705_v4 = vadd.f32 %v2691_v30, %v2685_v26  ;;  %v6675_v29 = vpop.f32.mrf.mxu0 }
 0x374   :  { %3911 = vmatmul.mubr.bf16.vlgmr.msra.gmra.mxu1 %v2725_v8  ;;  %v2718_v20 = vmax.f32 %v2702_v39, 0.0  ;;  %v2719_v36 = vmax.f32 %v2703_v44, 0.0  ;;  %v2706_v63 = vadd.f32 %v2691_v30, %v2686_v61  ;;  %v2707_v52 = vadd.f32 %v2691_v30, %v2687_v54 }
 0x375   :  { %3914 = vmatprep.mubr.bf16.mxu1 %v2726_v43  ;;  %v2728_v48 = vpack.c.bf16 %v2717_v22, %v2716_v49  ;;  %v2720_v32 = vmax.f32 %v2704_v37, 0.0  ;;  %v2721_v19 = vmax.f32 %v2705_v4, 0.0  ;;  %v3174_v50 = vmul.f32 %v6658_v60, %v6658_v60  ;;  %v6680_v27 = vpop.f32.mrf.mxu0 }
 0x376   :  { %v2729_v17 = vpack.c.bf16 %v2719_v36, %v2718_v20  ;;  %v2722_v6 = vmax.f32 %v2706_v63, 0.0  ;;  %v2723_v58 = vmax.f32 %v2707_v52, 0.0  ;;  %v3152_v15 = vadd.f32 %v6662_v46, %v6658_v60 }
 0x377   :  { %v2730_v59 = vpack.c.bf16 %v2721_v19, %v2720_v32  ;;  %v3175_v3 = vmul.f32 %v6662_v46, %v6662_v46  ;;  %v3176_v2 = vmul.f32 %v6656_v51, %v6656_v51  ;;  %v3177_v45 = vmul.f32 %v6660_v5, %v6660_v5  ;;  %v6685_v42 = vpop.f32.mrf.mxu0 }
 0x378   :  { %v2731_v41 = vpack.c.bf16 %v2723_v58, %v2722_v6  ;;  %v3153_v23 = vadd.f32 %v6656_v51, %v3152_v15  ;;  %v3178_v54 = vmul.f32 %v6675_v29, %v6675_v29  ;;  %v3179_v47 = vmul.f32 %v6685_v42, %v6685_v42 }
 0x379   :  { %v3190_v33 = vadd.f32 %v3175_v3, %v3174_v50  ;;  %v6690_v38 = vpop.f32.mrf.mxu0  ;;  %v3180_v21 = vmul.f32 %v6670_v40, %v6670_v40  ;;  %v3181_v9 = vmul.f32 %v6680_v27, %v6680_v27 }
 0x37a   :  { %v3154_v30 = vadd.f32 %v6660_v5, %v3153_v23  ;;  %v3184_v57 = vmul.f32 %v6690_v38, %v6690_v38 }
 0x37b   :  { %v3191_v26 = vadd.f32 %v3190_v33, %v3176_v2  ;;  %v6695_v34 = vpop.f32.mrf.mxu0 }
 0x37c   :  { %3915 = vmatmul.mubr.bf16.gmra.mxu1 %v2727_v12  ;;  %v3155_v61 = vadd.f32 %v3154_v30, %v6675_v29  ;;  %v3182_v0 = vmul.f32 %v6695_v34, %v6695_v34 }
 0x37d   :  { %3918 = vmatprep.mubr.bf16.mxu1 %v2728_v48  ;;  %v3192_v13 = vadd.f32 %v3191_v26, %v3177_v45  ;;  %v6700_v10 = vpop.f32.mrf.mxu0 }
 0x37e   :  { %v3156_v14 = vadd.f32 %v3155_v61, %v6685_v42  ;;  %v3185_v39 = vmul.f32 %v6700_v10, %v6700_v10 }
 0x37f   :  { %v3193_v53 = vadd.f32 %v3192_v13, %v3178_v54  ;;  %v6705_v62 = vpop.f32.mrf.mxu0 }
 0x380   :  { %v3157_v25 = vadd.f32 %v6670_v40, %v3156_v14  ;;  %v3183_v1 = vmul.f32 %v6705_v62, %v6705_v62 }
 0x381   :  { %v3194_v35 = vadd.f32 %v3193_v53, %v3179_v47 }
 0x382   :  { %v3158_v16 = vadd.f32 %v6680_v27, %v3157_v25 }
 0x383   :  { %v3195_v31 = vadd.f32 %v3194_v35, %v3180_v21 }
 0x384   :  { %3919 = vmatmul.mubr.bf16.gmra.mxu1 %v2729_v17  ;;  %v3159_v18 = vadd.f32 %v3158_v16, %v6695_v34 }
 0x385   :  { %3922 = vmatprep.mubr.bf16.mxu1 %v2730_v59  ;;  %v3196_v28 = vadd.f32 %v3195_v31, %v3181_v9 }
 0x386   :  { %v3160_v7 = vadd.f32 %v3159_v18, %v6705_v62 }
 0x387   :  { %v3197_v55 = vadd.f32 %v3196_v28, %v3182_v0 }
 0x388   :  { %v3161_v11 = vadd.f32 %v6690_v38, %v3160_v7 }
 0x389   :  { %v3198_v43 = vadd.f32 %v3197_v55, %v3183_v1 }
 0x38a   :  { %v3162_v49 = vadd.f32 %v6700_v10, %v3161_v11 }
 0x38b   :  { %v3199_v44 = vadd.f32 %v3198_v43, %v3184_v57 }
 0x38c   :  { %3923 = vmatmul.mubr.bf16.gmra.mxu1 %v2731_v41 }
 0x38d   :  { %v3200_v20 = vadd.f32 %v3199_v44, %v3185_v39 }
 0x3a2   :  { %v6710_v8 = vpop.f32.mrf.mxu0 }
 0x3a3   :  { %v3188_v32 = vmul.f32 %v6710_v8, %v6710_v8 }
 0x3a4   :  { %v6715_v12 = vpop.f32.mrf.mxu0 }
 0x3a5   :  { %v3163_v37 = vadd.f32 %v3162_v49, %v6715_v12  ;;  %v3186_v4 = vmul.f32 %v6715_v12, %v6715_v12 }
 0x3a6   :  { %v6720_v22 = vpop.f32.mrf.mxu0 }
 0x3a7   :  { %v3201_v63 = vadd.f32 %v3200_v20, %v3186_v4  ;;  %v3189_v6 = vmul.f32 %v6720_v22, %v6720_v22 }
 0x3a8   :  { %v6725_v36 = vpop.f32.mrf.mxu0 }
 0x3a9   :  { %v3164_v52 = vadd.f32 %v3163_v37, %v6725_v36  ;;  %v3187_v48 = vmul.f32 %v6725_v36, %v6725_v36 }
 0x3ab   :  { %v3165_v19 = vadd.f32 %v6710_v8, %v3164_v52  ;;  %v3202_v17 = vadd.f32 %v3201_v63, %v3187_v48 }
 0x3ad   :  { %v3166_v58 = vadd.f32 %v6720_v22, %v3165_v19  ;;  %v3203_v59 = vadd.f32 %v3202_v17, %v3188_v32 }
 0x3af   :  { %v3167_v41 = vrot.slane %v3166_v58, 4  ;;  %v3204_v50 = vadd.f32 %v3203_v59, %v3189_v6 }
 0x3b1   :  { %v3168_v15 = vadd.f32 %v3167_v41, %v3166_v58  ;;  %v3205_v3 = vrot.slane %v3204_v50, 4 }
 0x3b3   :  { %v3169_v2 = vrot.slane %v3168_v15, 2  ;;  %v3206_v23 = vadd.f32 %v3205_v3, %v3204_v50 }
 0x3b5   :  { %v3170_v26 = vadd.f32 %v3169_v2, %v3168_v15  ;;  %v3207_v30 = vrot.slane %v3206_v23, 2 }
 0x3b7   :  { %v3171_v47 = vrot.slane %v3170_v26, 1  ;;  %v3208_v21 = vadd.f32 %v3207_v30, %v3206_v23 }
 0x3b9   :  { %v3172_v55 = vadd.f32 %v3171_v47, %v3170_v26  ;;  %v3209_v7 = vrot.slane %v3208_v21, 1 }
 0x3bb   :  { %v6770_v4 = vmul.f32 0.0078125, %v3172_v55  ;;  %v3210_v20 = vadd.f32 %v3209_v7, %v3208_v21 }
 0x3bd   :  { %v3211_v59 = vmul.f32 0.0078125, %v3210_v20  ;;  %v3212_v41 = vmul.f32 %v6770_v4, %v6770_v4 }
 0x434   :  { %v6736_v33 = vpop.f32.mrf.mxu1 }
 0x435   :  { %v2917_v35 = vmul.f32 %v6736_v33, %v6736_v33 }
 0x436   :  { %v6738_v45 = vpop.f32.mrf.mxu1 }
 0x437   :  { %v2915_v13 = vmul.f32 %v6738_v45, %v6738_v45 }
 0x438   :  { %v6740_v61 = vpop.f32.mrf.mxu1 }
 0x439   :  { %v2918_v18 = vmul.f32 %v6740_v61, %v6740_v61 }
 0x43a   :  { %v6742_v54 = vpop.f32.mrf.mxu1 }
 0x43b   :  { %v2893_v53 = vadd.f32 %v6742_v54, %v6738_v45  ;;  %v2916_v14 = vmul.f32 %v6742_v54, %v6742_v54 }
 0x43c   :  { %v6750_v25 = vpop.f32.mrf.mxu1 }
 0x43d   :  { %v2894_v9 = vadd.f32 %v6736_v33, %v2893_v53  ;;  %v2931_v31 = vadd.f32 %v2916_v14, %v2915_v13  ;;  %v2921_v52 = vmul.f32 %v6750_v25, %v6750_v25  ;;  %v3213_v53 = vsub.f32 %v3211_v59, %v3212_v41 }
 0x43e   :  { %v6755_v16 = vpop.f32.mrf.mxu1 }
 0x43f   :  { %v2932_v0 = vadd.f32 %v2931_v31, %v2917_v35  ;;  %v2895_v28 = vadd.f32 %v6740_v61, %v2894_v9  ;;  %v2919_v11 = vmul.f32 %v6755_v16, %v6755_v16 }
 0x440   :  { %v6760_v1 = vpop.f32.mrf.mxu1 }
 0x441   :  { %v2896_v57 = vadd.f32 %v2895_v28, %v6755_v16  ;;  %v2933_v43 = vadd.f32 %v2932_v0, %v2918_v18  ;;  %v2922_v17 = vmul.f32 %v6760_v1, %v6760_v1  ;;  %v3214_v28 = vadd.f32 1e-05, %v3213_v53 }
 0x442   :  { %v6765_v39 = vpop.f32.mrf.mxu1 }
 0x443   :  { %v2934_v44 = vadd.f32 %v2933_v43, %v2919_v11  ;;  %v2897_v49 = vadd.f32 %v2896_v57, %v6765_v39  ;;  %v2920_v37 = vmul.f32 %v6765_v39, %v6765_v39  ;;  %4031 = vrsqrt.f32 %v3214_v28 }
 0x444   :  { %v6772_v63 = vpop.f32.mrf.mxu1 }
 0x445   :  { %v2898_v48 = vadd.f32 %v6750_v25, %v2897_v49  ;;  %v2935_v32 = vadd.f32 %v2934_v44, %v2920_v37  ;;  %v2925_v47 = vmul.f32 %v6772_v63, %v6772_v63 }
 0x446   :  { %v6777_v19 = vpop.f32.mrf.mxu1 }
 0x447   :  { %v2936_v6 = vadd.f32 %v2935_v32, %v2921_v52  ;;  %v2899_v58 = vadd.f32 %v6760_v1, %v2898_v48  ;;  %v2923_v3 = vmul.f32 %v6777_v19, %v6777_v19 }
 0x448   :  { %v6784_v50 = vpop.f32.mrf.mxu1 }
 0x449   :  { %v2900_v15 = vadd.f32 %v2899_v58, %v6777_v19  ;;  %v2937_v2 = vadd.f32 %v2936_v6, %v2922_v17  ;;  %v2926_v31 = vmul.f32 %v6784_v50, %v6784_v50 }
 0x44a   :  { %v6789_v23 = vpop.f32.mrf.mxu1 }
 0x44b   :  { %v2938_v26 = vadd.f32 %v2937_v2, %v2923_v3  ;;  %v2901_v30 = vadd.f32 %v2900_v15, %v6789_v23  ;;  %v2924_v13 = vmul.f32 %v6789_v23, %v6789_v23 }
 0x44c   :  { %v6794_v14 = vpop.f32.mrf.mxu1 }
 0x44d   :  { %v2902_v21 = vadd.f32 %v6772_v63, %v2901_v30  ;;  %v2939_v35 = vadd.f32 %v2938_v26, %v2924_v13  ;;  %v2929_v20 = vmul.f32 %v6794_v14, %v6794_v14 }
 0x44e   :  { %v6799_v9 = vpop.f32.mrf.mxu1 }
 0x44f   :  { %v2940_v18 = vadd.f32 %v2939_v35, %v2925_v47  ;;  %v2903_v0 = vadd.f32 %v6784_v50, %v2902_v21  ;;  %v2927_v57 = vmul.f32 %v6799_v9, %v6799_v9 }
 0x450   :  { %v6804_v55 = vpop.f32.mrf.mxu1  ;;  %v4032_v13 = vpop.eup %4031 }
 0x451   :  { %v2904_v7 = vadd.f32 %v2903_v0, %v6799_v9  ;;  %v2941_v11 = vadd.f32 %v2940_v18, %v2926_v31  ;;  %v2930_v32 = vmul.f32 %v6804_v55, %v6804_v55  ;;  %v3216_v31 = vmul.f32 %v6638_v56, %v4032_v13 }
 0x452   :  { %v6809_v43 = vpop.f32.mrf.mxu1 }
 0x453   :  { %v2942_v44 = vadd.f32 %v2941_v11, %v2927_v57  ;;  %v2905_v49 = vadd.f32 %v2904_v7, %v6809_v43  ;;  %v2928_v37 = vmul.f32 %v6809_v43, %v6809_v43  ;;  %v3217_v57 = vmul.f32 %v3216_v31, %v6770_v4 }
 0x455   :  { %v2906_v52 = vadd.f32 %v6794_v14, %v2905_v49  ;;  %v2943_v48 = vadd.f32 %v2942_v44, %v2928_v37  ;;  %v3219_v49 = vrot.slane %v3217_v57, 7  ;;  %v3224_v37 = vsub.s32 6, %v7393_v24 }
 0x457   :  { %v2907_v17 = vadd.f32 %v6804_v55, %v2906_v52  ;;  %v2944_v6 = vadd.f32 %v2943_v48, %v2929_v20  ;;  %v3221_v20 = vsub.f32 %v6638_v56, %v3219_v49  ;;  %v3225_v52 = vrot.slane %v3216_v31, %v3224_v37 }
 0x458   :  { %v3244_v48 = vsub.s32 7, %v7393_v24 }
 0x459   :  { %v2908_v58 = vrot.slane %v2907_v17, 4  ;;  %v2945_v59 = vadd.f32 %v2944_v6, %v2930_v32  ;;  %v3239_v32 = vmul.f32 %v3225_v52, %v6725_v36  ;;  %v3226_v6 = vmul.f32 %v3225_v52, %v6658_v60 }
 0x45a   :  { %v3228_v4 = vmul.f32 %v6656_v51, %v3225_v52  ;;  %v3232_v36 = vmul.f32 %v6670_v40, %v3225_v52  ;;  %v3234_v51 = vmul.f32 %v3225_v52, %v6695_v34  ;;  %v3235_v13 = vmul.f32 %v3225_v52, %v6705_v62 }
 0x45b   :  { %v2909_v41 = vadd.f32 %v2908_v58, %v2907_v17  ;;  %v2946_v15 = vrot.slane %v2945_v59, 4  ;;  %v3245_v17 = vrot.slane %v3221_v20, %v3244_v48  ;;  %v3227_v58 = vmul.f32 %v3225_v52, %v6662_v46 }
 0x45c   :  { %v3233_v46 = vmul.f32 %v6680_v27, %v3225_v52  ;;  %v3240_v40 = vmul.f32 %v6710_v8, %v3225_v52 }
 0x45d   :  { %v2910_v3 = vrot.slane %v2909_v41, 2  ;;  %v2947_v2 = vadd.f32 %v2946_v15, %v2945_v59  ;;  %v6829_v59 = vadd.f32 %v3245_v17, %v3239_v32  ;;  %v3230_v15 = vmul.f32 %v3225_v52, %v6675_v29 }
 0x45e   :  { %v3253_v62 = vadd.f32 %v3245_v17, %v3233_v46 }
 0x45f   :  { %v2911_v26 = vadd.f32 %v2910_v3, %v2909_v41  ;;  %v2948_v30 = vrot.slane %v2947_v2, 2  ;;  %v3229_v41 = vmul.f32 %v6660_v5, %v3225_v52  ;;  %v6833_v3 = vadd.f32 %v3245_v17, %v3226_v6 }
 0x460   :  { %v3236_v5 = vmul.f32 %v6690_v38, %v3225_v52  ;;  %v3250_v31 = vadd.f32 %v3245_v17, %v3230_v15  ;;  %v3255_v38 = vadd.f32 %v3245_v17, %v3235_v13 }
 0x461   :  { %v2912_v53 = vrot.slane %v2911_v26, 1  ;;  %v2949_v47 = vadd.f32 %v2948_v30, %v2947_v2  ;;  %v2965_v2 = vsub.s32 4, %v7393_v24  ;;  %v6838_v30 = vadd.f32 %v3245_v17, %v3227_v58 }
 0x462   :  { %v3256_v57 = vadd.f32 %v3245_v17, %v3236_v5 }
 0x463   :  { %v2913_v21 = vadd.f32 %v2912_v53, %v2911_v26  ;;  %v2950_v35 = vrot.slane %v2949_v47, 1  ;;  %v3231_v26 = vmul.f32 %v3225_v52, %v6685_v42  ;;  %v3237_v53 = vmul.f32 %v6700_v10, %v3225_v52 }
 0x464   :  { %v3248_v42 = vadd.f32 %v3245_v17, %v3228_v4  ;;  %v2985_v10 = vsub.s32 5, %v7393_v24 }
 0x465   :  { %v2914_v18 = vmul.f32 0.0078125, %v2913_v21  ;;  %v2951_v0 = vadd.f32 %v2950_v35, %v2949_v47  ;;  %v3238_v47 = vmul.f32 %v3225_v52, %v6715_v12  ;;  %v3241_v21 = vmul.f32 %v6720_v22, %v3225_v52 }
 0x466   :  { %v3249_v35 = vadd.f32 %v3245_v17, %v3229_v41  ;;  %v3251_v34 = vadd.f32 %v3245_v17, %v3231_v26  ;;  %v3260_v22 = vadd.f32 %v3245_v17, %v3240_v40 }
 0x467   :  { %v2952_v28 = vmul.f32 0.0078125, %v2951_v0  ;;  %v2953_v7 = vmul.f32 %v2914_v18, %v2914_v18  ;;  %v3258_v12 = vadd.f32 %v3245_v17, %v3238_v47  ;;  %v3261_v37 = vadd.f32 %v3245_v17, %v3241_v21 }
 0x469   :  { %v2954_v11 = vsub.f32 %v2952_v28, %v2953_v7  ;;  %v3252_v28 = vadd.f32 %v3245_v17, %v3232_v36  ;;  %v3254_v7 = vadd.f32 %v3245_v17, %v3234_v51 }
 0x46b   :  { %v2955_v44 = vadd.f32 1e-05, %v2954_v11 }
 0x46d   :  { %4033 = vrsqrt.f32 %v2955_v44  ;;  %v3257_v44 = vadd.f32 %v3245_v17, %v3237_v53 }
 0x47a   :  { %v4034_v60 = vpop.eup %4033 }
 0x47b   :  { %v2957_v29 = vmul.f32 %v6638_v56, %v4034_v60 }
 0x47d   :  { %v2958_v27 = vmul.f32 %v2957_v29, %v2914_v18  ;;  %v2966_v0 = vrot.slane %v2957_v29, %v2965_v2 }
 0x47f   :  { %v2960_v11 = vrot.slane %v2958_v27, 7  ;;  %v2967_v49 = vmul.f32 %v2966_v0, %v6738_v45  ;;  %v2968_v8 = vmul.f32 %v2966_v0, %v6742_v54  ;;  %v2969_v20 = vmul.f32 %v6736_v33, %v2966_v0 }
 0x480   :  { %v2970_v52 = vmul.f32 %v6740_v61, %v2966_v0  ;;  %v2971_v48 = vmul.f32 %v2966_v0, %v6755_v16  ;;  %v2972_v32 = vmul.f32 %v2966_v0, %v6765_v39  ;;  %v2973_v24 = vmul.f32 %v6750_v25, %v2966_v0 }
 0x481   :  { %v2962_v18 = vsub.f32 %v6638_v56, %v2960_v11  ;;  %v2974_v6 = vmul.f32 %v6760_v1, %v2966_v0  ;;  %v2975_v45 = vmul.f32 %v2966_v0, %v6777_v19  ;;  %v2976_v54 = vmul.f32 %v2966_v0, %v6789_v23 }
 0x482   :  { %v2977_v17 = vmul.f32 %v6772_v63, %v2966_v0  ;;  %v2978_v56 = vmul.f32 %v6784_v50, %v2966_v0  ;;  %v2979_v33 = vmul.f32 %v2966_v0, %v6799_v9  ;;  %v2980_v61 = vmul.f32 %v2966_v0, %v6809_v43 }
 0x483   :  { %v2986_v58 = vrot.slane %v2962_v18, %v2985_v10  ;;  %v2981_v16 = vmul.f32 %v6794_v14, %v2966_v0  ;;  %v2982_v39 = vmul.f32 %v6804_v55, %v2966_v0 }
 0x485   :  { %v2987_v25 = vadd.f32 %v2986_v58, %v2967_v49  ;;  %v2988_v4 = vadd.f32 %v2986_v58, %v2968_v8  ;;  %v2989_v1 = vadd.f32 %v2986_v58, %v2969_v20  ;;  %v2990_v41 = vadd.f32 %v2986_v58, %v2970_v52 }
 0x486   :  { %v2991_v19 = vadd.f32 %v2986_v58, %v2971_v48  ;;  %v2992_v15 = vadd.f32 %v2986_v58, %v2972_v32  ;;  %v2993_v23 = vadd.f32 %v2986_v58, %v2973_v24  ;;  %v2994_v2 = vadd.f32 %v2986_v58, %v2974_v6 }
 0x487   :  { %v2995_v63 = vadd.f32 %v2986_v58, %v2975_v45  ;;  %v2996_v26 = vadd.f32 %v2986_v58, %v2976_v54  ;;  %v2997_v50 = vadd.f32 %v2986_v58, %v2977_v17  ;;  %v2998_v36 = vadd.f32 %v2986_v58, %v2978_v56 }
 0x488   :  { %v2999_v60 = vadd.f32 %v2986_v58, %v2979_v33  ;;  %v3000_v9 = vadd.f32 %v2986_v58, %v2980_v61  ;;  %v3001_v46 = vadd.f32 %v2986_v58, %v2981_v16  ;;  %v3002_v43 = vadd.f32 %v2986_v58, %v2982_v39 }
 0x489   :  { %v3262_v14 = vadd.f32 %v6833_v3, %v2987_v25  ;;  %v3263_v55 = vadd.f32 %v6838_v30, %v2988_v4  ;;  %v3264_v51 = vadd.f32 %v3248_v42, %v2989_v1  ;;  %v3265_v13 = vadd.f32 %v3249_v35, %v2990_v41 }
 0x48a   :  { %v3266_v5 = vadd.f32 %v3250_v31, %v2991_v19  ;;  %v3267_v29 = vadd.f32 %v3251_v34, %v2992_v15  ;;  %v3268_v53 = vadd.f32 %v3252_v28, %v2993_v23  ;;  %v3269_v47 = vadd.f32 %v3253_v62, %v2994_v2 }
 0x48b   :  { %v3270_v40 = vadd.f32 %v3254_v7, %v2995_v63  ;;  %v3271_v21 = vadd.f32 %v3255_v38, %v2996_v26  ;;  %v3272_v27 = vadd.f32 %v3256_v57, %v2997_v50  ;;  %v3273_v0 = vadd.f32 %v3257_v44, %v2998_v36 }
 0x48c   :  { %v3274_v11 = vadd.f32 %v3258_v12, %v2999_v60  ;;  %v3275_v10 = vadd.f32 %v6829_v59, %v3000_v9  ;;  %v3276_v49 = vadd.f32 %v3260_v22, %v3001_v46  ;;  %v3277_v8 = vadd.f32 %v3261_v37, %v3002_v43 }
 0x48d   :  { %v3278_v18 = vmax.f32 %v3262_v14, 0.0  ;;  %v3279_v20 = vmax.f32 %v3263_v55, 0.0  ;;  %v3280_v3 = vmax.f32 %v3264_v51, 0.0  ;;  %v3281_v52 = vmax.f32 %v3265_v13, 0.0 }
 0x48e   :  { %v3282_v30 = vmax.f32 %v3266_v5, 0.0  ;;  %v3283_v42 = vmax.f32 %v3267_v29, 0.0  ;;  %v3284_v35 = vmax.f32 %v3268_v53, 0.0  ;;  %v3285_v31 = vmax.f32 %v3269_v47, 0.0 }
 0x48f   :  { %v3286_v34 = vmax.f32 %v3270_v40, 0.0  ;;  %v3287_v28 = vmax.f32 %v3271_v21, 0.0  ;;  %v3288_v62 = vmax.f32 %v3272_v27, 0.0  ;;  %v3289_v7 = vmax.f32 %v3273_v0, 0.0  ;;  %3294 = vst [vmem:[%s6925_s7] sm:$0xff] %v3278_v18  ;;  %3295 = vst [vmem:[%s6925_s7 + $0x8] sm:$0xff] %v3279_v20 }
 0x490   :  { %3296 = vst [vmem:[%s6925_s7 + $0x10] sm:$0xff] %v3280_v3  ;;  %3297 = vst [vmem:[%s6925_s7 + $0x18] sm:$0xff] %v3281_v52  ;;  %v3290_v59 = vmax.f32 %v3274_v11, 0.0  ;;  %v3291_v38 = vmax.f32 %v3275_v10, 0.0  ;;  %v3292_v57 = vmax.f32 %v3276_v49, 0.0  ;;  %v3293_v44 = vmax.f32 %v3277_v8, 0.0 }
 0x491   :  { %3298 = vst [vmem:[%s6925_s7 + $0x20] sm:$0xff] %v3282_v30  ;;  %3299 = vst [vmem:[%s6925_s7 + $0x28] sm:$0xff] %v3283_v42 }
 0x492   :  { %3300 = vst [vmem:[%s6925_s7 + $0x30] sm:$0xff] %v3284_v35  ;;  %3301 = vst [vmem:[%s6925_s7 + $0x38] sm:$0xff] %v3285_v31 }
 0x493   :  { %3302 = vst [vmem:[%s6925_s7 + $0x40] sm:$0xff] %v3286_v34  ;;  %3303 = vst [vmem:[%s6925_s7 + $0x48] sm:$0xff] %v3287_v28 }
 0x494   :  { %3304 = vst [vmem:[%s6925_s7 + $0x50] sm:$0xff] %v3288_v62  ;;  %3305 = vst [vmem:[%s6925_s7 + $0x58] sm:$0xff] %v3289_v7 }
 0x495   :  { %3306 = vst [vmem:[%s6925_s7 + $0x60] sm:$0xff] %v3290_v59  ;;  %3307 = vst [vmem:[%s6925_s7 + $0x68] sm:$0xff] %v3291_v38 }
 0x496   :  { %3308 = vst [vmem:[%s6925_s7 + $0x70] sm:$0xff] %v3292_v57  ;;  %3309 = vst [vmem:[%s6925_s7 + $0x78] sm:$0xff] %v3293_v44 }

</bundles_post_ra>
